<compile_context>
chip_gen: v7x
topology: tpu7x:2x2x1
jax: 0.10.0
libtpu: 0.0.40
codegen_flags: <defaults>
</compile_context>

<pallas_src>
import jax
import jax.numpy as jnp
from jax.experimental import pallas as pl
from jax.experimental.pallas import tpu as pltpu

LEAKY_SLOPE = 0.2


def _leaky_relu(x, slope):
    return jnp.where(x >= 0, x, slope * x)


def sft_kernel(x_ref,      # (H+2, W, 3*c_in)   dw-folded, zero-padded cat input (lane-dense)
               feat_ref,   # (nf, H*W)          feature maps, NCHW-flat (channels on sublanes)
               w1_ref,     # (3, 3*c_in, 2*c_mid)  fused [mul|add] conv1 weight, dw folded in K
               b1_ref,     # (1, 2*c_mid)          fused conv1 bias
               w2_ref,     # (9, 2*c_mid, 2*nf)    block-diagonal fused conv2 weight
               b2_ref,     # (1, 2*nf)             fused conv2 bias
               o_ref,      # (nf, H*W)          lane-dense output (already NCHW-flat)
               h_scr):     # (H+2, W+2, 2*c_mid) zero-haloed fused hidden activations
    H = x_ref.shape[0] - 2
    W = x_ref.shape[1]
    k1 = x_ref.shape[2]                 # 3*c_in
    HW = H * W
    nf = o_ref.shape[0]
    c2 = h_scr.shape[-1]                # 2*c_mid  (fused [mul | add] hidden width)
    nf2 = w2_ref.shape[-1]              # 2*nf

    # ---- conv1 (both branches fused, dw taps folded into K): 3 slices + 3 dots ----------
    # Leading-dim slices are pure pointer offsets; reshape (H,W,k1)->(HW,k1) is
    # layout-preserving because W % 8 == 0.  Bias is folded into the first tap.
    # (Default MXU precision; pass precision=HIGHEST to the dots if tighter agreement with
    #  the XLA-conv reference is ever required.)
    acc1 = jnp.dot(x_ref[0:H, :, :].reshape(HW, k1), w1_ref[0],
                   preferred_element_type=jnp.float32) + b1_ref[...]
    for dh in (1, 2):
        acc1 = acc1 + jnp.dot(x_ref[dh:dh + H, :, :].reshape(HW, k1), w1_ref[dh],
                              preferred_element_type=jnp.float32)
    h = _leaky_relu(acc1, LEAKY_SLOPE)                      # (HW, 2*c_mid): [mul | add]

    # ---- zero-haloed fused scratch for conv2's padding -----------------------------------
    # Only the 1-px border strips are zeroed (cheap); the interior is fully overwritten.
    # Not guarded by program_id==0 on purpose: with a "parallel" batch axis each TensorCore
    # has its own private scratch copy and would otherwise see an uninitialized halo.
    h_scr[0:1, :, :] = jnp.zeros((1, W + 2, c2), jnp.float32)
    h_scr[H + 1:H + 2, :, :] = jnp.zeros((1, W + 2, c2), jnp.float32)
    h_scr[:, 0:1, :] = jnp.zeros((H + 2, 1, c2), jnp.float32)
    h_scr[:, W + 1:W + 2, :] = jnp.zeros((H + 2, 1, c2), jnp.float32)
    h_scr[1:H + 1, 1:W + 1, :] = h.reshape(H, W, c2)

    # ---- conv2 (both branches fused via block-diagonal weight): 9 slices + 9 dots --------
    acc2 = jnp.dot(h_scr[0:H, 0:W, :].reshape(HW, c2), w2_ref[0],
                   preferred_element_type=jnp.float32) + b2_ref[...]
    for tap in range(1, 9):
        dh, dw = tap // 3, tap % 3
        p = h_scr[dh:dh + H, dw:dw + W, :].reshape(HW, c2)
        acc2 = acc2 + jnp.dot(p, w2_ref[tap], preferred_element_type=jnp.float32)

    # ---- one XLU transpose -> lane-dense (channels on sublanes, pixels on lanes) ---------
    res_t = acc2.T                                          # (2*nf, HW)
    mul_t = 1.0 / (1.0 + jnp.exp(-res_t[0:nf, :]))          # sigmoid (exp -> EUP slot)
    add_t = res_t[nf:nf2, :]
    o_ref[...] = feat_ref[...] * mul_t + add_t              # unmasked full-lane stores


def sft_layer_forward(feature_maps, para_maps, params):
    """feature_maps: (B, nf, H, W) f32; para_maps: (B, para, H, W) f32 (NCHW, PyTorch layout).

    params: dict of HWIO conv weights (3,3,Cin,Cout) and biases (Cout,):
       w1_mul/b1_mul/w2_mul/b2_mul, w1_add/b1_add/w2_add/b2_add
    Returns (B, nf, H, W) f32.
    """
    B, nf, H, W = feature_maps.shape
    assert para_maps.shape[0] == B and para_maps.shape[2:] == (H, W)
    para = para_maps.shape[1]
    c_in = nf + para
    c_mid = params["w1_mul"].shape[-1]
    assert params["w2_mul"].shape[-1] == nf and params["w2_add"].shape[-1] == nf
    c2, nf2 = 2 * c_mid, 2 * nf
    k1 = 3 * c_in
    HW = H * W
    f32 = jnp.float32

    # --- layout plumbing outside the kernel: NCHW -> NHWC, channel concat, 1px zero pad ---
    x_nhwc = jnp.concatenate(
        [jnp.transpose(feature_maps, (0, 2, 3, 1)),
         jnp.transpose(para_maps, (0, 2, 3, 1))], axis=-1).astype(f32)      # (B,H,W,c_in)
    xp = jnp.pad(x_nhwc, ((0, 0), (1, 1), (1, 1), (0, 0)))                  # (B,H+2,W+2,c_in)
    # Fold conv1's three dw (column) taps into the channel/lane dimension -> lane-dense input.
    x_shift = jnp.concatenate(
        [xp[:, :, 0:W, :], xp[:, :, 1:W + 1, :], xp[:, :, 2:W + 2, :]],
        axis=-1)                                                            # (B,H+2,W,3*c_in)

    # Feature maps stay in their native NCHW layout, flattened -> lane-dense (nf, H*W).
    feat_flat = feature_maps.reshape(B, nf, HW).astype(f32)

    # Fused conv1 weight: [w1_mul | w1_add] along Cout, dw folded into K (matches x_shift).
    w1f = jnp.concatenate([params["w1_mul"], params["w1_add"]], axis=-1)    # (3,3,c_in,2*c_mid)
    w1f = w1f.reshape(3, k1, c2).astype(f32)
    b1f = jnp.concatenate([params["b1_mul"], params["b1_add"]]).reshape(1, c2).astype(f32)

    # Fused conv2 weight: block-diagonal so the mul/add branches stay independent.
    z = jnp.zeros_like(params["w2_mul"])
    w2f = jnp.concatenate(
        [jnp.concatenate([params["w2_mul"], z], axis=-1),                   # [w2_mul | 0 ]
         jnp.concatenate([z, params["w2_add"]], axis=-1)], axis=2)          # [  0    | w2_add]
    w2f = w2f.reshape(9, c2, nf2).astype(f32)                               # (9,2*c_mid,2*nf)
    b2f = jnp.concatenate([params["b2_mul"], params["b2_add"]]).reshape(1, nf2).astype(f32)

    def const_spec(shape):
        return pl.BlockSpec(shape, lambda b, _n=len(shape): (0,) * _n)

    out_flat = pl.pallas_call(
        sft_kernel,
        out_shape=jax.ShapeDtypeStruct((B, nf, HW), f32),
        grid=(B,),
        in_specs=[
            pl.BlockSpec((None, H + 2, W, k1), lambda b: (b, 0, 0, 0)),     # x_shift
            pl.BlockSpec((None, nf, HW), lambda b: (b, 0, 0)),              # feature_maps
            const_spec((3, k1, c2)), const_spec((1, c2)),                   # conv1 w/b
            const_spec((9, c2, nf2)), const_spec((1, nf2)),                 # conv2 w/b
        ],
        out_specs=pl.BlockSpec((None, nf, HW), lambda b: (b, 0, 0)),
        scratch_shapes=[pltpu.VMEM((H + 2, W + 2, c2), jnp.float32)],
        compiler_params=pltpu.CompilerParams(
            dimension_semantics=("parallel",),          # batch axis: 2-TC sharding on v7x
            vmem_limit_bytes=32 * 1024 * 1024),
    )(x_shift, feat_flat, w1f, b1f, w2f, b2f)

    return out_flat.reshape(B, nf, H, W)                 # already NCHW-flat: reshape only


def sft_layer_reference(feature_maps, para_maps, params):
    """Pure-JAX reference (lax conv), same math as the PyTorch module."""
    x = jnp.concatenate(
        [jnp.transpose(feature_maps, (0, 2, 3, 1)),
         jnp.transpose(para_maps, (0, 2, 3, 1))], axis=-1)            # NHWC

    def conv(inp, w, b):
        out = jax.lax.conv_general_dilated(
            inp, w, window_strides=(1, 1), padding=((1, 1), (1, 1)),
            dimension_numbers=("NHWC", "HWIO", "NHWC"),
            precision=jax.lax.Precision.HIGHEST)
        return out + b

    h_m = _leaky_relu(conv(x, params["w1_mul"], params["b1_mul"]), 0.2)
    mul = jax.nn.sigmoid(conv(h_m, params["w2_mul"], params["b2_mul"]))
    h_a = _leaky_relu(conv(x, params["w1_add"], params["b1_add"]), 0.2)
    add = conv(h_a, params["w2_add"], params["b2_add"])

    out = jnp.transpose(feature_maps, (0, 2, 3, 1)) * mul + add
    return jnp.transpose(out, (0, 3, 1, 2))


if __name__ == "__main__":
    # Small shapes consistent with the module: nf feature channels, para=10 degradation maps.
    nf, para = 32, 10
    B, H, W = 2, 16, 16
    c_in, c_mid = nf + para, 32        # hidden width of the SFT layer is fixed at 32

    key = jax.random.PRNGKey(0)
    ks = jax.random.split(key, 10)

    feature_maps = jax.random.normal(ks[0], (B, nf, H, W), dtype=jnp.float32)
    para_maps = jax.random.normal(ks[1], (B, para, H, W), dtype=jnp.float32)

    def conv_w(k, ci, co):
        return jax.random.normal(k, (3, 3, ci, co), dtype=jnp.float32) / jnp.sqrt(9.0 * ci)

    params = {
        "w1_mul": conv_w(ks[2], c_in, c_mid),
        "b1_mul": jax.random.normal(ks[3], (c_mid,), dtype=jnp.float32) * 0.1,
        "w2_mul": conv_w(ks[4], c_mid, nf),
        "b2_mul": jax.random.normal(ks[5], (nf,), dtype=jnp.float32) * 0.1,
        "w1_add": conv_w(ks[6], c_in, c_mid),
        "b1_add": jax.random.normal(ks[7], (c_mid,), dtype=jnp.float32) * 0.1,
        "w2_add": conv_w(ks[8], c_mid, nf),
        "b2_add": jax.random.normal(ks[9], (nf,), dtype=jnp.float32) * 0.1,
    }

    out = jax.block_until_ready(sft_layer_forward(feature_maps, para_maps, params))
    ref = sft_layer_reference(feature_maps, para_maps, params)

    assert out.shape == (B, nf, H, W)
    max_err = float(jnp.max(jnp.abs(out - ref)))
    # Tolerance covers MXU f32 accumulation-order / multi-pass differences vs the XLA conv.
    assert jnp.allclose(out, ref, atol=5e-3, rtol=5e-3), f"mismatch vs reference (max abs err {max_err})"

    print("KERNEL_OK")
</pallas_src>

<mosaic_0001>
module attributes {stable_mosaic.version = 11 : i64} {
  func.func @sft_kernel(%arg0: i32, %arg1: memref<1x18x16x126xf32, #tpu.memory_space<vmem>>, %arg2: memref<1x32x256xf32, #tpu.memory_space<vmem>>, %arg3: memref<3x126x64xf32, #tpu.memory_space<vmem>>, %arg4: memref<1x64xf32, #tpu.memory_space<vmem>>, %arg5: memref<9x64x64xf32, #tpu.memory_space<vmem>>, %arg6: memref<1x64xf32, #tpu.memory_space<vmem>>, %arg7: memref<1x32x256xf32, #tpu.memory_space<vmem>>, %arg8: memref<18x18x64xf32, #tpu.memory_space<vmem>>) attributes {dimension_semantics = [#tpu.dimension_semantics<parallel>], iteration_bounds = array<i64: 2>, scalar_prefetch = 0 : i64, scratch_operands = 1 : i64, tpu.core_type = #tpu.core_type<tc>, window_params = [{transform_indices = @transform_0, window_bounds = array<i64: 1, 18, 16, 126>}, {transform_indices = @transform_1, window_bounds = array<i64: 1, 32, 256>}, {pipeline_mode = #tpu.pipeline_mode<synchronous>, transform_indices = @transform_2, window_bounds = array<i64: 3, 126, 64>}, {pipeline_mode = #tpu.pipeline_mode<synchronous>, transform_indices = @transform_3, window_bounds = array<i64: 1, 64>}, {pipeline_mode = #tpu.pipeline_mode<synchronous>, transform_indices = @transform_4, window_bounds = array<i64: 9, 64, 64>}, {pipeline_mode = #tpu.pipeline_mode<synchronous>, transform_indices = @transform_5, window_bounds = array<i64: 1, 64>}, {transform_indices = @transform_6, window_bounds = array<i64: 1, 32, 256>}]} {
    %c0 = arith.constant 0 : index
    %c0_0 = arith.constant 0 : index
    %c0_1 = arith.constant 0 : index
    %c0_2 = arith.constant 0 : index
    %0 = vector.load %arg1[%c0, %c0_0, %c0_1, %c0_2] : memref<1x18x16x126xf32, #tpu.memory_space<vmem>>, vector<1x16x16x126xf32>
    %1 = vector.shape_cast %0 : vector<1x16x16x126xf32> to vector<16x16x126xf32>
    %2 = vector.shape_cast %1 : vector<16x16x126xf32> to vector<256x126xf32>
    %c0_3 = arith.constant 0 : index
    %c0_4 = arith.constant 0 : index
    %c0_5 = arith.constant 0 : index
    %3 = vector.load %arg3[%c0_3, %c0_4, %c0_5] : memref<3x126x64xf32, #tpu.memory_space<vmem>>, vector<1x126x64xf32>
    %4 = vector.shape_cast %3 : vector<1x126x64xf32> to vector<126x64xf32>
    %cst = arith.constant dense<0.000000e+00> : vector<256x64xf32>
    %5 = tpu.matmul %2, %4, %cst {dimension_numbers = #tpu.dot_dimension_numbers<[1], [0], [0], [1], [0, 0, 1, 1], [], []>} : vector<256x126xf32>, vector<126x64xf32>, vector<256x64xf32> -> vector<256x64xf32>
    %c0_6 = arith.constant 0 : index
    %c0_7 = arith.constant 0 : index
    %6 = vector.load %arg4[%c0_6, %c0_7] : memref<1x64xf32, #tpu.memory_space<vmem>>, vector<1x64xf32>
    %7 = vector.broadcast %6 : vector<1x64xf32> to vector<256x64xf32>
    %8 = arith.addf %5, %7 : vector<256x64xf32>
    %c0_8 = arith.constant 0 : index
    %c1 = arith.constant 1 : index
    %c0_9 = arith.constant 0 : index
    %c0_10 = arith.constant 0 : index
    %9 = vector.load %arg1[%c0_8, %c1, %c0_9, %c0_10] : memref<1x18x16x126xf32, #tpu.memory_space<vmem>>, vector<1x16x16x126xf32>
    %10 = vector.shape_cast %9 : vector<1x16x16x126xf32> to vector<16x16x126xf32>
    %11 = vector.shape_cast %10 : vector<16x16x126xf32> to vector<256x126xf32>
    %c1_11 = arith.constant 1 : index
    %c0_12 = arith.constant 0 : index
    %c0_13 = arith.constant 0 : index
    %12 = vector.load %arg3[%c1_11, %c0_12, %c0_13] : memref<3x126x64xf32, #tpu.memory_space<vmem>>, vector<1x126x64xf32>
    %13 = vector.shape_cast %12 : vector<1x126x64xf32> to vector<126x64xf32>
    %cst_14 = arith.constant dense<0.000000e+00> : vector<256x64xf32>
    %14 = tpu.matmul %11, %13, %cst_14 {dimension_numbers = #tpu.dot_dimension_numbers<[1], [0], [0], [1], [0, 0, 1, 1], [], []>} : vector<256x126xf32>, vector<126x64xf32>, vector<256x64xf32> -> vector<256x64xf32>
    %15 = arith.addf %8, %14 : vector<256x64xf32>
    %c0_15 = arith.constant 0 : index
    %c2 = arith.constant 2 : index
    %c0_16 = arith.constant 0 : index
    %c0_17 = arith.constant 0 : index
    %16 = vector.load %arg1[%c0_15, %c2, %c0_16, %c0_17] : memref<1x18x16x126xf32, #tpu.memory_space<vmem>>, vector<1x16x16x126xf32>
    %17 = vector.shape_cast %16 : vector<1x16x16x126xf32> to vector<16x16x126xf32>
    %18 = vector.shape_cast %17 : vector<16x16x126xf32> to vector<256x126xf32>
    %c2_18 = arith.constant 2 : index
    %c0_19 = arith.constant 0 : index
    %c0_20 = arith.constant 0 : index
    %19 = vector.load %arg3[%c2_18, %c0_19, %c0_20] : memref<3x126x64xf32, #tpu.memory_space<vmem>>, vector<1x126x64xf32>
    %20 = vector.shape_cast %19 : vector<1x126x64xf32> to vector<126x64xf32>
    %cst_21 = arith.constant dense<0.000000e+00> : vector<256x64xf32>
    %21 = tpu.matmul %18, %20, %cst_21 {dimension_numbers = #tpu.dot_dimension_numbers<[1], [0], [0], [1], [0, 0, 1, 1], [], []>} : vector<256x126xf32>, vector<126x64xf32>, vector<256x64xf32> -> vector<256x64xf32>
    %22 = arith.addf %15, %21 : vector<256x64xf32>
    %cst_22 = arith.constant 0.000000e+00 : f32
    %23 = vector.broadcast %cst_22 : f32 to vector<256x64xf32>
    %24 = arith.cmpf oge, %22, %23 : vector<256x64xf32>
    %cst_23 = arith.constant 2.000000e-01 : f32
    %25 = vector.broadcast %cst_23 : f32 to vector<256x64xf32>
    %26 = arith.mulf %25, %22 : vector<256x64xf32>
    %27 = arith.select %24, %22, %26 : vector<256x64xi1>, vector<256x64xf32>
    %cst_24 = arith.constant 0.000000e+00 : f32
    %28 = vector.broadcast %cst_24 : f32 to vector<1x18x64xf32>
    %c0_25 = arith.constant 0 : index
    %c0_26 = arith.constant 0 : index
    %c0_27 = arith.constant 0 : index
    %29 = vector.load %arg8[%c0_25, %c0_26, %c0_27] : memref<18x18x64xf32, #tpu.memory_space<vmem>>, vector<1x18x64xf32>
    tpu.vector_store %arg8[%c0_25, %c0_26, %c0_27], %28 {strides = array<i32>} : memref<18x18x64xf32, #tpu.memory_space<vmem>>, vector<1x18x64xf32>,
    %cst_28 = arith.constant 0.000000e+00 : f32
    %30 = vector.broadcast %cst_28 : f32 to vector<1x18x64xf32>
    %c17 = arith.constant 17 : index
    %c0_29 = arith.constant 0 : index
    %c0_30 = arith.constant 0 : index
    %31 = vector.load %arg8[%c17, %c0_29, %c0_30] : memref<18x18x64xf32, #tpu.memory_space<vmem>>, vector<1x18x64xf32>
    tpu.vector_store %arg8[%c17, %c0_29, %c0_30], %30 {strides = array<i32>} : memref<18x18x64xf32, #tpu.memory_space<vmem>>, vector<1x18x64xf32>,
    %cst_31 = arith.constant 0.000000e+00 : f32
    %32 = vector.broadcast %cst_31 : f32 to vector<18x1x64xf32>
    %c0_32 = arith.constant 0 : index
    %c0_33 = arith.constant 0 : index
    %c0_34 = arith.constant 0 : index
    %33 = vector.load %arg8[%c0_32, %c0_33, %c0_34] : memref<18x18x64xf32, #tpu.memory_space<vmem>>, vector<18x1x64xf32>
    tpu.vector_store %arg8[%c0_32, %c0_33, %c0_34], %32 {strides = array<i32>} : memref<18x18x64xf32, #tpu.memory_space<vmem>>, vector<18x1x64xf32>,
    %cst_35 = arith.constant 0.000000e+00 : f32
    %34 = vector.broadcast %cst_35 : f32 to vector<18x1x64xf32>
    %c0_36 = arith.constant 0 : index
    %c17_37 = arith.constant 17 : index
    %c0_38 = arith.constant 0 : index
    %35 = vector.load %arg8[%c0_36, %c17_37, %c0_38] : memref<18x18x64xf32, #tpu.memory_space<vmem>>, vector<18x1x64xf32>
    tpu.vector_store %arg8[%c0_36, %c17_37, %c0_38], %34 {strides = array<i32>} : memref<18x18x64xf32, #tpu.memory_space<vmem>>, vector<18x1x64xf32>,
    %36 = vector.shape_cast %27 : vector<256x64xf32> to vector<16x16x64xf32>
    %c1_39 = arith.constant 1 : index
    %c1_40 = arith.constant 1 : index
    %c0_41 = arith.constant 0 : index
    %37 = vector.load %arg8[%c1_39, %c1_40, %c0_41] : memref<18x18x64xf32, #tpu.memory_space<vmem>>, vector<16x16x64xf32>
    tpu.vector_store %arg8[%c1_39, %c1_40, %c0_41], %36 {strides = array<i32>} : memref<18x18x64xf32, #tpu.memory_space<vmem>>, vector<16x16x64xf32>,
    %c0_42 = arith.constant 0 : index
    %c0_43 = arith.constant 0 : index
    %c0_44 = arith.constant 0 : index
    %38 = vector.load %arg8[%c0_42, %c0_43, %c0_44] : memref<18x18x64xf32, #tpu.memory_space<vmem>>, vector<16x16x64xf32>
    %39 = vector.shape_cast %38 : vector<16x16x64xf32> to vector<256x64xf32>
    %c0_45 = arith.constant 0 : index
    %c0_46 = arith.constant 0 : index
    %c0_47 = arith.constant 0 : index
    %40 = vector.load %arg5[%c0_45, %c0_46, %c0_47] : memref<9x64x64xf32, #tpu.memory_space<vmem>>, vector<1x64x64xf32>
    %41 = vector.shape_cast %40 : vector<1x64x64xf32> to vector<64x64xf32>
    %cst_48 = arith.constant dense<0.000000e+00> : vector<256x64xf32>
    %42 = tpu.matmul %39, %41, %cst_48 {dimension_numbers = #tpu.dot_dimension_numbers<[1], [0], [0], [1], [0, 0, 1, 1], [], []>} : vector<256x64xf32>, vector<64x64xf32>, vector<256x64xf32> -> vector<256x64xf32>
    %c0_49 = arith.constant 0 : index
    %c0_50 = arith.constant 0 : index
    %43 = vector.load %arg6[%c0_49, %c0_50] : memref<1x64xf32, #tpu.memory_space<vmem>>, vector<1x64xf32>
    %44 = vector.broadcast %43 : vector<1x64xf32> to vector<256x64xf32>
    %45 = arith.addf %42, %44 : vector<256x64xf32>
    %c0_51 = arith.constant 0 : index
    %c1_52 = arith.constant 1 : index
    %c0_53 = arith.constant 0 : index
    %46 = vector.load %arg8[%c0_51, %c1_52, %c0_53] : memref<18x18x64xf32, #tpu.memory_space<vmem>>, vector<16x16x64xf32>
    %47 = vector.shape_cast %46 : vector<16x16x64xf32> to vector<256x64xf32>
    %c1_54 = arith.constant 1 : index
    %c0_55 = arith.constant 0 : index
    %c0_56 = arith.constant 0 : index
    %48 = vector.load %arg5[%c1_54, %c0_55, %c0_56] : memref<9x64x64xf32, #tpu.memory_space<vmem>>, vector<1x64x64xf32>
    %49 = vector.shape_cast %48 : vector<1x64x64xf32> to vector<64x64xf32>
    %cst_57 = arith.constant dense<0.000000e+00> : vector<256x64xf32>
    %50 = tpu.matmul %47, %49, %cst_57 {dimension_numbers = #tpu.dot_dimension_numbers<[1], [0], [0], [1], [0, 0, 1, 1], [], []>} : vector<256x64xf32>, vector<64x64xf32>, vector<256x64xf32> -> vector<256x64xf32>
    %51 = arith.addf %45, %50 : vector<256x64xf32>
    %c0_58 = arith.constant 0 : index
    %c2_59 = arith.constant 2 : index
    %c0_60 = arith.constant 0 : index
    %52 = vector.load %arg8[%c0_58, %c2_59, %c0_60] : memref<18x18x64xf32, #tpu.memory_space<vmem>>, vector<16x16x64xf32>
    %53 = vector.shape_cast %52 : vector<16x16x64xf32> to vector<256x64xf32>
    %c2_61 = arith.constant 2 : index
    %c0_62 = arith.constant 0 : index
    %c0_63 = arith.constant 0 : index
    %54 = vector.load %arg5[%c2_61, %c0_62, %c0_63] : memref<9x64x64xf32, #tpu.memory_space<vmem>>, vector<1x64x64xf32>
    %55 = vector.shape_cast %54 : vector<1x64x64xf32> to vector<64x64xf32>
    %cst_64 = arith.constant dense<0.000000e+00> : vector<256x64xf32>
    %56 = tpu.matmul %53, %55, %cst_64 {dimension_numbers = #tpu.dot_dimension_numbers<[1], [0], [0], [1], [0, 0, 1, 1], [], []>} : vector<256x64xf32>, vector<64x64xf32>, vector<256x64xf32> -> vector<256x64xf32>
    %57 = arith.addf %51, %56 : vector<256x64xf32>
    %c1_65 = arith.constant 1 : index
    %c0_66 = arith.constant 0 : index
    %c0_67 = arith.constant 0 : index
    %58 = vector.load %arg8[%c1_65, %c0_66, %c0_67] : memref<18x18x64xf32, #tpu.memory_space<vmem>>, vector<16x16x64xf32>
    %59 = vector.shape_cast %58 : vector<16x16x64xf32> to vector<256x64xf32>
    %c3 = arith.constant 3 : index
    %c0_68 = arith.constant 0 : index
    %c0_69 = arith.constant 0 : index
    %60 = vector.load %arg5[%c3, %c0_68, %c0_69] : memref<9x64x64xf32, #tpu.memory_space<vmem>>, vector<1x64x64xf32>
    %61 = vector.shape_cast %60 : vector<1x64x64xf32> to vector<64x64xf32>
    %cst_70 = arith.constant dense<0.000000e+00> : vector<256x64xf32>
    %62 = tpu.matmul %59, %61, %cst_70 {dimension_numbers = #tpu.dot_dimension_numbers<[1], [0], [0], [1], [0, 0, 1, 1], [], []>} : vector<256x64xf32>, vector<64x64xf32>, vector<256x64xf32> -> vector<256x64xf32>
    %63 = arith.addf %57, %62 : vector<256x64xf32>
    %c1_71 = arith.constant 1 : index
    %c1_72 = arith.constant 1 : index
    %c0_73 = arith.constant 0 : index
    %64 = vector.load %arg8[%c1_71, %c1_72, %c0_73] : memref<18x18x64xf32, #tpu.memory_space<vmem>>, vector<16x16x64xf32>
    %65 = vector.shape_cast %64 : vector<16x16x64xf32> to vector<256x64xf32>
    %c4 = arith.constant 4 : index
    %c0_74 = arith.constant 0 : index
    %c0_75 = arith.constant 0 : index
    %66 = vector.load %arg5[%c4, %c0_74, %c0_75] : memref<9x64x64xf32, #tpu.memory_space<vmem>>, vector<1x64x64xf32>
    %67 = vector.shape_cast %66 : vector<1x64x64xf32> to vector<64x64xf32>
    %cst_76 = arith.constant dense<0.000000e+00> : vector<256x64xf32>
    %68 = tpu.matmul %65, %67, %cst_76 {dimension_numbers = #tpu.dot_dimension_numbers<[1], [0], [0], [1], [0, 0, 1, 1], [], []>} : vector<256x64xf32>, vector<64x64xf32>, vector<256x64xf32> -> vector<256x64xf32>
    %69 = arith.addf %63, %68 : vector<256x64xf32>
    %c1_77 = arith.constant 1 : index
    %c2_78 = arith.constant 2 : index
    %c0_79 = arith.constant 0 : index
    %70 = vector.load %arg8[%c1_77, %c2_78, %c0_79] : memref<18x18x64xf32, #tpu.memory_space<vmem>>, vector<16x16x64xf32>
    %71 = vector.shape_cast %70 : vector<16x16x64xf32> to vector<256x64xf32>
    %c5 = arith.constant 5 : index
    %c0_80 = arith.constant 0 : index
    %c0_81 = arith.constant 0 : index
    %72 = vector.load %arg5[%c5, %c0_80, %c0_81] : memref<9x64x64xf32, #tpu.memory_space<vmem>>, vector<1x64x64xf32>
    %73 = vector.shape_cast %72 : vector<1x64x64xf32> to vector<64x64xf32>
    %cst_82 = arith.constant dense<0.000000e+00> : vector<256x64xf32>
    %74 = tpu.matmul %71, %73, %cst_82 {dimension_numbers = #tpu.dot_dimension_numbers<[1], [0], [0], [1], [0, 0, 1, 1], [], []>} : vector<256x64xf32>, vector<64x64xf32>, vector<256x64xf32> -> vector<256x64xf32>
    %75 = arith.addf %69, %74 : vector<256x64xf32>
    %c2_83 = arith.constant 2 : index
    %c0_84 = arith.constant 0 : index
    %c0_85 = arith.constant 0 : index
    %76 = vector.load %arg8[%c2_83, %c0_84, %c0_85] : memref<18x18x64xf32, #tpu.memory_space<vmem>>, vector<16x16x64xf32>
    %77 = vector.shape_cast %76 : vector<16x16x64xf32> to vector<256x64xf32>
    %c6 = arith.constant 6 : index
    %c0_86 = arith.constant 0 : index
    %c0_87 = arith.constant 0 : index
    %78 = vector.load %arg5[%c6, %c0_86, %c0_87] : memref<9x64x64xf32, #tpu.memory_space<vmem>>, vector<1x64x64xf32>
    %79 = vector.shape_cast %78 : vector<1x64x64xf32> to vector<64x64xf32>
    %cst_88 = arith.constant dense<0.000000e+00> : vector<256x64xf32>
    %80 = tpu.matmul %77, %79, %cst_88 {dimension_numbers = #tpu.dot_dimension_numbers<[1], [0], [0], [1], [0, 0, 1, 1], [], []>} : vector<256x64xf32>, vector<64x64xf32>, vector<256x64xf32> -> vector<256x64xf32>
    %81 = arith.addf %75, %80 : vector<256x64xf32>
    %c2_89 = arith.constant 2 : index
    %c1_90 = arith.constant 1 : index
    %c0_91 = arith.constant 0 : index
    %82 = vector.load %arg8[%c2_89, %c1_90, %c0_91] : memref<18x18x64xf32, #tpu.memory_space<vmem>>, vector<16x16x64xf32>
    %83 = vector.shape_cast %82 : vector<16x16x64xf32> to vector<256x64xf32>
    %c7 = arith.constant 7 : index
    %c0_92 = arith.constant 0 : index
    %c0_93 = arith.constant 0 : index
    %84 = vector.load %arg5[%c7, %c0_92, %c0_93] : memref<9x64x64xf32, #tpu.memory_space<vmem>>, vector<1x64x64xf32>
    %85 = vector.shape_cast %84 : vector<1x64x64xf32> to vector<64x64xf32>
    %cst_94 = arith.constant dense<0.000000e+00> : vector<256x64xf32>
    %86 = tpu.matmul %83, %85, %cst_94 {dimension_numbers = #tpu.dot_dimension_numbers<[1], [0], [0], [1], [0, 0, 1, 1], [], []>} : vector<256x64xf32>, vector<64x64xf32>, vector<256x64xf32> -> vector<256x64xf32>
    %87 = arith.addf %81, %86 : vector<256x64xf32>
    %c2_95 = arith.constant 2 : index
    %c2_96 = arith.constant 2 : index
    %c0_97 = arith.constant 0 : index
    %88 = vector.load %arg8[%c2_95, %c2_96, %c0_97] : memref<18x18x64xf32, #tpu.memory_space<vmem>>, vector<16x16x64xf32>
    %89 = vector.shape_cast %88 : vector<16x16x64xf32> to vector<256x64xf32>
    %c8 = arith.constant 8 : index
    %c0_98 = arith.constant 0 : index
    %c0_99 = arith.constant 0 : index
    %90 = vector.load %arg5[%c8, %c0_98, %c0_99] : memref<9x64x64xf32, #tpu.memory_space<vmem>>, vector<1x64x64xf32>
    %91 = vector.shape_cast %90 : vector<1x64x64xf32> to vector<64x64xf32>
    %cst_100 = arith.constant dense<0.000000e+00> : vector<256x64xf32>
    %92 = tpu.matmul %89, %91, %cst_100 {dimension_numbers = #tpu.dot_dimension_numbers<[1], [0], [0], [1], [0, 0, 1, 1], [], []>} : vector<256x64xf32>, vector<64x64xf32>, vector<256x64xf32> -> vector<256x64xf32>
    %93 = arith.addf %87, %92 : vector<256x64xf32>
    %94 = tpu.transpose %93, [1, 0] : vector<256x64xf32> -> vector<64x256xf32>
    %95 = vector.extract_strided_slice %94 {offsets = [0, 0], sizes = [32, 256], strides = [1, 1]} : vector<64x256xf32> to vector<32x256xf32>
    %cst_101 = arith.constant 0.000000e+00 : f32
    %96 = vector.broadcast %cst_101 : f32 to vector<32x256xf32>
    %97 = arith.subf %96, %95 : vector<32x256xf32>
    %98 = math.exp %97 : vector<32x256xf32>
    %cst_102 = arith.constant 1.000000e+00 : f32
    %99 = vector.broadcast %cst_102 : f32 to vector<32x256xf32>
    %100 = arith.addf %99, %98 : vector<32x256xf32>
    %cst_103 = arith.constant 1.000000e+00 : f32
    %101 = vector.broadcast %cst_103 : f32 to vector<32x256xf32>
    %102 = arith.divf %101, %100 : vector<32x256xf32>
    %103 = vector.extract_strided_slice %94 {offsets = [32, 0], sizes = [32, 256], strides = [1, 1]} : vector<64x256xf32> to vector<32x256xf32>
    %c0_104 = arith.constant 0 : index
    %c0_105 = arith.constant 0 : index
    %c0_106 = arith.constant 0 : index
    %104 = vector.load %arg2[%c0_104, %c0_105, %c0_106] : memref<1x32x256xf32, #tpu.memory_space<vmem>>, vector<1x32x256xf32>
    %105 = vector.shape_cast %104 : vector<1x32x256xf32> to vector<32x256xf32>
    %106 = arith.mulf %105, %102 : vector<32x256xf32>
    %107 = arith.addf %106, %103 : vector<32x256xf32>
    %c0_107 = arith.constant 0 : index
    %c0_108 = arith.constant 0 : index
    %c0_109 = arith.constant 0 : index
    %108 = vector.load %arg7[%c0_107, %c0_108, %c0_109] : memref<1x32x256xf32, #tpu.memory_space<vmem>>, vector<1x32x256xf32>
    %109 = vector.shape_cast %108 : vector<1x32x256xf32> to vector<32x256xf32>
    %110 = vector.shape_cast %107 : vector<32x256xf32> to vector<1x32x256xf32>
    tpu.vector_store %arg7[%c0_107, %c0_108, %c0_109], %110 {strides = array<i32>} : memref<1x32x256xf32, #tpu.memory_space<vmem>>, vector<1x32x256xf32>,
    return
  }
  func.func @transform_0(%arg0: i32) -> (i32, i32, i32, i32) {
    %c0_i32 = arith.constant 0 : i32
    %c0_i32_0 = arith.constant 0 : i32
    %c0_i32_1 = arith.constant 0 : i32
    %c0_i32_2 = arith.constant 0 : i32
    return %arg0, %c0_i32, %c0_i32_0, %c0_i32_1 : i32, i32, i32, i32
  }
  func.func @transform_1(%arg0: i32) -> (i32, i32, i32) {
    %c0_i32 = arith.constant 0 : i32
    %c0_i32_0 = arith.constant 0 : i32
    %c0_i32_1 = arith.constant 0 : i32
    return %arg0, %c0_i32, %c0_i32_0 : i32, i32, i32
  }
  func.func @transform_2(%arg0: i32) -> (i32, i32, i32) {
    %c0_i32 = arith.constant 0 : i32
    %c0_i32_0 = arith.constant 0 : i32
    %c0_i32_1 = arith.constant 0 : i32
    %c0_i32_2 = arith.constant 0 : i32
    return %c0_i32, %c0_i32_0, %c0_i32_1 : i32, i32, i32
  }
  func.func @transform_3(%arg0: i32) -> (i32, i32) {
    %c0_i32 = arith.constant 0 : i32
    %c0_i32_0 = arith.constant 0 : i32
    %c0_i32_1 = arith.constant 0 : i32
    return %c0_i32, %c0_i32_0 : i32, i32
  }
  func.func @transform_4(%arg0: i32) -> (i32, i32, i32) {
    %c0_i32 = arith.constant 0 : i32
    %c0_i32_0 = arith.constant 0 : i32
    %c0_i32_1 = arith.constant 0 : i32
    %c0_i32_2 = arith.constant 0 : i32
    return %c0_i32, %c0_i32_0, %c0_i32_1 : i32, i32, i32
  }
  func.func @transform_5(%arg0: i32) -> (i32, i32) {
    %c0_i32 = arith.constant 0 : i32
    %c0_i32_0 = arith.constant 0 : i32
    %c0_i32_1 = arith.constant 0 : i32
    return %c0_i32, %c0_i32_0 : i32, i32
  }
  func.func @transform_6(%arg0: i32) -> (i32, i32, i32) {
    %c0_i32 = arith.constant 0 : i32
    %c0_i32_0 = arith.constant 0 : i32
    %c0_i32_1 = arith.constant 0 : i32
    return %arg0, %c0_i32, %c0_i32_0 : i32, i32, i32
  }
}

</mosaic_0001>

<bundles_post_ra>
// kernel: tpu_custom_call.1
= control target key start
LH: loop header
LB: loop body
LE: loop exit
PB: predicated region body
PF: predicated region fallthrough
CT: control target
= control target key end

     0   :  { %11 = vsyncpa [#allocation4], 0  ;;  %s9935_s0 = inlined_call_operand.vmem [shape: f32[2,18,16,126], index: 0, kind: input, shape index: {}]   ;;  %s9936_s1 = inlined_call_operand.hbm [shape: f32[2,32,256], index: 1, kind: input, shape index: {}]   ;;  %s9937_s2 = inlined_call_operand.vmem [shape: f32[3,126,64], index: 2, kind: input, shape index: {}]   ;;  %s9938_s3 = inlined_call_operand.vmem [shape: f32[1,64], index: 3, kind: input, shape index: {}]   ;;  %s9939_s4 = inlined_call_operand.hbm [shape: f32[9,64,64], index: 4, kind: input, shape index: {}]   ;;  %s9940_s5 = inlined_call_operand.vmem [shape: f32[1,64], index: 5, kind: input, shape index: {}]   ;;  %s9941_s6 = inlined_call_operand.hbm [shape: f32[2,32,256], index: 6, kind: output, shape index: {}]  }
   0x1   :  { %13 = vsyncpa [#allocation4 + $0x1], 0 }
   0x2   :  { %14 = vsyncpa [#allocation7], 0 }
   0x3   :  { %15 = vsyncpa [#allocation5], 0 }
   0x4   :  { %17 = vsyncpa [#allocation5 + $0x1], 0  ;;  %s8183_s21 = smov 0   ;;  %s8185_s22 = smov 0  }
   0x5   :  { %s8187_s23 = smov 0   ;;  %s8189_s24 = smov 0  }
   0x6 LB: > { %s8204_s25 = sadd.s32 4294967295, %s8135_s24   ;;  %s5447_s26 = sadd.s32 4294967294, %s8135_s24   ;;  %s8135_s24 = sphi %s8189_s24, %s10041_s24   ;;  %s8131_s23 = sphi %s8187_s23, %s10040_s23   ;;  %s8127_s22 = sphi %s8185_s22, %s10039_s22   ;;  %s8123_s21 = sphi %s8183_s21, %s10038_s21  }
   0x7   : > { %p69_p0 = scmp.ne.s32.totalorder %s8127_s22, %s8123_s21  ;;  %p9942_p1 = scmp.eq.s32.totalorder %s8204_s25, 0 }
   0x8   : > { %p183_p3 = scmp.eq.s32.totalorder %s5447_s26, 1  ;;  %p5448_p5 = scmp.ge.s32.totalorder %s8135_s24, 1 }
   0x9   : > { %p8213_p4 = por %p9942_p1, %p69_p0  ;;  %p190_p7 = scmp.lt.s32.totalorder %s8135_s24, 3 }
   0xa   : > { %p8218_p6 = por %p183_p3, %p69_p0  ;;  %s8137_s30 = smov [#allocation6]  }
   0xb   : > { %s9971_s27 = scalar_select %p8213_p4, 1, 0 }
   0xc   : > { %s9972_s28 = scalar_select %p8218_p6, 1, 0 }
   0xd   : > { %p8223_p8 = pnand %p5448_p5, %p190_p7  ;;  %s208_s7 = sshll.u32 %s8137_s30, 4  ;;  %s8227_s7 = int_to_ptr.vmem [resolvable:$true] %s208_s7 }
   0xe   : > { %s8239_s9 = sadd.s32 1, %s8135_s24   ;;  %s56_s10 = sadd.s32 1, %s8131_s23 }
   0xf   : > { %s9973_s29 = scalar_select %p8223_p8, 1, 0 }
  0x10   : > { %p7918_p9 = pneg %p8223_p8  ;;  %s53_s11 = ssub.s32 %s8135_s24, %s8239_s9 }
  0x11   : > { %s8007_s14 = scalar_lea.hbm %s9939_s4, 9216 }
  0x12   : > { %p8234_p11 = pnand %p7918_p9, %p9942_p1  ;;  %p8008_p12 = scmp.ne.s32.totalorder %s9939_s4, %s8007_s14 }
  0x13   : > { %p8014_p5 = scmp.lt.u32.totalorder %s8007_s14, %s9939_s4 }
  0x14   : > { %p8009_p13 = pneg %p8234_p11 }
  0x16   : > { %p8010_p0 = pnand %p8009_p13, %p8008_p12 }
  0x18   : > { %p8011_p3 = pneg %p8010_p0 }
  0x1a   : > { %p8016_p7 = pnand %p8014_p5, %p8011_p3 }
  0x1c   : > { %8019 = shalt.err (!%p8016_p7)
}
  0x1d   : > { %s8020_s19 = scalar_lea.vmem %s8227_s7, 9216  ;;  %p8028_p2 = scmp.lt.s32.totalorder %s8227_s7, %s8227_s7 }
  0x1e   : > { %p8021_p9 = scmp.ne.s32.totalorder %s8227_s7, %s8020_s19  ;;  %p8029_p6 = scmp.lt.s32.totalorder %s8020_s19, %s8020_s19 }
  0x20   : > { %p8023_p10 = pnand %p8021_p9, %p8009_p13  ;;  %p8030_p4 = por %p8029_p6, %p8028_p2 }
  0x22   : > { %p8024_p1 = pneg %p8023_p10 }
  0x24   : > { %p8031_p8 = pnand %p8030_p4, %p8024_p1 }
  0x26   : > { %8034 = shalt.err (!%p8031_p8)
}
  0x27   : > { %s8138_s20 = smov 128   ;;  %s8139_s26 = smov 8  }
  0x28   : > { %7921 = dma.hbm_to_vmem [thread:$0]  (!%p8234_p11), %s9939_s4, 9216, %s8227_s7, [#allocation7], %s8138_s20, %s8138_s20, %s8139_s26  }
  0x29   : > { %p54_p2 = scmp.eq.s32.totalorder %s53_s11, 0  ;;  %p63_p1 = scmp.ne.s32.totalorder %s8131_s23, %s8127_s22 }
  0x2a   : > { %p64_p4 = scmp.eq.s32.totalorder %s8135_s24, 0  ;;  %p7931_p6 = scmp.lt.s32.totalorder %s8135_s24, 2 }
  0x2b   : > { %s8270_s13 = scalar_select %p54_p2, %s8131_s23, %s56_s10  }
  0x2c   : > { %p65_p8 = por %p64_p4, %p63_p1  ;;  %p9975_p10 = scmp.eq.s32.totalorder %s8204_s25, 1 }
  0x2d   : > { %s233_s15 = sand.u32 1, %s8131_s23   ;;  %s5949_s16 = sshll.u32 %s8135_s24, 10 }
  0x2e   : > { %p8274_p12 = por %p9975_p10, %p63_p1  ;;  %s5451_s17 = sshll.u32 %s233_s15, 6 }
  0x2f   : > { %s8283_s19 = scalar_lea.hbm %s9936_s1, %s5949_s16  ;;  %s237_s7 = scalar_lea.vmem [#allocation3], %s5451_s17 }
  0x30   : > { %s244_s10 = sshll.u32 %s237_s7, 4  ;;  %p8285_p11 = pnand %p7931_p6, %p65_p8  ;;  %s8289_s10 = int_to_ptr.vmem [resolvable:$true] %s244_s10 }
  0x31   : > { %s8291_s20 = scalar_lea.sflag [#allocation4], %s233_s15  ;;  %s8035_s26 = scalar_lea.hbm %s8283_s19, 1024 }
  0x32   : > { %p8036_p13 = scmp.ne.s32.totalorder %s8283_s19, %s8035_s26  ;;  %p8037_p0 = pneg %p8285_p11 }
  0x33   : > { %s8040_s16 = scalar_lea.hbm %s9936_s1, 2048  ;;  %p8041_p7 = scmp.lt.u32.totalorder %s8283_s19, %s9936_s1 }
  0x34   : > { %p8038_p3 = pnand %p8037_p0, %p8036_p13  ;;  %p8042_p9 = scmp.lt.u32.totalorder %s8040_s16, %s8035_s26 }
  0x35   : > { %p8044_p1 = scmp.lt.u32.totalorder %s8035_s26, %s8283_s19 }
  0x36   : > { %p8039_p5 = pneg %p8038_p3  ;;  %p8043_p2 = por %p8042_p9, %p8041_p7 }
  0x38   : > { %p8045_p4 = por %p8044_p1, %p8043_p2 }
  0x3a   : > { %p8046_p6 = pnand %p8045_p4, %p8039_p5 }
  0x3c   : > { %8049 = shalt.err (!%p8046_p6)
}
  0x3d   : > { %s8050_s15 = scalar_lea.vmem %s8289_s10, 1024  ;;  %s8140_s18 = smov [#allocation3]  }
  0x3e   : > { %p8051_p8 = scmp.ne.s32.totalorder %s8289_s10, %s8050_s15  ;;  %s8055_s7 = sshll.u32 %s8140_s18, 4  ;;  %s8056_s7 = int_to_ptr.vmem [resolvable:$false] %s8055_s7 }
  0x3f   : > { %s8057_s30 = scalar_lea.vmem %s8056_s7, 2048  ;;  %p8058_p3 = scmp.lt.s32.totalorder %s8289_s10, %s8056_s7 }
  0x40   : > { %p8053_p10 = pnand %p8051_p8, %p8037_p0  ;;  %p8059_p7 = scmp.lt.s32.totalorder %s8057_s30, %s8050_s15 }
  0x42   : > { %p8054_p13 = pneg %p8053_p10  ;;  %p8060_p9 = por %p8059_p7, %p8058_p3 }
  0x44   : > { %p8061_p2 = pnand %p8060_p9, %p8054_p13 }
  0x46   : > { %8064 = shalt.err (!%p8061_p2)
}
  0x47   : > { %s8141_s26 = smov 256   ;;  %s8142_s12 = smov 16  }
  0x48   : > { %7925 = dma.hbm_to_vmem [thread:$0]  (!%p8285_p11), %s8283_s19, 1024, %s8289_s10, %s8291_s20, %s8141_s26, %s8141_s26, %s8142_s12  }
  0x49   : > { %p9978_p0 = scmp.ne.s32.totalorder %s9973_s29, 0 }
  0x4b   : > { %256 = sbr.rel (%p9978_p0) target bundleno = 1233 (0x4d1), region = 44 }
  0x52   : > { %s8322_s16 = sand.u32 1, %s8127_s22   ;;  %p9979_p5 = scmp.ne.s32.totalorder %s9971_s27, 0 }
  0x53   : > { %s5455_s17 = sshll.u32 %s8322_s16, 6  ;;  %s259_s8 = scalar_lea.sflag [#allocation4], %s8322_s16 }
  0x54   : > { %s8328_s15 = scalar_lea.vmem [#allocation3], %s5455_s17 }
  0x55   : > { %8110 = dma.done.wait (%p9979_p5), %s259_s8, 1024  }
  0x56   : > { %8112 = vsyncadd (%p9979_p5), %s259_s8, 4294966272  ;;  %p9980_p11 = scmp.eq.s32.totalorder %s8204_s25, 0 }
  0x58   : > { %8114 = dma.done.wait (%p9980_p11), [#allocation7], 9216   ;;  %p9981_p1 = pmov %p9980_p11 }
  0x59   : > { %p300_p4 = scmp.lt.s32.totalorder %s8204_s25, 1  ;;  %v337_v0 = vld [vmem:[%s9937_s2] sm:$0xff]  ;;  %v338_v1 = vld [vmem:[%s9937_s2 + $0x8] sm:$0xff]  ;;  %v339_v2 = vld [vmem:[%s9937_s2 + $0x10] sm:$0xff]  ;;  %vm360_vm0 = vcmask 1031168   ;;  %vm457_vm1 = vcmask 1045504  }
  0x5a   : > { %8116 = vsyncadd (%p9981_p1), [#allocation7], 4294958080  ;;  %v7271_v3 = vpack.c.bf16 %v338_v1, %v337_v0  ;;  %v340_v4 = vld [vmem:[%s9937_s2 + $0x18] sm:$0xff]  ;;  %v341_v6 = vld [vmem:[%s9937_s2 + $0x20] sm:$0xff]  ;;  %vm8143_vm2 = vmmov 1   ;;  %vm1594_vm4 = vcmask 523264  }
  0x5b   : > { %s301_s29 = scalar_select %p300_p4, %s8204_s25, 1  ;;  %v7275_v5 = vpack.c.bf16 %v340_v4, %v339_v2  ;;  %v342_v7 = vld [vmem:[%s9937_s2 + $0x28] sm:$0xff]  ;;  %v343_v10 = vld [vmem:[%s9937_s2 + $0x30] sm:$0xff]  ;;  %v344_v11 = vld [vmem:[%s9937_s2 + $0x38] sm:$0xff]  ;;  %vm1603_vm5 = vcmask 516096   ;;  %vm1597_vm6 = vcmask 517120  }
  0x5c   : > { %7272 = vmatprep.subr.bf16.mxu0 %v7271_v3  ;;  %v7279_v8 = vpack.c.bf16 %v342_v7, %v341_v6  ;;  %v7283_v12 = vpack.c.bf16 %v344_v11, %v343_v10  ;;  %v345_v13 = vld [vmem:[%s9937_s2 + $0x40] sm:$0xff]  ;;  %v346_v14 = vld [vmem:[%s9937_s2 + $0x48] sm:$0xff]  ;;  %v347_v16 = vld [vmem:[%s9937_s2 + $0x50] sm:$0xff]  ;;  %s9868_s20 = scalar_lea.vmem [#allocation8], %s5455_s17  ;;  %s5950_s27 = sshll.u32 %s8204_s25, 10 }
  0x5d   : > { %s7909_s19 = smul.u32 288, %s301_s29  ;;  %7274 = vmatpush3.bf16.msra.mxu0 %v7271_v3  ;;  %v7287_v15 = vpack.c.bf16 %v346_v14, %v345_v13  ;;  %v348_v17 = vld [vmem:[%s9937_s2 + $0x58] sm:$0xff]  ;;  %v349_v19 = vld [vmem:[%s9937_s2 + $0x60] sm:$0xff]  ;;  %v350_v20 = vld [vmem:[%s9937_s2 + $0x68] sm:$0xff]  ;;  %s5352_s17 = sshll.u32 %s9868_s20, 4  ;;  %s9884_s17 = int_to_ptr.vmem [resolvable:$true] %s5352_s17 }
  0x5e   : > { %7276 = vmatprep.subr.bf16.mxu0 %v7275_v5  ;;  %v7291_v18 = vpack.c.bf16 %v348_v17, %v347_v16  ;;  %v7295_v21 = vpack.c.bf16 %v350_v20, %v349_v19  ;;  %v351_v22 = vld [vmem:[%s9937_s2 + $0x70] sm:$0xff]  ;;  %v352_v23 = vld [vmem:[%s9937_s2 + $0x78] sm:$0x3f]  ;;  %vm8395_vm3 = vmpackc.low %vm457_vm1, %vm8143_vm2  ;;  %s9890_s26 = scalar_lea.hbm %s9941_s6, %s5950_s27  ;;  %s8145_s25 = smov [#allocation8]  }
  0x5f   : > { %s8361_s18 = scalar_lea.vmem %s9935_s0, %s7909_s19  ;;  %v7299_v24 = vpack.c.bf16 %v352_v23, %v351_v22  ;;  %v5525_v26 = vld [vmem:[%s9937_s2 + $0x80] sm:$0xff]  ;;  %v5526_v27 = vld [vmem:[%s9937_s2 + $0x88] sm:$0xff]  ;;  %v5527_v29 = vld [vmem:[%s9937_s2 + $0x90] sm:$0xff]  ;;  %s5339_s19 = scalar_lea.sflag [#allocation5], %s8322_s16 }
  0x60   : > { %v305_v9 = vld [vmem:[%s8361_s18] sm:$0xff]  ;;  %v7305_v28 = vpack.c.bf16 %v5526_v27, %v5525_v26  ;;  %v5528_v30 = vld [vmem:[%s9937_s2 + $0x98] sm:$0xff]  ;;  %v306_v31 = vld [vmem:[%s8361_s18 + $0x8] sm:$0xff]  ;;  %s8069_s12 = sshll.u32 %s8145_s25, 4  ;;  %s8070_s12 = int_to_ptr.vmem [resolvable:$false] %s8069_s12 }
  0x61   : > { %6487 = vmatprep.mubr.msk.f32.mxu0 %vm360_vm0, %v305_v9  ;;  %7278 = vmatpush3.bf16.msra.mxu0 %v7275_v5  ;;  %v8417_v32 = vld [vmem:[%s8361_s18 + $0x10] sm:$0xff]  ;;  %v7309_v33 = vpack.c.bf16 %v5528_v30, %v5527_v29  ;;  %v5529_v34 = vld [vmem:[%s9937_s2 + $0xa0] sm:$0xff]  ;;  %v5530_v35 = vld [vmem:[%s9937_s2 + $0xa8] sm:$0xff]  ;;  %s8071_s8 = scalar_lea.vmem %s8070_s12, 2048  ;;  %p8072_p13 = scmp.lt.s32.totalorder %s9884_s17, %s8070_s12 }
  0x62   : > { %7280 = vmatprep.subr.bf16.mxu0 %v7279_v8  ;;  %v8429_v36 = vld [vmem:[%s8361_s18 + $0x18] sm:$0xff]  ;;  %v8432_v37 = vld [vmem:[%s8361_s18 + $0x20] sm:$0xff]  ;;  %v7313_v38 = vpack.c.bf16 %v5530_v35, %v5529_v34  ;;  %v5531_v39 = vld [vmem:[%s9937_s2 + $0xb0] sm:$0xff] }
  0x63   : > { %v5532_v40 = vld [vmem:[%s9937_s2 + $0xb8] sm:$0xff]  ;;  %v8445_v41 = vld [vmem:[%s8361_s18 + $0x28] sm:$0xff]  ;;  %v8448_v42 = vld [vmem:[%s8361_s18 + $0x30] sm:$0xff] }
  0x64   : > { %v7317_v43 = vpack.c.bf16 %v5532_v40, %v5531_v39  ;;  %v5533_v44 = vld [vmem:[%s9937_s2 + $0xc0] sm:$0xff]  ;;  %v5534_v45 = vld [vmem:[%s9937_s2 + $0xc8] sm:$0xff]  ;;  %v8461_v46 = vld [vmem:[%s8361_s18 + $0x38] sm:$0xff] }
  0x65   : > { %7282 = vmatpush3.bf16.msra.mxu0 %v7279_v8  ;;  %v8464_v47 = vld [vmem:[%s8361_s18 + $0x40] sm:$0xff]  ;;  %v7321_v48 = vpack.c.bf16 %v5534_v45, %v5533_v44  ;;  %v5535_v49 = vld [vmem:[%s9937_s2 + $0xd0] sm:$0xff]  ;;  %v5536_v50 = vld [vmem:[%s9937_s2 + $0xd8] sm:$0xff] }
  0x66   : > { %7284 = vmatprep.subr.bf16.mxu0 %v7283_v12  ;;  %v8477_v51 = vld [vmem:[%s8361_s18 + $0x48] sm:$0xff]  ;;  %v8480_v52 = vld [vmem:[%s8361_s18 + $0x50] sm:$0xff]  ;;  %v7325_v53 = vpack.c.bf16 %v5536_v50, %v5535_v49  ;;  %v5537_v54 = vld [vmem:[%s9937_s2 + $0xe0] sm:$0xff] }
  0x67   : > { %v5538_v55 = vld [vmem:[%s9937_s2 + $0xe8] sm:$0xff]  ;;  %v8493_v56 = vld [vmem:[%s8361_s18 + $0x58] sm:$0xff]  ;;  %v8496_v57 = vld [vmem:[%s8361_s18 + $0x60] sm:$0xff] }
  0x68   : > { %v7329_v58 = vpack.c.bf16 %v5538_v55, %v5537_v54  ;;  %v5539_v59 = vld [vmem:[%s9937_s2 + $0xf0] sm:$0xff]  ;;  %v5540_v60 = vld [vmem:[%s9937_s2 + $0xf8] sm:$0x3f]  ;;  %v8509_v61 = vld [vmem:[%s8361_s18 + $0x68] sm:$0xff] }
  0x69   : > { %7286 = vmatpush3.bf16.msra.mxu0 %v7283_v12  ;;  %v8512_v62 = vld [vmem:[%s8361_s18 + $0x70] sm:$0xff]  ;;  %v7333_v63 = vpack.c.bf16 %v5540_v60, %v5539_v59  ;;  %v5606_v0 = vld [vmem:[%s9937_s2 + $0x100] sm:$0xff]  ;;  %v5607_v1 = vld [vmem:[%s9937_s2 + $0x108] sm:$0xff] }
  0x6a   : > { %7288 = vmatprep.subr.bf16.mxu0 %v7287_v15  ;;  %v8525_v2 = vld [vmem:[%s8361_s18 + $0x78] sm:$0xff]  ;;  %v8528_v3 = vld [vmem:[%s8361_s18 + $0x80] sm:$0xff]  ;;  %v7339_v4 = vpack.c.bf16 %v5607_v1, %v5606_v0  ;;  %v8537_v5 = vld [vmem:[%s8361_s18 + $0x88] sm:$0xff] }
  0x6b   : > { %v8542_v6 = vld [vmem:[%s8361_s18 + $0x90] sm:$0xff]  ;;  %v8549_v7 = vld [vmem:[%s8361_s18 + $0x98] sm:$0xff]  ;;  %v8552_v8 = vld [vmem:[%s8361_s18 + $0xa0] sm:$0xff] }
  0x6c   : > { %v8559_v9 = vld [vmem:[%s8361_s18 + $0xa8] sm:$0xff]  ;;  %v8562_v10 = vld [vmem:[%s8361_s18 + $0xb0] sm:$0xff]  ;;  %v8569_v11 = vld [vmem:[%s8361_s18 + $0xb8] sm:$0xff] }
  0x6d   : > { %7290 = vmatpush3.bf16.msra.mxu0 %v7287_v15  ;;  %v8572_v12 = vld [vmem:[%s8361_s18 + $0xc0] sm:$0xff]  ;;  %v8579_v13 = vld [vmem:[%s8361_s18 + $0xc8] sm:$0xff]  ;;  %v8582_v14 = vld [vmem:[%s8361_s18 + $0xd0] sm:$0xff] }
  0x6e   : > { %7292 = vmatprep.subr.bf16.mxu0 %v7291_v18  ;;  %v8589_v15 = vld [vmem:[%s8361_s18 + $0xd8] sm:$0xff]  ;;  %v8592_v16 = vld [vmem:[%s8361_s18 + $0xe0] sm:$0xff]  ;;  %v8599_v17 = vld [vmem:[%s8361_s18 + $0xe8] sm:$0xff] }
  0x6f   : > { %v8609_v19 = vld [vmem:[%s8361_s18 + $0xf8] sm:$0xff]  ;;  %v5608_v20 = vld [vmem:[%s9937_s2 + $0x110] sm:$0xff]  ;;  %v5610_v27 = vld [vmem:[%s9937_s2 + $0x120] sm:$0xff] }
  0x70   : > { %v2468_v22 = vld [vmem:[#allocation6 + $0x80] sm:$0xff]  ;;  %v2469_v23 = vld [vmem:[#allocation6 + $0x88] sm:$0xff]  ;;  %v5615_v34 = vld [vmem:[%s9937_s2 + $0x148] sm:$0xff] }
  0x71   : > { %7294 = vmatpush3.bf16.msra.mxu0 %v7291_v18  ;;  %v8602_v18 = vld [vmem:[%s8361_s18 + $0xf0] sm:$0xff]  ;;  %v7405_v26 = vpack.c.bf16 %v2469_v23, %v2468_v22  ;;  %v5618_v40 = vld [vmem:[%s9937_s2 + $0x160] sm:$0xff]  ;;  %v5524_v55 = vld [vmem:[%s8361_s18 + $0x108] sm:$0xff] }
  0x72   : > { %7296 = vmatprep.subr.bf16.mxu0 %v7295_v21  ;;  %v5612_v30 = vld [vmem:[%s9937_s2 + $0x130] sm:$0xff]  ;;  %v5523_v25 = vld [vmem:[%s8361_s18 + $0x100] sm:$0xff]  ;;  %v1712_v1 = vld [vmem:[#allocation6 + $0x38] sm:$0xff] }
  0x73   : > { %7406 = vmatprep.subr.bf16.mxu1 %v7405_v26  ;;  %v5620_v45 = vld [vmem:[%s9937_s2 + $0x170] sm:$0xff]  ;;  %v1711_v0 = vld [vmem:[#allocation6 + $0x30] sm:$0xff]  ;;  %v2077_v23 = vld [vmem:[#allocation6 + $0x58] sm:$0xff] }
  0x74   : > { %7408 = vmatpush3.bf16.msra.mxu1 %v7405_v26  ;;  %v1705_v50 = vld [vmem:[#allocation6] sm:$0xff]  ;;  %v2076_v22 = vld [vmem:[#allocation6 + $0x50] sm:$0xff] }
  0x75   : > { %7298 = vmatpush3.bf16.msra.mxu0 %v7295_v21  ;;  %v5609_v21 = vld [vmem:[%s9937_s2 + $0x118] sm:$0xff]  ;;  %v2472_v59 = vld [vmem:[#allocation6 + $0xa0] sm:$0xff] }
  0x76   : > { %7301 = vmatprep.subr.msk.bf16.mxu0 %vm8395_vm3, %v7299_v24  ;;  %v2078_v26 = vld [vmem:[#allocation6 + $0x60] sm:$0xff] }
  0x79   : > { %7304 = vmatpush3.bf16.msk.msra.mxu0 %vm8395_vm3, %v7299_v24  ;;  %v7343_v24 = vpack.c.bf16 %v5609_v21, %v5608_v20  ;;  %v2075_v20 = vld [vmem:[#allocation6 + $0x48] sm:$0xff] }
  0x7a   : > { %7306 = vmatprep.subr.bf16.mxu0 %v7305_v28 }
  0x7c   : > { %6488 = vmatmul.mubr.msk.f32.vlgmr.msra.gmra.mrb[0].mxu0 %vm360_vm0, %v306_v31  ;;  %v5613_v31 = vld [vmem:[%s9937_s2 + $0x138] sm:$0xff] }
  0x7d   : > { %7308 = vmatpush3.bf16.msra.mxu0 %v7305_v28  ;;  %6490 = vmatprep.mubr.msk.f32.mxu0 %vm360_vm0, %v8417_v32  ;;  %v5611_v28 = vld [vmem:[%s9937_s2 + $0x128] sm:$0xff] }
  0x7e   : > { %7310 = vmatprep.subr.bf16.mxu0 %v7309_v33  ;;  %v7347_v29 = vpack.c.bf16 %v5611_v28, %v5610_v27  ;;  %v2079_v27 = vld [vmem:[#allocation6 + $0x68] sm:$0xff]  ;;  %v2868_v28 = vld [vmem:[#allocation6 + $0xf0] sm:$0xff] }
  0x80   : > { %6491 = vmatmul.mubr.msk.f32.gmra.mrb[2].mxu0 %vm360_vm0, %v8429_v36 }
  0x81   : > { %6493 = vmatprep.mubr.msk.f32.mxu0 %vm360_vm0, %v8432_v37  ;;  %7312 = vmatpush3.bf16.msra.mxu0 %v7309_v33  ;;  %v5614_v33 = vld [vmem:[%s9937_s2 + $0x140] sm:$0xff] }
  0x82   : > { %7314 = vmatprep.subr.bf16.mxu0 %v7313_v38  ;;  %v7355_v35 = vpack.c.bf16 %v5615_v34, %v5614_v33  ;;  %v2081_v33 = vld [vmem:[#allocation6 + $0x78] sm:$0xff] }
  0x84   : > { %6494 = vmatmul.mubr.msk.f32.gmra.mrb[4].mxu0 %vm360_vm0, %v8445_v41 }
  0x85   : > { %6496 = vmatprep.mubr.msk.f32.mxu0 %vm360_vm0, %v8448_v42  ;;  %7316 = vmatpush3.bf16.msra.mxu0 %v7313_v38  ;;  %v5617_v38 = vld [vmem:[%s9937_s2 + $0x158] sm:$0xff] }
  0x86   : > { %7318 = vmatprep.subr.bf16.mxu0 %v7317_v43 }
  0x88   : > { %6497 = vmatmul.mubr.msk.f32.gmra.mrb[6].mxu0 %vm360_vm0, %v8461_v46 }
  0x89   : > { %6499 = vmatprep.mubr.msk.f32.mxu0 %vm360_vm0, %v8464_v47  ;;  %7320 = vmatpush3.bf16.msra.mxu0 %v7317_v43  ;;  %v5619_v43 = vld [vmem:[%s9937_s2 + $0x168] sm:$0xff] }
  0x8a   : > { %7322 = vmatprep.subr.bf16.mxu0 %v7321_v48  ;;  %v7363_v44 = vpack.c.bf16 %v5619_v43, %v5618_v40  ;;  %v4834_v40 = vld [vmem:[#allocation6 + $0x208] sm:$0xff] }
  0x8c   : > { %6500 = vmatmul.mubr.msk.f32.gmra.mrb[8].mxu0 %vm360_vm0, %v8477_v51 }
  0x8d   : > { %6502 = vmatprep.mubr.msk.f32.mxu0 %vm360_vm0, %v8480_v52  ;;  %7324 = vmatpush3.bf16.msra.mxu0 %v7321_v48  ;;  %v5621_v48 = vld [vmem:[%s9937_s2 + $0x178] sm:$0x3f] }
  0x8e   : > { %7326 = vmatprep.subr.bf16.mxu0 %v7325_v53  ;;  %v7367_v49 = vpack.c.bf16 %v5621_v48, %v5620_v45 }
  0x90   : > { %6503 = vmatmul.mubr.msk.f32.gmra.mrb[10].mxu0 %vm360_vm0, %v8493_v56 }
  0x91   : > { %6505 = vmatprep.mubr.msk.f32.mxu0 %vm360_vm0, %v8496_v57  ;;  %7328 = vmatpush3.bf16.msra.mxu0 %v7325_v53  ;;  %v1706_v53 = vld [vmem:[#allocation6 + $0x8] sm:$0xff] }
  0x92   : > { %7330 = vmatprep.subr.bf16.mxu0 %v7329_v58  ;;  %v7373_v54 = vpack.c.bf16 %v1706_v53, %v1705_v50 }
  0x94   : > { %6506 = vmatmul.mubr.msk.f32.gmra.mrb[12].mxu0 %vm360_vm0, %v8509_v61 }
  0x95   : > { %6508 = vmatprep.mubr.msk.f32.mxu0 %vm360_vm0, %v8512_v62  ;;  %7332 = vmatpush3.bf16.msra.mxu0 %v7329_v58  ;;  %v1710_v58 = vld [vmem:[#allocation6 + $0x28] sm:$0xff] }
  0x96   : > { %7335 = vmatprep.subr.msk.bf16.mxu0 %vm8395_vm3, %v7333_v63 }
  0x98   : > { %6509 = vmatmul.mubr.msk.f32.gmra.mrb[14].mxu0 %vm360_vm0, %v8525_v2 }
  0x99   : > { %6511 = vmatprep.mubr.msk.f32.mxu0 %vm360_vm0, %v8528_v3  ;;  %7338 = vmatpush3.bf16.msk.msra.mxu0 %vm8395_vm3, %v7333_v63 }
  0x9a   : > { %7340 = vmatprep.subr.bf16.mxu0 %v7339_v4 }
  0x9c   : > { %6512 = vmatmul.mubr.msk.f32.gmra.mrb[16].mxu0 %vm360_vm0, %v8537_v5 }
  0x9d   : > { %6514 = vmatprep.mubr.msk.f32.mxu0 %vm360_vm0, %v8542_v6 }
  0xa0   : > { %6515 = vmatmul.mubr.msk.f32.gmra.mrb[18].mxu0 %vm360_vm0, %v8549_v7 }
  0xa1   : > { %6517 = vmatprep.mubr.msk.f32.mxu0 %vm360_vm0, %v8552_v8 }
  0xa4   : > { %6518 = vmatmul.mubr.msk.f32.gmra.mrb[20].mxu0 %vm360_vm0, %v8559_v9 }
  0xa5   : > { %6520 = vmatprep.mubr.msk.f32.mxu0 %vm360_vm0, %v8562_v10 }
  0xa8   : > { %6521 = vmatmul.mubr.msk.f32.gmra.mrb[22].mxu0 %vm360_vm0, %v8569_v11 }
  0xa9   : > { %6523 = vmatprep.mubr.msk.f32.mxu0 %vm360_vm0, %v8572_v12 }
  0xac   : > { %6524 = vmatmul.mubr.msk.f32.gmra.mrb[24].mxu0 %vm360_vm0, %v8579_v13 }
  0xad   : > { %6526 = vmatprep.mubr.msk.f32.mxu0 %vm360_vm0, %v8582_v14 }
  0xb0   : > { %6527 = vmatmul.mubr.msk.f32.gmra.mrb[26].mxu0 %vm360_vm0, %v8589_v15 }
  0xb1   : > { %6529 = vmatprep.mubr.msk.f32.mxu0 %vm360_vm0, %v8592_v16 }
  0xb4   : > { %6530 = vmatmul.mubr.msk.f32.gmra.mrb[28].mxu0 %vm360_vm0, %v8599_v17 }
  0xb5   : > { %6532 = vmatprep.mubr.msk.f32.mxu0 %vm360_vm0, %v8602_v18 }
  0xb8   : > { %6533 = vmatmul.mubr.msk.f32.gmra.mrb[30].mxu0 %vm360_vm0, %v8609_v19 }
  0xb9   : > { %6567 = vmatprep.mubr.msk.f32.mxu0 %vm360_vm0, %v8417_v32  ;;  %v7351_v32 = vpack.c.bf16 %v5613_v31, %v5612_v30  ;;  %v7397_v30 = vpack.c.bf16 %v2079_v27, %v2078_v26 }
  0xbc   : > { %6568 = vmatmul.mubr.msk.f32.vlgmr.msra.gmra.mrb[0].mxu0 %vm360_vm0, %v8429_v36  ;;  %v5616_v36 = vld [vmem:[%s9937_s2 + $0x150] sm:$0xff] }
  0xbd   : > { %7342 = vmatpush3.bf16.msra.mxu0 %v7339_v4  ;;  %6570 = vmatprep.mubr.msk.f32.mxu0 %vm360_vm0, %v8432_v37  ;;  %v7359_v39 = vpack.c.bf16 %v5617_v38, %v5616_v36  ;;  %v2475_v4 = vld [vmem:[#allocation6 + $0xb8] sm:$0xff]  ;;  %v3257_v36 = vld [vmem:[#allocation6 + $0x108] sm:$0xff] }
  0xbe   : > { %7344 = vmatprep.subr.bf16.mxu0 %v7343_v24 }
  0xc0   : > { %6571 = vmatmul.mubr.msk.f32.gmra.mrb[2].mxu0 %vm360_vm0, %v8445_v41 }
  0xc1   : > { %6573 = vmatprep.mubr.msk.f32.mxu0 %vm360_vm0, %v8448_v42  ;;  %7346 = vmatpush3.bf16.msra.mxu0 %v7343_v24  ;;  %v7393_v24 = vpack.c.bf16 %v2077_v23, %v2076_v22 }
  0xc2   : > { %7348 = vmatprep.subr.bf16.mxu0 %v7347_v29 }
  0xc4   : > { %6574 = vmatmul.mubr.msk.f32.gmra.mrb[4].mxu0 %vm360_vm0, %v8461_v46 }
  0xc5   : > { %6576 = vmatprep.mubr.msk.f32.mxu0 %vm360_vm0, %v8464_v47  ;;  %7350 = vmatpush3.bf16.msra.mxu0 %v7347_v29  ;;  %v2869_v29 = vld [vmem:[#allocation6 + $0xf8] sm:$0xff] }
  0xc6   : > { %7352 = vmatprep.subr.bf16.mxu0 %v7351_v32  ;;  %v7433_v31 = vpack.c.bf16 %v2869_v29, %v2868_v28 }
  0xc8   : > { %6577 = vmatmul.mubr.msk.f32.gmra.mrb[6].mxu0 %vm360_vm0, %v8477_v51 }
  0xc9   : > { %6579 = vmatprep.mubr.msk.f32.mxu0 %vm360_vm0, %v8480_v52  ;;  %7354 = vmatpush3.bf16.msra.mxu0 %v7351_v32  ;;  %v2080_v32 = vld [vmem:[#allocation6 + $0x70] sm:$0xff] }
  0xca   : > { %7356 = vmatprep.subr.bf16.mxu0 %v7355_v35  ;;  %v7401_v34 = vpack.c.bf16 %v2081_v33, %v2080_v32 }
  0xcc   : > { %6580 = vmatmul.mubr.msk.f32.gmra.mrb[8].mxu0 %vm360_vm0, %v8493_v56 }
  0xcd   : > { %6582 = vmatprep.mubr.msk.f32.mxu0 %vm360_vm0, %v8496_v57  ;;  %7358 = vmatpush3.bf16.msra.mxu0 %v7355_v35  ;;  %v3256_v35 = vld [vmem:[#allocation6 + $0x100] sm:$0xff] }
  0xce   : > { %7360 = vmatprep.subr.bf16.mxu0 %v7359_v39  ;;  %v8831_v38 = vpack.c.bf16 %v3257_v36, %v3256_v35 }
  0xd0   : > { %6583 = vmatmul.mubr.msk.f32.gmra.mrb[10].mxu0 %vm360_vm0, %v8509_v61 }
  0xd1   : > { %6585 = vmatprep.mubr.msk.f32.mxu0 %vm360_vm0, %v8512_v62  ;;  %7362 = vmatpush3.bf16.msra.mxu0 %v7359_v39  ;;  %v4833_v39 = vld [vmem:[#allocation6 + $0x200] sm:$0xff] }
  0xd2   : > { %7364 = vmatprep.subr.bf16.mxu0 %v7363_v44  ;;  %v8834_v43 = vpack.c.bf16 %v4834_v40, %v4833_v39 }
  0xd4   : > { %6586 = vmatmul.mubr.msk.f32.gmra.mrb[12].mxu0 %vm360_vm0, %v8525_v2 }
  0xd5   : > { %6588 = vmatprep.mubr.msk.f32.mxu0 %vm360_vm0, %v8528_v3  ;;  %7366 = vmatpush3.bf16.msra.mxu0 %v7363_v44  ;;  %v8840_v44 = vld [vmem:[%s9938_s3] ss:$0 sm:$0xff] }
  0xd6   : > { %7369 = vmatprep.subr.msk.bf16.mxu0 %vm8395_vm3, %v7367_v49 }
  0xd8   : > { %6589 = vmatmul.mubr.msk.f32.gmra.mrb[14].mxu0 %vm360_vm0, %v8537_v5 }
  0xd9   : > { %6591 = vmatprep.mubr.msk.f32.mxu0 %vm360_vm0, %v8542_v6  ;;  %7372 = vmatpush3.bf16.msk.msra.mxu0 %vm8395_vm3, %v7367_v49 }
  0xda   : > { %7374 = vmatprep.subr.bf16.mxu0 %v7373_v54 }
  0xdc   : > { %6592 = vmatmul.mubr.msk.f32.gmra.mrb[16].mxu0 %vm360_vm0, %v8549_v7 }
  0xdd   : > { %6594 = vmatprep.mubr.msk.f32.mxu0 %vm360_vm0, %v8552_v8 }
  0xe0   : > { %6595 = vmatmul.mubr.msk.f32.gmra.mrb[18].mxu0 %vm360_vm0, %v8559_v9 }
  0xe1   : > { %6597 = vmatprep.mubr.msk.f32.mxu0 %vm360_vm0, %v8562_v10 }
  0xe4   : > { %6598 = vmatmul.mubr.msk.f32.gmra.mrb[20].mxu0 %vm360_vm0, %v8569_v11 }
  0xe5   : > { %6600 = vmatprep.mubr.msk.f32.mxu0 %vm360_vm0, %v8572_v12 }
  0xe8   : > { %6601 = vmatmul.mubr.msk.f32.gmra.mrb[22].mxu0 %vm360_vm0, %v8579_v13 }
  0xe9   : > { %6603 = vmatprep.mubr.msk.f32.mxu0 %vm360_vm0, %v8582_v14 }
  0xec   : > { %6604 = vmatmul.mubr.msk.f32.gmra.mrb[24].mxu0 %vm360_vm0, %v8589_v15 }
  0xed   : > { %6606 = vmatprep.mubr.msk.f32.mxu0 %vm360_vm0, %v8592_v16 }
  0xf0   : > { %6607 = vmatmul.mubr.msk.f32.gmra.mrb[26].mxu0 %vm360_vm0, %v8599_v17 }
  0xf1   : > { %6609 = vmatprep.mubr.msk.f32.mxu0 %vm360_vm0, %v8602_v18 }
  0xf4   : > { %6610 = vmatmul.mubr.msk.f32.gmra.mrb[28].mxu0 %vm360_vm0, %v8609_v19 }
  0xf5   : > { %6612 = vmatprep.mubr.msk.f32.mxu0 %vm360_vm0, %v5523_v25 }
  0xf8   : > { %6613 = vmatmul.mubr.msk.f32.gmra.mrb[30].mxu0 %vm360_vm0, %v5524_v55 }
  0xf9   : > { %6647 = vmatprep.mubr.msk.f32.mxu0 %vm360_vm0, %v8432_v37  ;;  %v5604_v37 = vld [vmem:[%s8361_s18 + $0x110] sm:$0xff] }
  0xfc   : > { %6648 = vmatmul.mubr.msk.f32.vlgmr.msra.gmra.mrb[0].mxu0 %vm360_vm0, %v8445_v41  ;;  %v5605_v41 = vld [vmem:[%s8361_s18 + $0x118] sm:$0xff] }
  0xfd   : > { %6650 = vmatprep.mubr.msk.f32.mxu0 %vm360_vm0, %v8448_v42  ;;  %7376 = vmatpush3.bf16.msra.mxu0 %v7373_v54  ;;  %v1707_v42 = vld [vmem:[#allocation6 + $0x10] sm:$0xff] }
 0x100   : > { %6651 = vmatmul.mubr.msk.f32.gmra.mrb[2].mxu0 %vm360_vm0, %v8461_v46  ;;  %v1708_v46 = vld [vmem:[#allocation6 + $0x18] sm:$0xff] }
 0x101   : > { %6653 = vmatprep.mubr.msk.f32.mxu0 %vm360_vm0, %v8464_v47  ;;  %v2470_v47 = vld [vmem:[#allocation6 + $0x90] sm:$0xff] }
 0x104   : > { %6654 = vmatmul.mubr.msk.f32.gmra.mrb[4].mxu0 %vm360_vm0, %v8477_v51  ;;  %v7377_v51 = vpack.c.bf16 %v1708_v46, %v1707_v42 }
 0x105   : > { %6656 = vmatprep.mubr.msk.f32.mxu0 %vm360_vm0, %v8480_v52  ;;  %v2471_v52 = vld [vmem:[#allocation6 + $0x98] sm:$0xff] }
 0x106   : > { %7378 = vmatprep.subr.bf16.mxu0 %v7377_v51 }
 0x107   : > { %7380 = vmatpush3.bf16.msra.mxu0 %v7377_v51 }
 0x108   : > { %6657 = vmatmul.mubr.msk.f32.gmra.mrb[6].mxu0 %vm360_vm0, %v8493_v56  ;;  %v7409_v56 = vpack.c.bf16 %v2471_v52, %v2470_v47 }
 0x109   : > { %6659 = vmatprep.mubr.msk.f32.mxu0 %vm360_vm0, %v8496_v57  ;;  %v1709_v57 = vld [vmem:[#allocation6 + $0x20] sm:$0xff] }
 0x10a   : > { %7410 = vmatprep.subr.bf16.mxu1 %v7409_v56  ;;  %v7381_v60 = vpack.c.bf16 %v1710_v58, %v1709_v57 }
 0x10b   : > { %7412 = vmatpush3.bf16.msra.mxu1 %v7409_v56 }
 0x10c   : > { %6660 = vmatmul.mubr.msk.f32.gmra.mrb[8].mxu0 %vm360_vm0, %v8509_v61  ;;  %v2473_v61 = vld [vmem:[#allocation6 + $0xa8] sm:$0xff]  ;;  %7382 = vmatprep.subr.bf16.mxu0 %v7381_v60 }
 0x10d   : > { %6662 = vmatprep.mubr.msk.f32.mxu0 %vm360_vm0, %v8512_v62  ;;  %v8144_v62 = vmov 0.0   ;;  %v7413_v63 = vpack.c.bf16 %v2473_v61, %v2472_v59  ;;  %7384 = vmatpush3.bf16.msra.mxu0 %v7381_v60 }
 0x10e   : > { %1595 = vst.msk [vmem:[#allocation2] sm:$0xff] %vm1594_vm4, %v8144_v62  ;;  %1596 = vst.msk [vmem:[#allocation2 + $0x8] sm:$0xff] %vm1594_vm4, %v8144_v62 }
 0x10f   : > { %1600 = vst.msk [vmem:[#allocation2 + $0x198] sm:$0xff] %vm1594_vm4, %v8144_v62  ;;  %1601 = vst.msk [vmem:[#allocation2 + $0x1a0] sm:$0xff] %vm1594_vm4, %v8144_v62  ;;  %7414 = vmatprep.subr.bf16.mxu1 %v7413_v63 }
 0x110   : > { %6663 = vmatmul.mubr.msk.f32.gmra.mrb[10].mxu0 %vm360_vm0, %v8525_v2  ;;  %1604 = vst.msk [vmem:[#allocation2] sm:$0x1] %vm1603_vm5, %v8144_v62  ;;  %1605 = vst.msk [vmem:[#allocation2 + $0x18] sm:$0x1] %vm1603_vm5, %v8144_v62  ;;  %v2474_v2 = vld [vmem:[#allocation6 + $0xb0] sm:$0xff]  ;;  %7416 = vmatpush3.bf16.msra.mxu1 %v7413_v63 }
 0x111   : > { %6665 = vmatprep.mubr.msk.f32.mxu0 %vm360_vm0, %v8528_v3  ;;  %1606 = vst.msk [vmem:[#allocation2 + $0x30] sm:$0x1] %vm1603_vm5, %v8144_v62  ;;  %1607 = vst.msk [vmem:[#allocation2 + $0x48] sm:$0x1] %vm1603_vm5, %v8144_v62  ;;  %v7385_v3 = vpack.c.bf16 %v1712_v1, %v1711_v0 }
 0x112   : > { %1608 = vst.msk [vmem:[#allocation2 + $0x60] sm:$0x1] %vm1603_vm5, %v8144_v62  ;;  %1609 = vst.msk [vmem:[#allocation2 + $0x78] sm:$0x1] %vm1603_vm5, %v8144_v62 }
 0x113   : > { %1610 = vst.msk [vmem:[#allocation2 + $0x90] sm:$0x1] %vm1603_vm5, %v8144_v62  ;;  %1611 = vst.msk [vmem:[#allocation2 + $0xa8] sm:$0x1] %vm1603_vm5, %v8144_v62  ;;  %7386 = vmatprep.subr.bf16.mxu0 %v7385_v3 }
 0x114   : > { %6666 = vmatmul.mubr.msk.f32.gmra.mrb[12].mxu0 %vm360_vm0, %v8537_v5  ;;  %1612 = vst.msk [vmem:[#allocation2 + $0xc0] sm:$0x1] %vm1603_vm5, %v8144_v62  ;;  %1613 = vst.msk [vmem:[#allocation2 + $0xd8] sm:$0x1] %vm1603_vm5, %v8144_v62  ;;  %v7417_v5 = vpack.c.bf16 %v2475_v4, %v2474_v2 }
 0x115   : > { %6668 = vmatprep.mubr.msk.f32.mxu0 %vm360_vm0, %v8542_v6  ;;  %1614 = vst.msk [vmem:[#allocation2 + $0xf0] sm:$0x1] %vm1603_vm5, %v8144_v62  ;;  %1615 = vst.msk [vmem:[#allocation2 + $0x108] sm:$0x1] %vm1603_vm5, %v8144_v62  ;;  %7388 = vmatpush3.bf16.msra.mxu0 %v7385_v3 }
 0x116   : > { %1616 = vst.msk [vmem:[#allocation2 + $0x120] sm:$0x1] %vm1603_vm5, %v8144_v62  ;;  %1617 = vst.msk [vmem:[#allocation2 + $0x138] sm:$0x1] %vm1603_vm5, %v8144_v62  ;;  %7418 = vmatprep.subr.bf16.mxu1 %v7417_v5 }
 0x117   : > { %1618 = vst.msk [vmem:[#allocation2 + $0x150] sm:$0x1] %vm1603_vm5, %v8144_v62  ;;  %1619 = vst.msk [vmem:[#allocation2 + $0x168] sm:$0x1] %vm1603_vm5, %v8144_v62  ;;  %7420 = vmatpush3.bf16.msra.mxu1 %v7417_v5  ;;  %v1673_v6 = vld [vmem:[#allocation2] sm:$0xff] }
 0x118   : > { %6669 = vmatmul.mubr.msk.f32.gmra.mrb[14].mxu0 %vm360_vm0, %v8549_v7  ;;  %1620 = vst.msk [vmem:[#allocation2 + $0x180] sm:$0x1] %vm1603_vm5, %v8144_v62  ;;  %1623 = vst.msk [vmem:[#allocation2 + $0x29] sm:$0x1] %vm1603_vm5, %v8144_v62  ;;  %v2435_v7 = vld [vmem:[#allocation2 + $0x2] sm:$0xff] }
 0x119   : > { %6671 = vmatprep.mubr.msk.f32.mxu0 %vm360_vm0, %v8552_v8  ;;  %1624 = vst.msk [vmem:[#allocation2 + $0x41] sm:$0x1] %vm1603_vm5, %v8144_v62  ;;  %1625 = vst.msk [vmem:[#allocation2 + $0x59] sm:$0x1] %vm1603_vm5, %v8144_v62  ;;  %6839 = vmatprep.mubr.msk.f32.mxu1 %vm1594_vm4, %v2435_v7  ;;  %v1674_v8 = vld [vmem:[#allocation2 + $0x8] sm:$0xff] }
 0x11a   : > { %1626 = vst.msk [vmem:[#allocation2 + $0x71] sm:$0x1] %vm1603_vm5, %v8144_v62  ;;  %1627 = vst.msk [vmem:[#allocation2 + $0x89] sm:$0x1] %vm1603_vm5, %v8144_v62 }
 0x11b   : > { %1628 = vst.msk [vmem:[#allocation2 + $0xa1] sm:$0x1] %vm1603_vm5, %v8144_v62  ;;  %1629 = vst.msk [vmem:[#allocation2 + $0xb9] sm:$0x1] %vm1603_vm5, %v8144_v62 }
 0x11c   : > { %6672 = vmatmul.mubr.msk.f32.gmra.mrb[16].mxu0 %vm360_vm0, %v8559_v9  ;;  %1630 = vst.msk [vmem:[#allocation2 + $0xd1] sm:$0x1] %vm1603_vm5, %v8144_v62  ;;  %1631 = vst.msk [vmem:[#allocation2 + $0xe9] sm:$0x1] %vm1603_vm5, %v8144_v62 }
 0x11d   : > { %6674 = vmatprep.mubr.msk.f32.mxu0 %vm360_vm0, %v8562_v10  ;;  %1632 = vst.msk [vmem:[#allocation2 + $0x101] sm:$0x1] %vm1603_vm5, %v8144_v62  ;;  %1633 = vst.msk [vmem:[#allocation2 + $0x119] sm:$0x1] %vm1603_vm5, %v8144_v62  ;;  %v2862_v10 = vld [vmem:[#allocation6 + $0xc0] sm:$0xff] }
 0x11e   : > { %1634 = vst.msk [vmem:[#allocation2 + $0x131] sm:$0x1] %vm1603_vm5, %v8144_v62  ;;  %1635 = vst.msk [vmem:[#allocation2 + $0x149] sm:$0x1] %vm1603_vm5, %v8144_v62 }
 0x11f   : > { %1636 = vst.msk [vmem:[#allocation2 + $0x161] sm:$0x1] %vm1603_vm5, %v8144_v62  ;;  %1637 = vst.msk [vmem:[#allocation2 + $0x179] sm:$0x1] %vm1603_vm5, %v8144_v62 }
 0x120   : > { %6675 = vmatmul.mubr.msk.f32.gmra.mrb[18].mxu0 %vm360_vm0, %v8569_v11  ;;  %1638 = vst.msk [vmem:[#allocation2 + $0x191] sm:$0x1] %vm1603_vm5, %v8144_v62  ;;  %1621 = vst.msk [vmem:[#allocation2 + $0x198] sm:$0x1] %vm1603_vm5, %v8144_v62  ;;  %v2863_v11 = vld [vmem:[#allocation6 + $0xc8] sm:$0xff] }
 0x121   : > { %6677 = vmatprep.mubr.msk.f32.mxu0 %vm360_vm0, %v8572_v12  ;;  %1598 = vst.msk [vmem:[#allocation2 + $0x10] sm:$0x3] %vm1597_vm6, %v8144_v62  ;;  %1602 = vst.msk [vmem:[#allocation2 + $0x1a8] sm:$0x3] %vm1597_vm6, %v8144_v62  ;;  %v7421_v12 = vpack.c.bf16 %v2863_v11, %v2862_v10 }
 0x122   : > { %1622 = vst.msk [vmem:[#allocation2 + $0x11] sm:$0x1] %vm1603_vm5, %v8144_v62  ;;  %1639 = vst.msk [vmem:[#allocation2 + $0x1a9] sm:$0x1] %vm1603_vm5, %v8144_v62 }
 0x123   : > { %7422 = vmatprep.subr.bf16.mxu1 %v7421_v12 }
 0x124   : > { %6678 = vmatmul.mubr.msk.f32.gmra.mrb[20].mxu0 %vm360_vm0, %v8579_v13  ;;  %v2864_v13 = vld [vmem:[#allocation6 + $0xd0] sm:$0xff] }
 0x125   : > { %6680 = vmatprep.mubr.msk.f32.mxu0 %vm360_vm0, %v8582_v14  ;;  %v2865_v14 = vld [vmem:[#allocation6 + $0xd8] sm:$0xff] }
 0x128   : > { %6681 = vmatmul.mubr.msk.f32.gmra.mrb[22].mxu0 %vm360_vm0, %v8589_v15  ;;  %v7425_v15 = vpack.c.bf16 %v2865_v14, %v2864_v13 }
 0x129   : > { %6683 = vmatprep.mubr.msk.f32.mxu0 %vm360_vm0, %v8592_v16  ;;  %v2436_v9 = vld [vmem:[#allocation2 + $0xa] sm:$0xff] }
 0x12a   : > { %6840 = vmatmul.mubr.msk.f32.vlgmr.msra.gmra.mrb[0].mxu1 %vm1594_vm4, %v2436_v9  ;;  %v2866_v16 = vld [vmem:[#allocation6 + $0xe0] sm:$0xff] }
 0x12b   : > { %7424 = vmatpush3.bf16.msra.mxu1 %v7421_v12 }
 0x12c   : > { %6684 = vmatmul.mubr.msk.f32.gmra.mrb[24].mxu0 %vm360_vm0, %v8599_v17  ;;  %7426 = vmatprep.subr.bf16.mxu1 %v7425_v15  ;;  %v2867_v17 = vld [vmem:[#allocation6 + $0xe8] sm:$0xff] }
 0x12d   : > { %6686 = vmatprep.mubr.msk.f32.mxu0 %vm360_vm0, %v8602_v18  ;;  %v7429_v18 = vpack.c.bf16 %v2867_v17, %v2866_v16 }
 0x12f   : > { %7428 = vmatpush3.bf16.msra.mxu1 %v7425_v15 }
 0x130   : > { %6687 = vmatmul.mubr.msk.f32.gmra.mrb[26].mxu0 %vm360_vm0, %v8609_v19  ;;  %7430 = vmatprep.subr.bf16.mxu1 %v7429_v18  ;;  %v2074_v19 = vld [vmem:[#allocation6 + $0x40] sm:$0xff] }
 0x131   : > { %6689 = vmatprep.mubr.msk.f32.mxu0 %vm360_vm0, %v5523_v25  ;;  %v7389_v21 = vpack.c.bf16 %v2075_v20, %v2074_v19 }
 0x133   : > { %7432 = vmatpush3.bf16.msra.mxu1 %v7429_v18  ;;  %7390 = vmatprep.subr.bf16.mxu0 %v7389_v21 }
 0x134   : > { %6690 = vmatmul.mubr.msk.f32.gmra.mrb[28].mxu0 %vm360_vm0, %v5524_v55  ;;  %7434 = vmatprep.subr.bf16.mxu1 %v7433_v31 }
 0x135   : > { %6692 = vmatprep.mubr.msk.f32.mxu0 %vm360_vm0, %v5604_v37 }
 0x137   : > { %7436 = vmatpush3.bf16.msra.mxu1 %v7433_v31 }
 0x138   : > { %6693 = vmatmul.mubr.msk.f32.gmra.mrb[30].mxu0 %vm360_vm0, %v5605_v41  ;;  %7438 = vmatprep.subr.bf16.mxu1 %v8831_v38 }
 0x139   : > { %6711 = vmatprep.mubr.msk.f32.mxu0 %vm1594_vm4, %v1673_v6 }
 0x13c   : > { %6712 = vmatmul.mubr.msk.f32.vlgmr.msra.gmra.mrb[32].mxu0 %vm1594_vm4, %v1674_v8 }
 0x13d   : > { %7392 = vmatpush3.bf16.msra.mxu0 %v7389_v21 }
 0x13e   : > { %7394 = vmatprep.subr.bf16.mxu0 %v7393_v24 }
 0x141   : > { %7396 = vmatpush3.bf16.msra.mxu0 %v7393_v24 }
 0x142   : > { %7398 = vmatprep.subr.bf16.mxu0 %v7397_v30 }
 0x145   : > { %7400 = vmatpush3.bf16.msra.mxu0 %v7397_v30 }
 0x146   : > { %7402 = vmatprep.subr.bf16.mxu0 %v7401_v34 }
 0x149   : > { %7404 = vmatpush3.bf16.msra.mxu0 %v7401_v34 }
 0x14a   : > { %7502 = vmatprep.subr.bf16.mxu0 %v8834_v43 }
 0x1cf   : > { %v6649_v45 = vpop.f32.mrb[0].mxu0 }
 0x1d0   : > { %v7525_v48 = vadd.f32 %v6649_v45, %v8840_v44  ;;  %v1307_v49 = vpop.f32.mrb[1].mxu0 }
 0x1d1   : > { %v7526_v50 = vadd.f32 %v8840_v44, %v1307_v49 }
 0x1d2   : > { %vm1499_vm7 = vcmp.ge.f32.partialorder %v7525_v48, 0.0  ;;  %v1531_v53 = vmul.f32 0.2, %v7525_v48 }
 0x1d3   : > { %vm1498_vm8 = vcmp.ge.f32.partialorder %v7526_v50, 0.0  ;;  %v1530_v54 = vmul.f32 0.2, %v7526_v50  ;;  %v6652_v25 = vpop.f32.mrb[2].mxu0 }
 0x1d4   : > { %v1563_v55 = vsel %vm1499_vm7, %v7525_v48, %v1531_v53  ;;  %v7527_v37 = vadd.f32 %v6652_v25, %v8840_v44  ;;  %v1317_v41 = vpop.f32.mrb[3].mxu0 }
 0x1d5   : > { %1642 = vst.msk [vmem:[#allocation2 + $0x21] sm:$0xff] %vm1594_vm4, %v1563_v55  ;;  %v1562_v42 = vsel %vm1498_vm8, %v7526_v50, %v1530_v54  ;;  %v7528_v46 = vadd.f32 %v8840_v44, %v1317_v41 }
 0x1d6   : > { %1641 = vst.msk [vmem:[#allocation2 + $0x19] sm:$0xff] %vm1594_vm4, %v1562_v42  ;;  %vm1501_vm9 = vcmp.ge.f32.partialorder %v7527_v37, 0.0  ;;  %v1533_v47 = vmul.f32 0.2, %v7527_v37 }
 0x1d7   : > { %vm1500_vm10 = vcmp.ge.f32.partialorder %v7528_v46, 0.0  ;;  %v1532_v51 = vmul.f32 0.2, %v7528_v46  ;;  %v6655_v52 = vpop.f32.mrb[4].mxu0 }
 0x1d8   : > { %v1565_v56 = vsel %vm1501_vm9, %v7527_v37, %v1533_v47  ;;  %v7529_v57 = vadd.f32 %v6655_v52, %v8840_v44  ;;  %v1327_v58 = vpop.f32.mrb[5].mxu0 }
 0x1d9   : > { %1644 = vst.msk [vmem:[#allocation2 + $0x39] sm:$0xff] %vm1594_vm4, %v1565_v56  ;;  %v1564_v59 = vsel %vm1500_vm10, %v7528_v46, %v1532_v51  ;;  %v7530_v60 = vadd.f32 %v8840_v44, %v1327_v58 }
 0x1da   : > { %1643 = vst.msk [vmem:[#allocation2 + $0x31] sm:$0xff] %vm1594_vm4, %v1564_v59  ;;  %vm1503_vm11 = vcmp.ge.f32.partialorder %v7529_v57, 0.0  ;;  %v1535_v61 = vmul.f32 0.2, %v7529_v57 }
 0x1db   : > { %vm1502_vm12 = vcmp.ge.f32.partialorder %v7530_v60, 0.0  ;;  %v1534_v62 = vmul.f32 0.2, %v7530_v60  ;;  %v6658_v63 = vpop.f32.mrb[6].mxu0 }
 0x1dc   : > { %v1567_v0 = vsel %vm1503_vm11, %v7529_v57, %v1535_v61  ;;  %v7531_v1 = vadd.f32 %v6658_v63, %v8840_v44  ;;  %v1337_v2 = vpop.f32.mrb[7].mxu0  ;;  %v2438_v9 = vld [vmem:[#allocation2 + $0x22] sm:$0xff] }
 0x1dd   : > { %1646 = vst.msk [vmem:[#allocation2 + $0x51] sm:$0xff] %vm1594_vm4, %v1567_v0  ;;  %v1566_v3 = vsel %vm1502_vm12, %v7530_v60, %v1534_v62  ;;  %v7532_v4 = vadd.f32 %v8840_v44, %v1337_v2  ;;  %v8855_v5 = vld [vmem:[#allocation2 + $0x18] sm:$0xff]  ;;  %v8857_v7 = vld [vmem:[#allocation2 + $0x20] sm:$0xff] }
 0x1de   : > { %v2437_v6 = vld [vmem:[#allocation2 + $0x1a] sm:$0xff]  ;;  %1645 = vst.msk [vmem:[#allocation2 + $0x49] sm:$0xff] %vm1594_vm4, %v1566_v3  ;;  %vm1505_vm13 = vcmp.ge.f32.partialorder %v7531_v1, 0.0  ;;  %v1537_v8 = vmul.f32 0.2, %v7531_v1  ;;  %6714 = vmatprep.mubr.msk.f32.mxu0 %vm1594_vm4, %v8855_v5 }
 0x1df   : > { %6842 = vmatprep.mubr.msk.f32.mxu1 %vm1594_vm4, %v2437_v6  ;;  %vm1504_vm14 = vcmp.ge.f32.partialorder %v7532_v4, 0.0  ;;  %v1536_v10 = vmul.f32 0.2, %v7532_v4  ;;  %v6661_v11 = vpop.f32.mrb[8].mxu0  ;;  %6715 = vmatmul.mubr.msk.f32.gmra.mrb[34].mxu0 %vm1594_vm4, %v8857_v7 }
 0x1e0   : > { %6843 = vmatmul.mubr.msk.f32.gmra.mrb[2].mxu1 %vm1594_vm4, %v2438_v9  ;;  %v1569_v12 = vsel %vm1505_vm13, %v7531_v1, %v1537_v8  ;;  %v7533_v13 = vadd.f32 %v6661_v11, %v8840_v44  ;;  %v1347_v14 = vpop.f32.mrb[9].mxu0  ;;  %v8880_v21 = vld [vmem:[#allocation2 + $0x3a] sm:$0xff] }
 0x1e1   : > { %1648 = vst.msk [vmem:[#allocation2 + $0x69] sm:$0xff] %vm1594_vm4, %v1569_v12  ;;  %v1568_v15 = vsel %vm1504_vm14, %v7532_v4, %v1536_v10  ;;  %v7534_v16 = vadd.f32 %v8840_v44, %v1347_v14  ;;  %v8869_v17 = vld [vmem:[#allocation2 + $0x30] sm:$0xff]  ;;  %v8873_v19 = vld [vmem:[#allocation2 + $0x38] sm:$0xff] }
 0x1e2   : > { %v8871_v18 = vld [vmem:[#allocation2 + $0x32] sm:$0xff]  ;;  %1647 = vst.msk [vmem:[#allocation2 + $0x61] sm:$0xff] %vm1594_vm4, %v1568_v15  ;;  %vm1507_vm15 = vcmp.ge.f32.partialorder %v7533_v13, 0.0  ;;  %v1539_v20 = vmul.f32 0.2, %v7533_v13  ;;  %6717 = vmatprep.mubr.msk.f32.mxu0 %vm1594_vm4, %v8869_v17 }
 0x1e3   : > { %6845 = vmatprep.mubr.msk.f32.mxu1 %vm1594_vm4, %v8871_v18  ;;  %vm1506_vm0 = vcmp.ge.f32.partialorder %v7534_v16, 0.0  ;;  %v1538_v22 = vmul.f32 0.2, %v7534_v16  ;;  %v6664_v23 = vpop.f32.mrb[10].mxu0  ;;  %6718 = vmatmul.mubr.msk.f32.gmra.mrb[36].mxu0 %vm1594_vm4, %v8873_v19 }
 0x1e4   : > { %6846 = vmatmul.mubr.msk.f32.gmra.mrb[4].mxu1 %vm1594_vm4, %v8880_v21  ;;  %v1571_v24 = vsel %vm1507_vm15, %v7533_v13, %v1539_v20  ;;  %v7535_v26 = vadd.f32 %v6664_v23, %v8840_v44  ;;  %v1357_v27 = vpop.f32.mrb[11].mxu0  ;;  %v8900_v34 = vld [vmem:[#allocation2 + $0x52] sm:$0xff] }
 0x1e5   : > { %1650 = vst.msk [vmem:[#allocation2 + $0x81] sm:$0xff] %vm1594_vm4, %v1571_v24  ;;  %v1570_v28 = vsel %vm1506_vm0, %v7534_v16, %v1538_v22  ;;  %v7536_v29 = vadd.f32 %v8840_v44, %v1357_v27  ;;  %v8889_v30 = vld [vmem:[#allocation2 + $0x48] sm:$0xff]  ;;  %v8893_v32 = vld [vmem:[#allocation2 + $0x50] sm:$0xff] }
 0x1e6   : > { %v8891_v31 = vld [vmem:[#allocation2 + $0x4a] sm:$0xff]  ;;  %1649 = vst.msk [vmem:[#allocation2 + $0x79] sm:$0xff] %vm1594_vm4, %v1570_v28  ;;  %vm1509_vm1 = vcmp.ge.f32.partialorder %v7535_v26, 0.0  ;;  %v1541_v33 = vmul.f32 0.2, %v7535_v26  ;;  %6720 = vmatprep.mubr.msk.f32.mxu0 %vm1594_vm4, %v8889_v30 }
 0x1e7   : > { %6848 = vmatprep.mubr.msk.f32.mxu1 %vm1594_vm4, %v8891_v31  ;;  %vm1508_vm2 = vcmp.ge.f32.partialorder %v7536_v29, 0.0  ;;  %v1540_v35 = vmul.f32 0.2, %v7536_v29  ;;  %v6667_v36 = vpop.f32.mrb[12].mxu0  ;;  %6721 = vmatmul.mubr.msk.f32.gmra.mrb[38].mxu0 %vm1594_vm4, %v8893_v32 }
 0x1e8   : > { %6849 = vmatmul.mubr.msk.f32.gmra.mrb[6].mxu1 %vm1594_vm4, %v8900_v34  ;;  %v1573_v39 = vsel %vm1509_vm1, %v7535_v26, %v1541_v33  ;;  %v7537_v40 = vadd.f32 %v6667_v36, %v8840_v44  ;;  %v1367_v45 = vpop.f32.mrb[13].mxu0  ;;  %v8920_v55 = vld [vmem:[#allocation2 + $0x6a] sm:$0xff] }
 0x1e9   : > { %1652 = vst.msk [vmem:[#allocation2 + $0x99] sm:$0xff] %vm1594_vm4, %v1573_v39  ;;  %v1572_v48 = vsel %vm1508_vm2, %v7536_v29, %v1540_v35  ;;  %v7538_v49 = vadd.f32 %v8840_v44, %v1367_v45  ;;  %v8909_v50 = vld [vmem:[#allocation2 + $0x60] sm:$0xff]  ;;  %v8913_v54 = vld [vmem:[#allocation2 + $0x68] sm:$0xff] }
 0x1ea   : > { %v8911_v53 = vld [vmem:[#allocation2 + $0x62] sm:$0xff]  ;;  %1651 = vst.msk [vmem:[#allocation2 + $0x91] sm:$0xff] %vm1594_vm4, %v1572_v48  ;;  %vm1511_vm3 = vcmp.ge.f32.partialorder %v7537_v40, 0.0  ;;  %v1543_v25 = vmul.f32 0.2, %v7537_v40  ;;  %6723 = vmatprep.mubr.msk.f32.mxu0 %vm1594_vm4, %v8909_v50 }
 0x1eb   : > { %6851 = vmatprep.mubr.msk.f32.mxu1 %vm1594_vm4, %v8911_v53  ;;  %vm1510_vm5 = vcmp.ge.f32.partialorder %v7538_v49, 0.0  ;;  %v1542_v37 = vmul.f32 0.2, %v7538_v49  ;;  %v6670_v41 = vpop.f32.mrb[14].mxu0  ;;  %6724 = vmatmul.mubr.msk.f32.gmra.mrb[40].mxu0 %vm1594_vm4, %v8913_v54 }
 0x1ec   : > { %6852 = vmatmul.mubr.msk.f32.gmra.mrb[8].mxu1 %vm1594_vm4, %v8920_v55  ;;  %v1575_v42 = vsel %vm1511_vm3, %v7537_v40, %v1543_v25  ;;  %v7539_v46 = vadd.f32 %v6670_v41, %v8840_v44  ;;  %v1377_v47 = vpop.f32.mrb[15].mxu0  ;;  %v8940_v60 = vld [vmem:[#allocation2 + $0x82] sm:$0xff] }
 0x1ed   : > { %1654 = vst.msk [vmem:[#allocation2 + $0xb1] sm:$0xff] %vm1594_vm4, %v1575_v42  ;;  %v1574_v51 = vsel %vm1510_vm5, %v7538_v49, %v1542_v37  ;;  %v7540_v52 = vadd.f32 %v8840_v44, %v1377_v47  ;;  %v8929_v56 = vld [vmem:[#allocation2 + $0x78] sm:$0xff]  ;;  %v8933_v58 = vld [vmem:[#allocation2 + $0x80] sm:$0xff] }
 0x1ee   : > { %v8931_v57 = vld [vmem:[#allocation2 + $0x7a] sm:$0xff]  ;;  %1653 = vst.msk [vmem:[#allocation2 + $0xa9] sm:$0xff] %vm1594_vm4, %v1574_v51  ;;  %vm1513_vm6 = vcmp.ge.f32.partialorder %v7539_v46, 0.0  ;;  %v1545_v59 = vmul.f32 0.2, %v7539_v46  ;;  %6726 = vmatprep.mubr.msk.f32.mxu0 %vm1594_vm4, %v8929_v56 }
 0x1ef   : > { %6854 = vmatprep.mubr.msk.f32.mxu1 %vm1594_vm4, %v8931_v57  ;;  %vm1512_vm7 = vcmp.ge.f32.partialorder %v7540_v52, 0.0  ;;  %v1544_v61 = vmul.f32 0.2, %v7540_v52  ;;  %v6673_v62 = vpop.f32.mrb[16].mxu0  ;;  %6727 = vmatmul.mubr.msk.f32.gmra.mrb[42].mxu0 %vm1594_vm4, %v8933_v58 }
 0x1f0   : > { %6855 = vmatmul.mubr.msk.f32.gmra.mrb[10].mxu1 %vm1594_vm4, %v8940_v60  ;;  %v1577_v63 = vsel %vm1513_vm6, %v7539_v46, %v1545_v59  ;;  %v7541_v0 = vadd.f32 %v6673_v62, %v8840_v44  ;;  %v1387_v1 = vpop.f32.mrb[17].mxu0  ;;  %v8960_v10 = vld [vmem:[#allocation2 + $0x9a] sm:$0xff] }
 0x1f1   : > { %1656 = vst.msk [vmem:[#allocation2 + $0xc9] sm:$0xff] %vm1594_vm4, %v1577_v63  ;;  %v1576_v2 = vsel %vm1512_vm7, %v7540_v52, %v1544_v61  ;;  %v7542_v3 = vadd.f32 %v8840_v44, %v1387_v1  ;;  %v8949_v4 = vld [vmem:[#allocation2 + $0x90] sm:$0xff]  ;;  %v8953_v8 = vld [vmem:[#allocation2 + $0x98] sm:$0xff] }
 0x1f2   : > { %v8951_v6 = vld [vmem:[#allocation2 + $0x92] sm:$0xff]  ;;  %1655 = vst.msk [vmem:[#allocation2 + $0xc1] sm:$0xff] %vm1594_vm4, %v1576_v2  ;;  %vm1515_vm8 = vcmp.ge.f32.partialorder %v7541_v0, 0.0  ;;  %v1547_v9 = vmul.f32 0.2, %v7541_v0  ;;  %6729 = vmatprep.mubr.msk.f32.mxu0 %vm1594_vm4, %v8949_v4 }
 0x1f3   : > { %6857 = vmatprep.mubr.msk.f32.mxu1 %vm1594_vm4, %v8951_v6  ;;  %vm1514_vm9 = vcmp.ge.f32.partialorder %v7542_v3, 0.0  ;;  %v1546_v11 = vmul.f32 0.2, %v7542_v3  ;;  %v6676_v12 = vpop.f32.mrb[18].mxu0  ;;  %6730 = vmatmul.mubr.msk.f32.gmra.mrb[44].mxu0 %vm1594_vm4, %v8953_v8 }
 0x1f4   : > { %6858 = vmatmul.mubr.msk.f32.gmra.mrb[12].mxu1 %vm1594_vm4, %v8960_v10  ;;  %v1579_v13 = vsel %vm1515_vm8, %v7541_v0, %v1547_v9  ;;  %v7543_v14 = vadd.f32 %v6676_v12, %v8840_v44  ;;  %v1397_v15 = vpop.f32.mrb[19].mxu0  ;;  %v8980_v27 = vld [vmem:[#allocation2 + $0xb2] sm:$0xff] }
 0x1f5   : > { %1658 = vst.msk [vmem:[#allocation2 + $0xe1] sm:$0xff] %vm1594_vm4, %v1579_v13  ;;  %v1578_v16 = vsel %vm1514_vm9, %v7542_v3, %v1546_v11  ;;  %v7544_v20 = vadd.f32 %v8840_v44, %v1397_v15  ;;  %v8969_v22 = vld [vmem:[#allocation2 + $0xa8] sm:$0xff]  ;;  %v8973_v24 = vld [vmem:[#allocation2 + $0xb0] sm:$0xff] }
 0x1f6   : > { %v8971_v23 = vld [vmem:[#allocation2 + $0xaa] sm:$0xff]  ;;  %1657 = vst.msk [vmem:[#allocation2 + $0xd9] sm:$0xff] %vm1594_vm4, %v1578_v16  ;;  %vm1517_vm10 = vcmp.ge.f32.partialorder %v7543_v14, 0.0  ;;  %v1549_v26 = vmul.f32 0.2, %v7543_v14  ;;  %6732 = vmatprep.mubr.msk.f32.mxu0 %vm1594_vm4, %v8969_v22 }
 0x1f7   : > { %6860 = vmatprep.mubr.msk.f32.mxu1 %vm1594_vm4, %v8971_v23  ;;  %vm1516_vm11 = vcmp.ge.f32.partialorder %v7544_v20, 0.0  ;;  %v1548_v28 = vmul.f32 0.2, %v7544_v20  ;;  %v6679_v29 = vpop.f32.mrb[20].mxu0  ;;  %6733 = vmatmul.mubr.msk.f32.gmra.mrb[46].mxu0 %vm1594_vm4, %v8973_v24 }
 0x1f8   : > { %6861 = vmatmul.mubr.msk.f32.gmra.mrb[14].mxu1 %vm1594_vm4, %v8980_v27  ;;  %v1581_v33 = vsel %vm1517_vm10, %v7543_v14, %v1549_v26  ;;  %v7545_v35 = vadd.f32 %v6679_v29, %v8840_v44  ;;  %v1407_v36 = vpop.f32.mrb[21].mxu0  ;;  %v9000_v37 = vld [vmem:[#allocation2 + $0xca] sm:$0xff] }
 0x1f9   : > { %1660 = vst.msk [vmem:[#allocation2 + $0xf9] sm:$0xff] %vm1594_vm4, %v1581_v33  ;;  %v1580_v39 = vsel %vm1516_vm11, %v7544_v20, %v1548_v28  ;;  %v7546_v40 = vadd.f32 %v8840_v44, %v1407_v36  ;;  %v8989_v45 = vld [vmem:[#allocation2 + $0xc0] sm:$0xff]  ;;  %v8993_v49 = vld [vmem:[#allocation2 + $0xc8] sm:$0xff] }
 0x1fa   : > { %v8991_v48 = vld [vmem:[#allocation2 + $0xc2] sm:$0xff]  ;;  %1659 = vst.msk [vmem:[#allocation2 + $0xf1] sm:$0xff] %vm1594_vm4, %v1580_v39  ;;  %vm1519_vm12 = vcmp.ge.f32.partialorder %v7545_v35, 0.0  ;;  %v1551_v25 = vmul.f32 0.2, %v7545_v35  ;;  %6735 = vmatprep.mubr.msk.f32.mxu0 %vm1594_vm4, %v8989_v45 }
 0x1fb   : > { %6863 = vmatprep.mubr.msk.f32.mxu1 %vm1594_vm4, %v8991_v48  ;;  %vm1518_vm13 = vcmp.ge.f32.partialorder %v7546_v40, 0.0  ;;  %v1550_v41 = vmul.f32 0.2, %v7546_v40  ;;  %v6682_v42 = vpop.f32.mrb[22].mxu0  ;;  %6736 = vmatmul.mubr.msk.f32.gmra.mrb[48].mxu0 %vm1594_vm4, %v8993_v49 }
 0x1fc   : > { %6864 = vmatmul.mubr.msk.f32.gmra.mrb[16].mxu1 %vm1594_vm4, %v9000_v37  ;;  %v1583_v46 = vsel %vm1519_vm12, %v7545_v35, %v1551_v25  ;;  %v7547_v47 = vadd.f32 %v6682_v42, %v8840_v44  ;;  %v1417_v51 = vpop.f32.mrb[23].mxu0  ;;  %v9020_v1 = vld [vmem:[#allocation2 + $0xe2] sm:$0xff] }
 0x1fd   : > { %1662 = vst.msk [vmem:[#allocation2 + $0x111] sm:$0xff] %vm1594_vm4, %v1583_v46  ;;  %v1582_v52 = vsel %vm1518_vm13, %v7546_v40, %v1550_v41  ;;  %v7548_v59 = vadd.f32 %v8840_v44, %v1417_v51  ;;  %v9009_v61 = vld [vmem:[#allocation2 + $0xd8] sm:$0xff]  ;;  %v9013_v63 = vld [vmem:[#allocation2 + $0xe0] sm:$0xff] }
 0x1fe   : > { %v9011_v62 = vld [vmem:[#allocation2 + $0xda] sm:$0xff]  ;;  %1661 = vst.msk [vmem:[#allocation2 + $0x109] sm:$0xff] %vm1594_vm4, %v1582_v52  ;;  %vm1521_vm14 = vcmp.ge.f32.partialorder %v7547_v47, 0.0  ;;  %v1553_v0 = vmul.f32 0.2, %v7547_v47  ;;  %6738 = vmatprep.mubr.msk.f32.mxu0 %vm1594_vm4, %v9009_v61 }
 0x1ff   : > { %6866 = vmatprep.mubr.msk.f32.mxu1 %vm1594_vm4, %v9011_v62  ;;  %vm1520_vm15 = vcmp.ge.f32.partialorder %v7548_v59, 0.0  ;;  %v1552_v2 = vmul.f32 0.2, %v7548_v59  ;;  %v6685_v3 = vpop.f32.mrb[24].mxu0  ;;  %6739 = vmatmul.mubr.msk.f32.gmra.mrb[50].mxu0 %vm1594_vm4, %v9013_v63 }
 0x200   : > { %6867 = vmatmul.mubr.msk.f32.gmra.mrb[18].mxu1 %vm1594_vm4, %v9020_v1  ;;  %v1585_v9 = vsel %vm1521_vm14, %v7547_v47, %v1553_v0  ;;  %v7549_v11 = vadd.f32 %v6685_v3, %v8840_v44  ;;  %v1427_v12 = vpop.f32.mrb[25].mxu0  ;;  %v9040_v28 = vld [vmem:[#allocation2 + $0xfa] sm:$0xff] }
 0x201   : > { %1664 = vst.msk [vmem:[#allocation2 + $0x129] sm:$0xff] %vm1594_vm4, %v1585_v9  ;;  %v1584_v13 = vsel %vm1520_vm15, %v7548_v59, %v1552_v2  ;;  %v7550_v14 = vadd.f32 %v8840_v44, %v1427_v12  ;;  %v9029_v15 = vld [vmem:[#allocation2 + $0xf0] sm:$0xff]  ;;  %v9033_v20 = vld [vmem:[#allocation2 + $0xf8] sm:$0xff] }
 0x202   : > { %v9031_v16 = vld [vmem:[#allocation2 + $0xf2] sm:$0xff]  ;;  %1663 = vst.msk [vmem:[#allocation2 + $0x121] sm:$0xff] %vm1594_vm4, %v1584_v13  ;;  %vm1523_vm0 = vcmp.ge.f32.partialorder %v7549_v11, 0.0  ;;  %v1555_v26 = vmul.f32 0.2, %v7549_v11  ;;  %6741 = vmatprep.mubr.msk.f32.mxu0 %vm1594_vm4, %v9029_v15 }
 0x203   : > { %6869 = vmatprep.mubr.msk.f32.mxu1 %vm1594_vm4, %v9031_v16  ;;  %vm1522_vm1 = vcmp.ge.f32.partialorder %v7550_v14, 0.0  ;;  %v1554_v29 = vmul.f32 0.2, %v7550_v14  ;;  %v6688_v33 = vpop.f32.mrb[26].mxu0  ;;  %6742 = vmatmul.mubr.msk.f32.gmra.mrb[52].mxu0 %vm1594_vm4, %v9033_v20 }
 0x204   : > { %6870 = vmatmul.mubr.msk.f32.gmra.mrb[20].mxu1 %vm1594_vm4, %v9040_v28  ;;  %v1587_v35 = vsel %vm1523_vm0, %v7549_v11, %v1555_v26  ;;  %v7551_v36 = vadd.f32 %v6688_v33, %v8840_v44  ;;  %v1437_v39 = vpop.f32.mrb[27].mxu0  ;;  %v9060_v51 = vld [vmem:[#allocation2 + $0x112] sm:$0xff] }
 0x205   : > { %1666 = vst.msk [vmem:[#allocation2 + $0x141] sm:$0xff] %vm1594_vm4, %v1587_v35  ;;  %v1586_v40 = vsel %vm1522_vm1, %v7550_v14, %v1554_v29  ;;  %v7552_v25 = vadd.f32 %v8840_v44, %v1437_v39  ;;  %v9049_v41 = vld [vmem:[#allocation2 + $0x108] sm:$0xff]  ;;  %v9053_v46 = vld [vmem:[#allocation2 + $0x110] sm:$0xff]  ;;  %9984 = vst [vmem:[#allocation12_spill] sm:$0xff] %v9060_v51 }
 0x206   : > { %v9051_v42 = vld [vmem:[#allocation2 + $0x10a] sm:$0xff]  ;;  %1665 = vst.msk [vmem:[#allocation2 + $0x139] sm:$0xff] %vm1594_vm4, %v1586_v40  ;;  %vm1525_vm2 = vcmp.ge.f32.partialorder %v7551_v36, 0.0  ;;  %v1557_v47 = vmul.f32 0.2, %v7551_v36  ;;  %6744 = vmatprep.mubr.msk.f32.mxu0 %vm1594_vm4, %v9049_v41 }
 0x207   : > { %6872 = vmatprep.mubr.msk.f32.mxu1 %vm1594_vm4, %v9051_v42  ;;  %vm1524_vm3 = vcmp.ge.f32.partialorder %v7552_v25, 0.0  ;;  %v1556_v52 = vmul.f32 0.2, %v7552_v25  ;;  %v6691_v59 = vpop.f32.mrb[28].mxu0  ;;  %6745 = vmatmul.mubr.msk.f32.gmra.mrb[54].mxu0 %vm1594_vm4, %v9053_v46 }
 0x208   : > { %6873 = vmatmul.mubr.msk.f32.gmra.mrb[22].mxu1 %vm1594_vm4, %v9060_v51  ;;  %v1589_v0 = vsel %vm1525_vm2, %v7551_v36, %v1557_v47  ;;  %v7553_v2 = vadd.f32 %v6691_v59, %v8840_v44  ;;  %v1447_v3 = vpop.f32.mrb[29].mxu0  ;;  %v9080_v29 = vld [vmem:[#allocation2 + $0x12a] sm:$0xff]  ;;  %v4838_v51 = vld [vmem:[#allocation6 + $0x228] sm:$0xff] }
 0x209   : > { %1668 = vst.msk [vmem:[#allocation2 + $0x159] sm:$0xff] %vm1594_vm4, %v1589_v0  ;;  %v1588_v9 = vsel %vm1524_vm3, %v7552_v25, %v1556_v52  ;;  %v7554_v11 = vadd.f32 %v8840_v44, %v1447_v3  ;;  %v9069_v12 = vld [vmem:[#allocation2 + $0x120] sm:$0xff]  ;;  %v9073_v14 = vld [vmem:[#allocation2 + $0x128] sm:$0xff]  ;;  %9986 = vst [vmem:[#allocation14_spill] sm:$0xff] %v9080_v29 }
 0x20a   : > { %v9071_v13 = vld [vmem:[#allocation2 + $0x122] sm:$0xff]  ;;  %1667 = vst.msk [vmem:[#allocation2 + $0x151] sm:$0xff] %vm1594_vm4, %v1588_v9  ;;  %vm1527_vm5 = vcmp.ge.f32.partialorder %v7553_v2, 0.0  ;;  %v1559_v26 = vmul.f32 0.2, %v7553_v2  ;;  %6747 = vmatprep.mubr.msk.f32.mxu0 %vm1594_vm4, %v9069_v12 }
 0x20b   : > { %9985 = vst [vmem:[#allocation13_spill] sm:$0xff] %v9071_v13  ;;  %6875 = vmatprep.mubr.msk.f32.mxu1 %vm1594_vm4, %v9071_v13  ;;  %vm1526_vm6 = vcmp.ge.f32.partialorder %v7554_v11, 0.0  ;;  %v1558_v33 = vmul.f32 0.2, %v7554_v11  ;;  %v6694_v35 = vpop.f32.mrb[30].mxu0  ;;  %6748 = vmatmul.mubr.msk.f32.gmra.mrb[56].mxu0 %vm1594_vm4, %v9073_v14  ;;  %v4837_v13 = vld [vmem:[#allocation6 + $0x220] sm:$0xff] }
 0x20c   : > { %6876 = vmatmul.mubr.msk.f32.gmra.mrb[24].mxu1 %vm1594_vm4, %v9080_v29  ;;  %v1591_v36 = vsel %vm1527_vm5, %v7553_v2, %v1559_v26  ;;  %v7555_v39 = vadd.f32 %v6694_v35, %v8840_v44  ;;  %v1457_v40 = vpop.f32.mrb[31].mxu0  ;;  %v9100_v2 = vld [vmem:[#allocation2 + $0x142] sm:$0xff] }
 0x20d   : > { %1670 = vst.msk [vmem:[#allocation2 + $0x171] sm:$0xff] %vm1594_vm4, %v1591_v36  ;;  %v1590_v25 = vsel %vm1526_vm6, %v7554_v11, %v1558_v33  ;;  %v7556_v47 = vadd.f32 %v8840_v44, %v1457_v40  ;;  %v9089_v52 = vld [vmem:[#allocation2 + $0x138] sm:$0xff]  ;;  %v9093_v0 = vld [vmem:[#allocation2 + $0x140] sm:$0xff]  ;;  %9988 = vst [vmem:[#allocation16_spill] sm:$0xff] %v9100_v2 }
 0x20e   : > { %v9091_v59 = vld [vmem:[#allocation2 + $0x13a] sm:$0xff]  ;;  %1669 = vst.msk [vmem:[#allocation2 + $0x169] sm:$0xff] %vm1594_vm4, %v1590_v25  ;;  %vm1529_vm7 = vcmp.ge.f32.partialorder %v7555_v39, 0.0  ;;  %v1561_v3 = vmul.f32 0.2, %v7555_v39  ;;  %6750 = vmatprep.mubr.msk.f32.mxu0 %vm1594_vm4, %v9089_v52 }
 0x20f   : > { %9987 = vst [vmem:[#allocation15_spill] sm:$0xff] %v9091_v59  ;;  %6878 = vmatprep.mubr.msk.f32.mxu1 %vm1594_vm4, %v9091_v59  ;;  %vm1528_vm8 = vcmp.ge.f32.partialorder %v7556_v47, 0.0  ;;  %v1560_v44 = vmul.f32 0.2, %v7556_v47  ;;  %6751 = vmatmul.mubr.msk.f32.gmra.mrb[58].mxu0 %vm1594_vm4, %v9093_v0  ;;  %v3261_v59 = vld [vmem:[#allocation6 + $0x128] sm:$0xff] }
 0x210   : > { %6879 = vmatmul.mubr.msk.f32.gmra.mrb[26].mxu1 %vm1594_vm4, %v9100_v2  ;;  %v1593_v9 = vsel %vm1529_vm7, %v7555_v39, %v1561_v3  ;;  %v9118_v36 = vld [vmem:[#allocation2 + $0x15a] sm:$0xff] }
 0x211   : > { %1672 = vst.msk [vmem:[#allocation2 + $0x189] sm:$0xff] %vm1594_vm4, %v1593_v9  ;;  %v1592_v11 = vsel %vm1528_vm8, %v7556_v47, %v1560_v44  ;;  %v9107_v26 = vld [vmem:[#allocation2 + $0x150] sm:$0xff]  ;;  %v9111_v35 = vld [vmem:[#allocation2 + $0x158] sm:$0xff]  ;;  %9990 = vst [vmem:[#allocation18_spill] sm:$0xff] %v9118_v36 }
 0x212   : > { %v9109_v33 = vld [vmem:[#allocation2 + $0x152] sm:$0xff]  ;;  %1671 = vst.msk [vmem:[#allocation2 + $0x181] sm:$0xff] %vm1594_vm4, %v1592_v11  ;;  %6753 = vmatprep.mubr.msk.f32.mxu0 %vm1594_vm4, %v9107_v26  ;;  %v2041_v39 = vld [vmem:[#allocation2 + $0x1] sm:$0xff] }
 0x213   : > { %9989 = vst [vmem:[#allocation17_spill] sm:$0xff] %v9109_v33  ;;  %6881 = vmatprep.mubr.msk.f32.mxu1 %vm1594_vm4, %v9109_v33  ;;  %6754 = vmatmul.mubr.msk.f32.gmra.mrb[60].mxu0 %vm1594_vm4, %v9111_v35  ;;  %v3258_v44 = vld [vmem:[#allocation6 + $0x110] sm:$0xff]  ;;  %v3259_v9 = vld [vmem:[#allocation6 + $0x118] sm:$0xff] }
 0x214   : > { %6882 = vmatmul.mubr.msk.f32.gmra.mrb[28].mxu1 %vm1594_vm4, %v9118_v36  ;;  %v9134_v3 = vld [vmem:[#allocation2 + $0x172] sm:$0xff]  ;;  %v4835_v11 = vld [vmem:[#allocation6 + $0x210] sm:$0xff]  ;;  %v4836_v36 = vld [vmem:[#allocation6 + $0x218] sm:$0xff]  ;;  %v7441_v2 = vpack.c.bf16 %v3259_v9, %v3258_v44 }
 0x215   : > { %v9124_v40 = vld [vmem:[#allocation2 + $0x168] sm:$0xff]  ;;  %v9128_v47 = vld [vmem:[#allocation2 + $0x170] sm:$0xff]  ;;  %9992 = vst [vmem:[#allocation20_spill] sm:$0xff] %v9134_v3  ;;  %v9143_v29 = vpack.c.bf16 %v4836_v36, %v4835_v11  ;;  %v3262_v36 = vld [vmem:[#allocation6 + $0x130] sm:$0xff] }
 0x216   : > { %v9126_v25 = vld [vmem:[#allocation2 + $0x16a] sm:$0xff]  ;;  %6756 = vmatprep.mubr.msk.f32.mxu0 %vm1594_vm4, %v9124_v40 }
 0x217   : > { %9991 = vst [vmem:[#allocation19_spill] sm:$0xff] %v9126_v25  ;;  %6884 = vmatprep.mubr.msk.f32.mxu1 %vm1594_vm4, %v9126_v25  ;;  %6757 = vmatmul.mubr.msk.f32.gmra.mrb[62].mxu0 %vm1594_vm4, %v9128_v47  ;;  %v2042_v33 = vld [vmem:[#allocation2 + $0x9] sm:$0xff]  ;;  %v9223_v11 = vld [vmem:[#allocation2 + $0x91] sm:$0xff] }
 0x218   : > { %6885 = vmatmul.mubr.msk.f32.gmra.mrb[30].mxu1 %vm1594_vm4, %v9134_v3  ;;  %6775 = vmatprep.mubr.msk.f32.mxu0 %vm1594_vm4, %v2041_v39  ;;  %v3260_v25 = vld [vmem:[#allocation6 + $0x120] sm:$0xff]  ;;  %v9148_v3 = vld [vmem:[#allocation2 + $0x19] sm:$0xff]  ;;  %v9159_v39 = vpack.c.bf16 %v4838_v51, %v4837_v13  ;;  %v4840_v44 = vld [vmem:[#allocation6 + $0x238] sm:$0xff] }
 0x219   : > { %6903 = vmatprep.mubr.msk.f32.mxu1 %vm1594_vm4, %v8855_v5  ;;  %v9156_v5 = vld [vmem:[#allocation2 + $0x21] sm:$0xff]  ;;  %v9172_v51 = vld [vmem:[#allocation2 + $0x39] sm:$0xff] }
 0x21b   : > { %6776 = vmatmul.mubr.msk.f32.vlgmr.msra.gmra.mrb[32].mxu0 %vm1594_vm4, %v2042_v33  ;;  %v7445_v33 = vpack.c.bf16 %v3261_v59, %v3260_v25  ;;  %v9181_v59 = vld [vmem:[#allocation2 + $0x49] sm:$0xff]  ;;  %v9188_v25 = vld [vmem:[#allocation2 + $0x51] sm:$0xff] }
 0x21c   : > { %6904 = vmatmul.mubr.msk.f32.vlgmr.msra.gmra.mrb[0].mxu1 %vm1594_vm4, %v8857_v7  ;;  %6778 = vmatprep.mubr.msk.f32.mxu0 %vm1594_vm4, %v9148_v3  ;;  %v3263_v7 = vld [vmem:[#allocation6 + $0x138] sm:$0xff] }
 0x21d   : > { %6906 = vmatprep.mubr.msk.f32.mxu1 %vm1594_vm4, %v8869_v17  ;;  %7440 = vmatpush3.bf16.msra.mxu1 %v8831_v38  ;;  %v9165_v17 = vld [vmem:[#allocation2 + $0x31] sm:$0xff]  ;;  %v4839_v38 = vld [vmem:[#allocation6 + $0x230] sm:$0xff]  ;;  %v7449_v13 = vpack.c.bf16 %v3263_v7, %v3262_v36 }
 0x21e   : > { %7504 = vmatpush3.bf16.msra.mxu0 %v8834_v43  ;;  %7442 = vmatprep.subr.bf16.mxu1 %v7441_v2  ;;  %v9333_v36 = vld [vmem:[#allocation2 + $0x180] sm:$0xff] }
 0x21f   : > { %7506 = vmatprep.subr.bf16.mxu0 %v9143_v29  ;;  %6779 = vmatmul.mubr.msk.f32.gmra.mrb[34].mxu0 %vm1594_vm4, %v9156_v5  ;;  %v3652_v7 = vld [vmem:[#allocation6 + $0x150] sm:$0xff] }
 0x220   : > { %6907 = vmatmul.mubr.msk.f32.gmra.mrb[2].mxu1 %vm1594_vm4, %v8873_v19  ;;  %6781 = vmatprep.mubr.msk.f32.mxu0 %vm1594_vm4, %v9165_v17  ;;  %v9175_v19 = vpack.c.bf16 %v4840_v44, %v4839_v38  ;;  %v9339_v38 = vld [vmem:[#allocation2 + $0x171] sm:$0xff]  ;;  %v9341_v44 = vld [vmem:[#allocation2 + $0x188] sm:$0xff] }
 0x221   : > { %6909 = vmatprep.mubr.msk.f32.mxu1 %vm1594_vm4, %v8889_v30  ;;  %7444 = vmatpush3.bf16.msra.mxu1 %v7441_v2  ;;  %v3650_v30 = vld [vmem:[#allocation6 + $0x140] sm:$0xff]  ;;  %v3651_v2 = vld [vmem:[#allocation6 + $0x148] sm:$0xff]  ;;  %9997 = vst [vmem:[#allocation25_spill] sm:$0xff] %v9339_v38 }
 0x222   : > { %7508 = vmatpush3.bf16.msra.mxu0 %v9143_v29  ;;  %7446 = vmatprep.subr.bf16.mxu1 %v7445_v33  ;;  %9993 = vst [vmem:[#allocation21_spill] sm:$0xff] %v9175_v19  ;;  %v9191_v9 = vpack.c.bf16 %v3651_v2, %v3650_v30  ;;  %v3654_v2 = vld [vmem:[#allocation6 + $0x160] sm:$0xff] }
 0x223   : > { %7510 = vmatprep.subr.bf16.mxu0 %v9159_v39  ;;  %6782 = vmatmul.mubr.msk.f32.gmra.mrb[36].mxu0 %vm1594_vm4, %v9172_v51 }
 0x224   : > { %6910 = vmatmul.mubr.msk.f32.gmra.mrb[4].mxu1 %vm1594_vm4, %v8893_v32  ;;  %6784 = vmatprep.mubr.msk.f32.mxu0 %vm1594_vm4, %v9181_v59  ;;  %v9197_v32 = vld [vmem:[#allocation2 + $0x61] sm:$0xff] }
 0x225   : > { %6912 = vmatprep.mubr.msk.f32.mxu1 %vm1594_vm4, %v8909_v50  ;;  %7448 = vmatpush3.bf16.msra.mxu1 %v7445_v33  ;;  %v9204_v50 = vld [vmem:[#allocation2 + $0x69] sm:$0xff] }
 0x226   : > { %7512 = vmatpush3.bf16.msra.mxu0 %v9159_v39  ;;  %7450 = vmatprep.subr.bf16.mxu1 %v7449_v13  ;;  %v9331_v33 = vld [vmem:[#allocation2 + $0x169] sm:$0xff] }
 0x227   : > { %7514 = vmatprep.subr.bf16.mxu0 %v9175_v19  ;;  %6785 = vmatmul.mubr.msk.f32.gmra.mrb[38].mxu0 %vm1594_vm4, %v9188_v25  ;;  %9996 = vst [vmem:[#allocation24_spill] sm:$0xff] %v9331_v33 }
 0x228   : > { %6913 = vmatmul.mubr.msk.f32.gmra.mrb[6].mxu1 %vm1594_vm4, %v8913_v54  ;;  %6787 = vmatprep.mubr.msk.f32.mxu0 %vm1594_vm4, %v9197_v32  ;;  %v9211_v54 = vld [vmem:[#allocation2 + $0x79] sm:$0xff] }
 0x229   : > { %6915 = vmatprep.mubr.msk.f32.mxu1 %vm1594_vm4, %v8929_v56  ;;  %7452 = vmatpush3.bf16.msra.mxu1 %v7449_v13  ;;  %v9217_v56 = vld [vmem:[#allocation2 + $0x81] sm:$0xff] }
 0x22a   : > { %7516 = vmatpush3.bf16.msra.mxu0 %v9175_v19  ;;  %7454 = vmatprep.subr.bf16.mxu1 %v9191_v9  ;;  %v3653_v13 = vld [vmem:[#allocation6 + $0x158] sm:$0xff]  ;;  %v3655_v19 = vld [vmem:[#allocation6 + $0x168] sm:$0xff] }
 0x22b   : > { %6788 = vmatmul.mubr.msk.f32.gmra.mrb[40].mxu0 %vm1594_vm4, %v9204_v50  ;;  %v7457_v30 = vpack.c.bf16 %v3653_v13, %v3652_v7  ;;  %v10006_v7 = vld [vmem:[#allocation20_spill] sm:$0xff]  ;;  %v9464_v13 = vld [vmem:[#allocation2 + $0x181] sm:$0xff] }
 0x22c   : > { %6916 = vmatmul.mubr.msk.f32.gmra.mrb[8].mxu1 %vm1594_vm4, %v8933_v58  ;;  %6790 = vmatprep.mubr.msk.f32.mxu0 %vm1594_vm4, %v9211_v54  ;;  %v9229_v58 = vld [vmem:[#allocation2 + $0x99] sm:$0xff] }
 0x22d   : > { %6918 = vmatprep.mubr.msk.f32.mxu1 %vm1594_vm4, %v8949_v4  ;;  %v9235_v4 = vld [vmem:[#allocation2 + $0xa9] sm:$0xff] }
 0x22f   : > { %6791 = vmatmul.mubr.msk.f32.gmra.mrb[42].mxu0 %vm1594_vm4, %v9217_v56 }
 0x230   : > { %6919 = vmatmul.mubr.msk.f32.gmra.mrb[10].mxu1 %vm1594_vm4, %v8953_v8  ;;  %6793 = vmatprep.mubr.msk.f32.mxu0 %vm1594_vm4, %v9223_v11  ;;  %v9241_v8 = vld [vmem:[#allocation2 + $0xb1] sm:$0xff] }
 0x231   : > { %6921 = vmatprep.mubr.msk.f32.mxu1 %vm1594_vm4, %v8969_v22  ;;  %v9247_v22 = vld [vmem:[#allocation2 + $0xc1] sm:$0xff] }
 0x233   : > { %6794 = vmatmul.mubr.msk.f32.gmra.mrb[44].mxu0 %vm1594_vm4, %v9229_v58 }
 0x234   : > { %6922 = vmatmul.mubr.msk.f32.gmra.mrb[12].mxu1 %vm1594_vm4, %v8973_v24  ;;  %6796 = vmatprep.mubr.msk.f32.mxu0 %vm1594_vm4, %v9235_v4  ;;  %v9253_v24 = vld [vmem:[#allocation2 + $0xc9] sm:$0xff] }
 0x235   : > { %6924 = vmatprep.mubr.msk.f32.mxu1 %vm1594_vm4, %v8989_v45  ;;  %v9259_v45 = vld [vmem:[#allocation2 + $0xd9] sm:$0xff] }
 0x237   : > { %6797 = vmatmul.mubr.msk.f32.gmra.mrb[46].mxu0 %vm1594_vm4, %v9241_v8 }
 0x238   : > { %6925 = vmatmul.mubr.msk.f32.gmra.mrb[14].mxu1 %vm1594_vm4, %v8993_v49  ;;  %6799 = vmatprep.mubr.msk.f32.mxu0 %vm1594_vm4, %v9247_v22  ;;  %v9265_v49 = vld [vmem:[#allocation2 + $0xe1] sm:$0xff] }
 0x239   : > { %6927 = vmatprep.mubr.msk.f32.mxu1 %vm1594_vm4, %v9009_v61  ;;  %v9271_v61 = vld [vmem:[#allocation2 + $0xf1] sm:$0xff] }
 0x23b   : > { %6800 = vmatmul.mubr.msk.f32.gmra.mrb[48].mxu0 %vm1594_vm4, %v9253_v24 }
 0x23c   : > { %6928 = vmatmul.mubr.msk.f32.gmra.mrb[16].mxu1 %vm1594_vm4, %v9013_v63  ;;  %6802 = vmatprep.mubr.msk.f32.mxu0 %vm1594_vm4, %v9259_v45  ;;  %v9277_v63 = vld [vmem:[#allocation2 + $0xf9] sm:$0xff] }
 0x23d   : > { %6930 = vmatprep.mubr.msk.f32.mxu1 %vm1594_vm4, %v9029_v15  ;;  %v9283_v15 = vld [vmem:[#allocation2 + $0x109] sm:$0xff] }
 0x23f   : > { %6803 = vmatmul.mubr.msk.f32.gmra.mrb[50].mxu0 %vm1594_vm4, %v9265_v49 }
 0x240   : > { %6931 = vmatmul.mubr.msk.f32.gmra.mrb[18].mxu1 %vm1594_vm4, %v9033_v20  ;;  %6805 = vmatprep.mubr.msk.f32.mxu0 %vm1594_vm4, %v9271_v61  ;;  %v9289_v20 = vld [vmem:[#allocation2 + $0x111] sm:$0xff] }
 0x241   : > { %6933 = vmatprep.mubr.msk.f32.mxu1 %vm1594_vm4, %v9049_v41  ;;  %v9295_v41 = vld [vmem:[#allocation2 + $0x121] sm:$0xff] }
 0x243   : > { %6806 = vmatmul.mubr.msk.f32.gmra.mrb[52].mxu0 %vm1594_vm4, %v9277_v63 }
 0x244   : > { %6934 = vmatmul.mubr.msk.f32.gmra.mrb[20].mxu1 %vm1594_vm4, %v9053_v46  ;;  %6808 = vmatprep.mubr.msk.f32.mxu0 %vm1594_vm4, %v9283_v15  ;;  %v9301_v46 = vld [vmem:[#allocation2 + $0x129] sm:$0xff] }
 0x245   : > { %6936 = vmatprep.mubr.msk.f32.mxu1 %vm1594_vm4, %v9069_v12  ;;  %v9307_v12 = vld [vmem:[#allocation2 + $0x139] sm:$0xff] }
 0x247   : > { %6809 = vmatmul.mubr.msk.f32.gmra.mrb[54].mxu0 %vm1594_vm4, %v9289_v20 }
 0x248   : > { %6937 = vmatmul.mubr.msk.f32.gmra.mrb[22].mxu1 %vm1594_vm4, %v9073_v14  ;;  %6811 = vmatprep.mubr.msk.f32.mxu0 %vm1594_vm4, %v9295_v41  ;;  %v9313_v14 = vld [vmem:[#allocation2 + $0x141] sm:$0xff] }
 0x249   : > { %6939 = vmatprep.mubr.msk.f32.mxu1 %vm1594_vm4, %v9089_v52  ;;  %v9319_v52 = vld [vmem:[#allocation2 + $0x151] sm:$0xff] }
 0x24a   : > { %9994 = vst [vmem:[#allocation22_spill] sm:$0xff] %v9319_v52 }
 0x24b   : > { %6812 = vmatmul.mubr.msk.f32.gmra.mrb[56].mxu0 %vm1594_vm4, %v9301_v46 }
 0x24c   : > { %6940 = vmatmul.mubr.msk.f32.gmra.mrb[24].mxu1 %vm1594_vm4, %v9093_v0  ;;  %6814 = vmatprep.mubr.msk.f32.mxu0 %vm1594_vm4, %v9307_v12  ;;  %v9325_v0 = vld [vmem:[#allocation2 + $0x159] sm:$0xff] }
 0x24d   : > { %6942 = vmatprep.mubr.msk.f32.mxu1 %vm1594_vm4, %v9107_v26  ;;  %9995 = vst [vmem:[#allocation23_spill] sm:$0xff] %v9325_v0 }
 0x24f   : > { %6815 = vmatmul.mubr.msk.f32.gmra.mrb[58].mxu0 %vm1594_vm4, %v9313_v14 }
 0x250   : > { %6943 = vmatmul.mubr.msk.f32.gmra.mrb[26].mxu1 %vm1594_vm4, %v9111_v35  ;;  %6817 = vmatprep.mubr.msk.f32.mxu0 %vm1594_vm4, %v9319_v52 }
 0x251   : > { %6945 = vmatprep.mubr.msk.f32.mxu1 %vm1594_vm4, %v9124_v40 }
 0x253   : > { %6818 = vmatmul.mubr.msk.f32.gmra.mrb[60].mxu0 %vm1594_vm4, %v9325_v0 }
 0x254   : > { %6946 = vmatmul.mubr.msk.f32.gmra.mrb[28].mxu1 %vm1594_vm4, %v9128_v47  ;;  %6820 = vmatprep.mubr.msk.f32.mxu0 %vm1594_vm4, %v9331_v33 }
 0x255   : > { %6948 = vmatprep.mubr.msk.f32.mxu1 %vm1594_vm4, %v9333_v36 }
 0x257   : > { %6821 = vmatmul.mubr.msk.f32.gmra.mrb[62].mxu0 %vm1594_vm4, %v9339_v38 }
 0x258   : > { %6949 = vmatmul.mubr.msk.f32.gmra.mrb[30].mxu1 %vm1594_vm4, %v9341_v44  ;;  %7223 = vmatprep.mubr.msk.f32.mxu0 %vm1594_vm4, %v8871_v18  ;;  %v3656_v18 = vld [vmem:[#allocation6 + $0x170] sm:$0xff] }
 0x259   : > { %6967 = vmatprep.mubr.msk.f32.mxu1 %vm1594_vm4, %v9148_v3  ;;  %v7461_v3 = vpack.c.bf16 %v3655_v19, %v3654_v2  ;;  %v4046_v19 = vld [vmem:[#allocation6 + $0x188] sm:$0xff]  ;;  %v4047_v2 = vld [vmem:[#allocation6 + $0x190] sm:$0xff] }
 0x25b   : > { %7224 = vmatmul.mubr.msk.f32.vlgmr.msra.gmra.mrb[64].mxu0 %vm1594_vm4, %v8880_v21  ;;  %v3657_v21 = vld [vmem:[#allocation6 + $0x178] sm:$0xff] }
 0x25c   : > { %6968 = vmatmul.mubr.msk.f32.vlgmr.msra.gmra.mrb[0].mxu1 %vm1594_vm4, %v9156_v5  ;;  %7226 = vmatprep.mubr.msk.f32.mxu0 %vm1594_vm4, %v8891_v31  ;;  %v7465_v5 = vpack.c.bf16 %v3657_v21, %v3656_v18  ;;  %v4045_v31 = vld [vmem:[#allocation6 + $0x180] sm:$0xff]  ;;  %v3617_v18 = vld [vmem:[#allocation2 + $0x1a] sm:$0xff] }
 0x25d   : > { %6970 = vmatprep.mubr.msk.f32.mxu1 %vm1594_vm4, %v9165_v17  ;;  %7456 = vmatpush3.bf16.msra.mxu1 %v9191_v9  ;;  %v10005_v9 = vld [vmem:[#allocation19_spill] sm:$0xff] }
 0x25e   : > { %7458 = vmatprep.subr.bf16.mxu1 %v7457_v30 }
 0x25f   : > { %7227 = vmatmul.mubr.msk.f32.gmra.mrb[66].mxu0 %vm1594_vm4, %v8900_v34  ;;  %v7469_v34 = vpack.c.bf16 %v4046_v19, %v4045_v31  ;;  %v4049_v31 = vld [vmem:[#allocation6 + $0x1a0] sm:$0xff]  ;;  %v4050_v19 = vld [vmem:[#allocation6 + $0x1a8] sm:$0xff] }
 0x260   : > { %6971 = vmatmul.mubr.msk.f32.gmra.mrb[2].mxu1 %vm1594_vm4, %v9172_v51  ;;  %7229 = vmatprep.mubr.msk.f32.mxu0 %vm1594_vm4, %v8911_v53  ;;  %v9998_v53 = vld [vmem:[#allocation12_spill] sm:$0xff] }
 0x261   : > { %6973 = vmatprep.mubr.msk.f32.mxu1 %vm1594_vm4, %v9181_v59  ;;  %7460 = vmatpush3.bf16.msra.mxu1 %v7457_v30  ;;  %10007 = vst [vmem:[#allocation12_spill] sm:$0xff] %v9464_v13  ;;  %v9468_v30 = vld [vmem:[#allocation2 + $0x189] sm:$0xff] }
 0x262   : > { %7462 = vmatprep.subr.bf16.mxu1 %v7461_v3 }
 0x263   : > { %7230 = vmatmul.mubr.msk.f32.gmra.mrb[68].mxu0 %vm1594_vm4, %v8920_v55  ;;  %v9999_v55 = vld [vmem:[#allocation13_spill] sm:$0xff] }
 0x264   : > { %6974 = vmatmul.mubr.msk.f32.gmra.mrb[4].mxu1 %vm1594_vm4, %v9188_v25  ;;  %7232 = vmatprep.mubr.msk.f32.mxu0 %vm1594_vm4, %v8931_v57  ;;  %v10000_v57 = vld [vmem:[#allocation14_spill] sm:$0xff]  ;;  %10008 = vst [vmem:[#allocation13_spill] sm:$0xff] %v9468_v30 }
 0x265   : > { %6976 = vmatprep.mubr.msk.f32.mxu1 %vm1594_vm4, %v9197_v32  ;;  %7464 = vmatpush3.bf16.msra.mxu1 %v7461_v3  ;;  %v4048_v3 = vld [vmem:[#allocation6 + $0x198] sm:$0xff] }
 0x266   : > { %7466 = vmatprep.subr.bf16.mxu1 %v7465_v5  ;;  %v7473_v21 = vpack.c.bf16 %v4048_v3, %v4047_v2  ;;  %v3622_v3 = vld [vmem:[#allocation2 + $0x52] sm:$0xff] }
 0x267   : > { %7233 = vmatmul.mubr.msk.f32.gmra.mrb[70].mxu0 %vm1594_vm4, %v8940_v60  ;;  %v10001_v60 = vld [vmem:[#allocation15_spill] sm:$0xff] }
 0x268   : > { %6977 = vmatmul.mubr.msk.f32.gmra.mrb[6].mxu1 %vm1594_vm4, %v9204_v50  ;;  %7235 = vmatprep.mubr.msk.f32.mxu0 %vm1594_vm4, %v8951_v6  ;;  %v10002_v6 = vld [vmem:[#allocation16_spill] sm:$0xff] }
 0x269   : > { %6979 = vmatprep.mubr.msk.f32.mxu1 %vm1594_vm4, %v9211_v54  ;;  %7468 = vmatpush3.bf16.msra.mxu1 %v7465_v5  ;;  %v3618_v5 = vld [vmem:[#allocation2 + $0x22] sm:$0xff] }
 0x26a   : > { %7470 = vmatprep.subr.bf16.mxu1 %v7469_v34 }
 0x26b   : > { %7236 = vmatmul.mubr.msk.f32.gmra.mrb[72].mxu0 %vm1594_vm4, %v8960_v10  ;;  %v10003_v10 = vld [vmem:[#allocation17_spill] sm:$0xff] }
 0x26c   : > { %6980 = vmatmul.mubr.msk.f32.gmra.mrb[8].mxu1 %vm1594_vm4, %v9217_v56  ;;  %7238 = vmatprep.mubr.msk.f32.mxu0 %vm1594_vm4, %v8971_v23  ;;  %v10004_v23 = vld [vmem:[#allocation18_spill] sm:$0xff] }
 0x26d   : > { %6982 = vmatprep.mubr.msk.f32.mxu1 %vm1594_vm4, %v9223_v11 }
 0x26f   : > { %7239 = vmatmul.mubr.msk.f32.gmra.mrb[74].mxu0 %vm1594_vm4, %v8980_v27 }
 0x270   : > { %6983 = vmatmul.mubr.msk.f32.gmra.mrb[10].mxu1 %vm1594_vm4, %v9229_v58  ;;  %7241 = vmatprep.mubr.msk.f32.mxu0 %vm1594_vm4, %v8991_v48 }
 0x271   : > { %6985 = vmatprep.mubr.msk.f32.mxu1 %vm1594_vm4, %v9235_v4 }
 0x273   : > { %7242 = vmatmul.mubr.msk.f32.gmra.mrb[76].mxu0 %vm1594_vm4, %v9000_v37 }
 0x274   : > { %6986 = vmatmul.mubr.msk.f32.gmra.mrb[12].mxu1 %vm1594_vm4, %v9241_v8  ;;  %7244 = vmatprep.mubr.msk.f32.mxu0 %vm1594_vm4, %v9011_v62 }
 0x275   : > { %6988 = vmatprep.mubr.msk.f32.mxu1 %vm1594_vm4, %v9247_v22 }
 0x277   : > { %7245 = vmatmul.mubr.msk.f32.gmra.mrb[78].mxu0 %vm1594_vm4, %v9020_v1 }
 0x278   : > { %6989 = vmatmul.mubr.msk.f32.gmra.mrb[14].mxu1 %vm1594_vm4, %v9253_v24  ;;  %7247 = vmatprep.mubr.msk.f32.mxu0 %vm1594_vm4, %v9031_v16 }
 0x279   : > { %6991 = vmatprep.mubr.msk.f32.mxu1 %vm1594_vm4, %v9259_v45 }
 0x27b   : > { %7248 = vmatmul.mubr.msk.f32.gmra.mrb[80].mxu0 %vm1594_vm4, %v9040_v28 }
 0x27c   : > { %6992 = vmatmul.mubr.msk.f32.gmra.mrb[16].mxu1 %vm1594_vm4, %v9265_v49  ;;  %7250 = vmatprep.mubr.msk.f32.mxu0 %vm1594_vm4, %v9051_v42 }
 0x27d   : > { %6994 = vmatprep.mubr.msk.f32.mxu1 %vm1594_vm4, %v9271_v61 }
 0x27f   : > { %7251 = vmatmul.mubr.msk.f32.gmra.mrb[82].mxu0 %vm1594_vm4, %v9998_v53 }
 0x280   : > { %6995 = vmatmul.mubr.msk.f32.gmra.mrb[18].mxu1 %vm1594_vm4, %v9277_v63  ;;  %7253 = vmatprep.mubr.msk.f32.mxu0 %vm1594_vm4, %v9999_v55 }
 0x281   : > { %6997 = vmatprep.mubr.msk.f32.mxu1 %vm1594_vm4, %v9283_v15 }
 0x283   : > { %7254 = vmatmul.mubr.msk.f32.gmra.mrb[84].mxu0 %vm1594_vm4, %v10000_v57 }
 0x284   : > { %6998 = vmatmul.mubr.msk.f32.gmra.mrb[20].mxu1 %vm1594_vm4, %v9289_v20  ;;  %7256 = vmatprep.mubr.msk.f32.mxu0 %vm1594_vm4, %v10001_v60 }
 0x285   : > { %7000 = vmatprep.mubr.msk.f32.mxu1 %vm1594_vm4, %v9295_v41 }
 0x287   : > { %7257 = vmatmul.mubr.msk.f32.gmra.mrb[86].mxu0 %vm1594_vm4, %v10002_v6 }
 0x288   : > { %7001 = vmatmul.mubr.msk.f32.gmra.mrb[22].mxu1 %vm1594_vm4, %v9301_v46  ;;  %7259 = vmatprep.mubr.msk.f32.mxu0 %vm1594_vm4, %v10003_v10 }
 0x289   : > { %7003 = vmatprep.mubr.msk.f32.mxu1 %vm1594_vm4, %v9307_v12 }
 0x28b   : > { %7260 = vmatmul.mubr.msk.f32.gmra.mrb[88].mxu0 %vm1594_vm4, %v10004_v23 }
 0x28c   : > { %7004 = vmatmul.mubr.msk.f32.gmra.mrb[24].mxu1 %vm1594_vm4, %v9313_v14  ;;  %7262 = vmatprep.mubr.msk.f32.mxu0 %vm1594_vm4, %v10005_v9 }
 0x28d   : > { %7006 = vmatprep.mubr.msk.f32.mxu1 %vm1594_vm4, %v9319_v52  ;;  %v4052_v52 = vld [vmem:[#allocation6 + $0x1b8] sm:$0xff] }
 0x28f   : > { %7263 = vmatmul.mubr.msk.f32.gmra.mrb[90].mxu0 %vm1594_vm4, %v10006_v7 }
 0x290   : > { %7007 = vmatmul.mubr.msk.f32.gmra.mrb[26].mxu1 %vm1594_vm4, %v9325_v0  ;;  %v4051_v0 = vld [vmem:[#allocation6 + $0x1b0] sm:$0xff] }
 0x291   : > { %7009 = vmatprep.mubr.msk.f32.mxu1 %vm1594_vm4, %v9331_v33  ;;  %v3620_v33 = vld [vmem:[#allocation2 + $0x3a] sm:$0xff]  ;;  %v7481_v2 = vpack.c.bf16 %v4052_v52, %v4051_v0  ;;  %v3626_v52 = vld [vmem:[#allocation2 + $0x82] sm:$0xff]  ;;  %v3627_v0 = vld [vmem:[#allocation2 + $0x92] sm:$0xff] }
 0x294   : > { %7010 = vmatmul.mubr.msk.f32.gmra.mrb[28].mxu1 %vm1594_vm4, %v9339_v38  ;;  %v3619_v38 = vld [vmem:[#allocation2 + $0x32] sm:$0xff] }
 0x295   : > { %7012 = vmatprep.mubr.msk.f32.mxu1 %vm1594_vm4, %v9464_v13  ;;  %v7477_v13 = vpack.c.bf16 %v4050_v19, %v4049_v31  ;;  %v3624_v31 = vld [vmem:[#allocation2 + $0x6a] sm:$0xff]  ;;  %v4019_v19 = vld [vmem:[#allocation2 + $0x80] sm:$0xff] }
 0x298   : > { %7013 = vmatmul.mubr.msk.f32.gmra.mrb[30].mxu1 %vm1594_vm4, %v9468_v30  ;;  %v3621_v30 = vld [vmem:[#allocation2 + $0x4a] sm:$0xff] }
 0x299   : > { %7031 = vmatprep.mubr.msk.f32.mxu1 %vm1594_vm4, %v3617_v18  ;;  %v4439_v18 = vld [vmem:[#allocation6 + $0x1c0] sm:$0xff] }
 0x29c   : > { %7032 = vmatmul.mubr.msk.f32.vlgmr.msra.gmra.mrb[0].mxu1 %vm1594_vm4, %v3618_v5  ;;  %v4440_v5 = vld [vmem:[#allocation6 + $0x1c8] sm:$0xff] }
 0x29d   : > { %7034 = vmatprep.mubr.msk.f32.mxu1 %vm1594_vm4, %v3619_v38  ;;  %7472 = vmatpush3.bf16.msra.mxu1 %v7469_v34  ;;  %v3623_v38 = vld [vmem:[#allocation2 + $0x62] sm:$0xff]  ;;  %v7485_v34 = vpack.c.bf16 %v4440_v5, %v4439_v18  ;;  %v4023_v5 = vld [vmem:[#allocation2 + $0xb0] sm:$0xff] }
 0x29e   : > { %7474 = vmatprep.subr.bf16.mxu1 %v7473_v21  ;;  %v4022_v18 = vld [vmem:[#allocation2 + $0xa8] sm:$0xff] }
 0x2a0   : > { %7035 = vmatmul.mubr.msk.f32.gmra.mrb[2].mxu1 %vm1594_vm4, %v3620_v33  ;;  %v3625_v33 = vld [vmem:[#allocation2 + $0x7a] sm:$0xff] }
 0x2a1   : > { %7037 = vmatprep.mubr.msk.f32.mxu1 %vm1594_vm4, %v3621_v30  ;;  %7476 = vmatpush3.bf16.msra.mxu1 %v7473_v21  ;;  %v3628_v30 = vld [vmem:[#allocation2 + $0x9a] sm:$0xff] }
 0x2a2   : > { %7478 = vmatprep.subr.bf16.mxu1 %v7477_v13  ;;  %v4018_v21 = vld [vmem:[#allocation2 + $0x78] sm:$0xff] }
 0x2a4   : > { %7038 = vmatmul.mubr.msk.f32.gmra.mrb[4].mxu1 %vm1594_vm4, %v3622_v3  ;;  %v4021_v3 = vld [vmem:[#allocation2 + $0x98] sm:$0xff] }
 0x2a5   : > { %7040 = vmatprep.mubr.msk.f32.mxu1 %vm1594_vm4, %v3623_v38  ;;  %7480 = vmatpush3.bf16.msra.mxu1 %v7477_v13  ;;  %v3629_v13 = vld [vmem:[#allocation2 + $0xaa] sm:$0xff] }
 0x2a6   : > { %7482 = vmatprep.subr.bf16.mxu1 %v7481_v2 }
 0x2a8   : > { %7041 = vmatmul.mubr.msk.f32.gmra.mrb[6].mxu1 %vm1594_vm4, %v3624_v31 }
 0x2a9   : > { %7043 = vmatprep.mubr.msk.f32.mxu1 %vm1594_vm4, %v3625_v33  ;;  %7484 = vmatpush3.bf16.msra.mxu1 %v7481_v2  ;;  %v4020_v2 = vld [vmem:[#allocation2 + $0x90] sm:$0xff] }
 0x2aa   : > { %7486 = vmatprep.subr.bf16.mxu1 %v7485_v34 }
 0x2ac   : > { %7044 = vmatmul.mubr.msk.f32.gmra.mrb[8].mxu1 %vm1594_vm4, %v3626_v52  ;;  %v4025_v52 = vld [vmem:[#allocation2 + $0xc8] sm:$0xff] }
 0x2ad   : > { %7046 = vmatprep.mubr.msk.f32.mxu1 %vm1594_vm4, %v3627_v0 }
 0x2b0   : > { %7047 = vmatmul.mubr.msk.f32.gmra.mrb[10].mxu1 %vm1594_vm4, %v3628_v30  ;;  %v4026_v30 = vld [vmem:[#allocation2 + $0xd8] sm:$0xff] }
 0x2b1   : > { %7049 = vmatprep.mubr.msk.f32.mxu1 %vm1594_vm4, %v3629_v13 }
 0x2b4   : > { %7050 = vmatmul.mubr.msk.f32.gmra.mrb[12].mxu1 %vm1594_vm4, %v8980_v27  ;;  %v9519_v27 = vld [vmem:[#allocation2 + $0x182] sm:$0xff] }
 0x2b5   : > { %7052 = vmatprep.mubr.msk.f32.mxu1 %vm1594_vm4, %v8991_v48  ;;  %v9523_v48 = vld [vmem:[#allocation2 + $0x18a] sm:$0xff] }
 0x2b8   : > { %7053 = vmatmul.mubr.msk.f32.gmra.mrb[14].mxu1 %vm1594_vm4, %v9000_v37  ;;  %v4441_v37 = vld [vmem:[#allocation6 + $0x1d0] sm:$0xff] }
 0x2b9   : > { %7055 = vmatprep.mubr.msk.f32.mxu1 %vm1594_vm4, %v9011_v62  ;;  %v4442_v62 = vld [vmem:[#allocation6 + $0x1d8] sm:$0xff] }
 0x2bc   : > { %7056 = vmatmul.mubr.msk.f32.gmra.mrb[16].mxu1 %vm1594_vm4, %v9020_v1  ;;  %v4012_v1 = vld [vmem:[#allocation2 + $0x30] sm:$0xff] }
 0x2bd   : > { %7058 = vmatprep.mubr.msk.f32.mxu1 %vm1594_vm4, %v9031_v16  ;;  %v7489_v16 = vpack.c.bf16 %v4442_v62, %v4441_v37  ;;  %v4027_v37 = vld [vmem:[#allocation2 + $0xe0] sm:$0xff] }
 0x2c0   : > { %7059 = vmatmul.mubr.msk.f32.gmra.mrb[18].mxu1 %vm1594_vm4, %v9040_v28  ;;  %v4013_v28 = vld [vmem:[#allocation2 + $0x38] sm:$0xff] }
 0x2c1   : > { %7061 = vmatprep.mubr.msk.f32.mxu1 %vm1594_vm4, %v9051_v42  ;;  %v4443_v42 = vld [vmem:[#allocation6 + $0x1e0] sm:$0xff] }
 0x2c4   : > { %7062 = vmatmul.mubr.msk.f32.gmra.mrb[20].mxu1 %vm1594_vm4, %v9998_v53  ;;  %v4444_v53 = vld [vmem:[#allocation6 + $0x1e8] sm:$0xff] }
 0x2c5   : > { %7064 = vmatprep.mubr.msk.f32.mxu1 %vm1594_vm4, %v9999_v55  ;;  %v4014_v55 = vld [vmem:[#allocation2 + $0x48] sm:$0xff] }
 0x2c8   : > { %7065 = vmatmul.mubr.msk.f32.gmra.mrb[22].mxu1 %vm1594_vm4, %v10000_v57  ;;  %v7493_v57 = vpack.c.bf16 %v4444_v53, %v4443_v42  ;;  %v4030_v53 = vld [vmem:[#allocation2 + $0x108] sm:$0xff] }
 0x2c9   : > { %7067 = vmatprep.mubr.msk.f32.mxu1 %vm1594_vm4, %v10001_v60  ;;  %v4015_v60 = vld [vmem:[#allocation2 + $0x50] sm:$0xff] }
 0x2cc   : > { %7068 = vmatmul.mubr.msk.f32.gmra.mrb[24].mxu1 %vm1594_vm4, %v10002_v6  ;;  %v4445_v6 = vld [vmem:[#allocation6 + $0x1f0] sm:$0xff] }
 0x2cd   : > { %7070 = vmatprep.mubr.msk.f32.mxu1 %vm1594_vm4, %v10003_v10  ;;  %v4446_v10 = vld [vmem:[#allocation6 + $0x1f8] sm:$0xff] }
 0x2d0   : > { %7071 = vmatmul.mubr.msk.f32.gmra.mrb[26].mxu1 %vm1594_vm4, %v10004_v23  ;;  %v4016_v23 = vld [vmem:[#allocation2 + $0x60] sm:$0xff] }
 0x2d1   : > { %7073 = vmatprep.mubr.msk.f32.mxu1 %vm1594_vm4, %v10005_v9  ;;  %v7497_v9 = vpack.c.bf16 %v4446_v10, %v4445_v6  ;;  %v4032_v6 = vld [vmem:[#allocation2 + $0x120] sm:$0xff] }
 0x2d4   : > { %7074 = vmatmul.mubr.msk.f32.gmra.mrb[28].mxu1 %vm1594_vm4, %v10006_v7  ;;  %v4017_v7 = vld [vmem:[#allocation2 + $0x68] sm:$0xff] }
 0x2d5   : > { %7076 = vmatprep.mubr.msk.f32.mxu1 %vm1594_vm4, %v9519_v27 }
 0x2d8   : > { %7077 = vmatmul.mubr.msk.f32.gmra.mrb[30].mxu1 %vm1594_vm4, %v9523_v48 }
 0x2d9   : > { %7095 = vmatprep.mubr.msk.f32.mxu1 %vm1594_vm4, %v4012_v1  ;;  %v4028_v1 = vld [vmem:[#allocation2 + $0xf0] sm:$0xff] }
 0x2dc   : > { %7096 = vmatmul.mubr.msk.f32.vlgmr.msra.gmra.mrb[0].mxu1 %vm1594_vm4, %v4013_v28  ;;  %v4029_v28 = vld [vmem:[#allocation2 + $0xf8] sm:$0xff] }
 0x2dd   : > { %7098 = vmatprep.mubr.msk.f32.mxu1 %vm1594_vm4, %v4014_v55  ;;  %7488 = vmatpush3.bf16.msra.mxu1 %v7485_v34  ;;  %v4024_v34 = vld [vmem:[#allocation2 + $0xc0] sm:$0xff] }
 0x2de   : > { %7490 = vmatprep.subr.bf16.mxu1 %v7489_v16 }
 0x2e0   : > { %7099 = vmatmul.mubr.msk.f32.gmra.mrb[2].mxu1 %vm1594_vm4, %v4015_v60 }
 0x2e1   : > { %7101 = vmatprep.mubr.msk.f32.mxu1 %vm1594_vm4, %v4016_v23  ;;  %7492 = vmatpush3.bf16.msra.mxu1 %v7489_v16  ;;  %v4033_v23 = vld [vmem:[#allocation2 + $0x128] sm:$0xff] }
 0x2e2   : > { %7494 = vmatprep.subr.bf16.mxu1 %v7493_v57 }
 0x2e4   : > { %7102 = vmatmul.mubr.msk.f32.gmra.mrb[4].mxu1 %vm1594_vm4, %v4017_v7  ;;  %v4034_v7 = vld [vmem:[#allocation2 + $0x138] sm:$0xff] }
 0x2e5   : > { %7104 = vmatprep.mubr.msk.f32.mxu1 %vm1594_vm4, %v4018_v21  ;;  %7496 = vmatpush3.bf16.msra.mxu1 %v7493_v57  ;;  %v4031_v57 = vld [vmem:[#allocation2 + $0x110] sm:$0xff] }
 0x2e6   : > { %7498 = vmatprep.subr.bf16.mxu1 %v7497_v9 }
 0x2e8   : > { %7105 = vmatmul.mubr.msk.f32.gmra.mrb[6].mxu1 %vm1594_vm4, %v4019_v19  ;;  %v4035_v19 = vld [vmem:[#allocation2 + $0x140] sm:$0xff] }
 0x2e9   : > { %7107 = vmatprep.mubr.msk.f32.mxu1 %vm1594_vm4, %v4020_v2  ;;  %7500 = vmatpush3.bf16.msra.mxu1 %v7497_v9 }
 0x2ea   : > { %7517 = vmatprep.subr.bf16.mxu1 %v8834_v43 }
 0x2ec   : > { %7108 = vmatmul.mubr.msk.f32.gmra.mrb[8].mxu1 %vm1594_vm4, %v4021_v3 }
 0x2ed   : > { %7110 = vmatprep.mubr.msk.f32.mxu1 %vm1594_vm4, %v4022_v18 }
 0x2ee   : > { %v9539_v38 = vpop.f32.mrb[32].mxu0 }
 0x2ef   : > { %v9542_v31 = vpop.f32.mrb[33].mxu0 }
 0x2f0   : > { %7111 = vmatmul.mubr.msk.f32.gmra.mrb[10].mxu1 %vm1594_vm4, %v4023_v5 }
 0x2f1   : > { %7113 = vmatprep.mubr.msk.f32.mxu1 %vm1594_vm4, %v4024_v34 }
 0x2f2   : > { %v9545_v33 = vpop.f32.mrb[34].mxu0 }
 0x2f3   : > { %v9547_v0 = vpop.f32.mrb[35].mxu0 }
 0x2f4   : > { %7114 = vmatmul.mubr.msk.f32.gmra.mrb[12].mxu1 %vm1594_vm4, %v4025_v52 }
 0x2f5   : > { %7116 = vmatprep.mubr.msk.f32.mxu1 %vm1594_vm4, %v4026_v30 }
 0x2f6   : > { %v9551_v13 = vpop.f32.mrb[36].mxu0 }
 0x2f7   : > { %v9553_v62 = vpop.f32.mrb[37].mxu0 }
 0x2f8   : > { %7117 = vmatmul.mubr.msk.f32.gmra.mrb[14].mxu1 %vm1594_vm4, %v4027_v37 }
 0x2f9   : > { %7119 = vmatprep.mubr.msk.f32.mxu1 %vm1594_vm4, %v4028_v1 }
 0x2fa   : > { %v9557_v16 = vpop.f32.mrb[38].mxu0 }
 0x2fb   : > { %v9559_v42 = vpop.f32.mrb[39].mxu0 }
 0x2fc   : > { %7120 = vmatmul.mubr.msk.f32.gmra.mrb[16].mxu1 %vm1594_vm4, %v4029_v28 }
 0x2fd   : > { %7122 = vmatprep.mubr.msk.f32.mxu1 %vm1594_vm4, %v4030_v53 }
 0x2fe   : > { %v9563_v55 = vpop.f32.mrb[40].mxu0 }
 0x2ff   : > { %v9565_v60 = vpop.f32.mrb[41].mxu0 }
 0x300   : > { %7123 = vmatmul.mubr.msk.f32.gmra.mrb[18].mxu1 %vm1594_vm4, %v4031_v57 }
 0x301   : > { %7125 = vmatprep.mubr.msk.f32.mxu1 %vm1594_vm4, %v4032_v6 }
 0x302   : > { %v9569_v10 = vpop.f32.mrb[42].mxu0 }
 0x303   : > { %v9571_v9 = vpop.f32.mrb[43].mxu0 }
 0x304   : > { %7126 = vmatmul.mubr.msk.f32.gmra.mrb[20].mxu1 %vm1594_vm4, %v4033_v23 }
 0x305   : > { %7128 = vmatprep.mubr.msk.f32.mxu1 %vm1594_vm4, %v4034_v7 }
 0x306   : > { %v9575_v21 = vpop.f32.mrb[44].mxu0 }
 0x307   : > { %v9577_v2 = vpop.f32.mrb[45].mxu0 }
 0x308   : > { %7129 = vmatmul.mubr.msk.f32.gmra.mrb[22].mxu1 %vm1594_vm4, %v4035_v19 }
 0x309   : > { %7131 = vmatprep.mubr.msk.f32.mxu1 %vm1594_vm4, %v9107_v26  ;;  %v4042_v26 = vld [vmem:[#allocation2 + $0x198] sm:$0xff] }
 0x30a   : > { %v9582_v3 = vpop.f32.mrb[46].mxu0 }
 0x30b   : > { %v9584_v18 = vpop.f32.mrb[47].mxu0 }
 0x30c   : > { %7132 = vmatmul.mubr.msk.f32.gmra.mrb[24].mxu1 %vm1594_vm4, %v9111_v35  ;;  %v4043_v35 = vld [vmem:[#allocation2 + $0x1a0] sm:$0xff] }
 0x30d   : > { %7134 = vmatprep.mubr.msk.f32.mxu1 %vm1594_vm4, %v9124_v40 }
 0x30e   : > { %v9590_v5 = vpop.f32.mrb[48].mxu0 }
 0x30f   : > { %v9592_v34 = vpop.f32.mrb[49].mxu0 }
 0x310   : > { %7135 = vmatmul.mubr.msk.f32.gmra.mrb[26].mxu1 %vm1594_vm4, %v9128_v47 }
 0x311   : > { %7137 = vmatprep.mubr.msk.f32.mxu1 %vm1594_vm4, %v9333_v36 }
 0x312   : > { %v9598_v52 = vpop.f32.mrb[50].mxu0 }
 0x313   : > { %v9600_v30 = vpop.f32.mrb[51].mxu0 }
 0x314   : > { %7138 = vmatmul.mubr.msk.f32.gmra.mrb[28].mxu1 %vm1594_vm4, %v9341_v44  ;;  %v9625_v44 = vld [vmem:[%s9940_s5] ss:$0 sm:$0xff] }
 0x315   : > { %7140 = vmatprep.mubr.msk.f32.mxu1 %vm1594_vm4, %v4042_v26  ;;  %v10016_v26 = vld [vmem:[#allocation22_spill] sm:$0xff] }
 0x316   : > { %v9605_v40 = vpop.f32.mrb[52].mxu0 }
 0x317   : > { %v9607_v37 = vpop.f32.mrb[53].mxu0 }
 0x318   : > { %7141 = vmatmul.mubr.msk.f32.gmra.mrb[30].mxu1 %vm1594_vm4, %v4043_v35  ;;  %v10017_v35 = vld [vmem:[#allocation23_spill] sm:$0xff] }
 0x319   : > { %7159 = vmatprep.mubr.msk.f32.mxu1 %vm1594_vm4, %v9165_v17 }
 0x31a   : > { %v9612_v47 = vpop.f32.mrb[54].mxu0 }
 0x31b   : > { %v9614_v36 = vpop.f32.mrb[55].mxu0 }
 0x31c   : > { %7160 = vmatmul.mubr.msk.f32.vlgmr.msra.gmra.mrb[0].mxu1 %vm1594_vm4, %v9172_v51 }
 0x31d   : > { %7162 = vmatprep.mubr.msk.f32.mxu1 %vm1594_vm4, %v9181_v59  ;;  %7521 = vmatpush3.bf16.msra.mxu1 %v8834_v43 }
 0x31e   : > { %7518 = vmatprep.subr.bf16.mxu1 %v9143_v29  ;;  %v6813_v17 = vpop.f32.mrb[56].mxu0 }
 0x31f   : > { %v9628_v1 = vadd.f32 %v6813_v17, %v9625_v44  ;;  %v2364_v28 = vpop.f32.mrb[57].mxu0  ;;  %v10018_v17 = vld [vmem:[#allocation24_spill] sm:$0xff] }
 0x320   : > { %7163 = vmatmul.mubr.msk.f32.gmra.mrb[2].mxu1 %vm1594_vm4, %v9188_v25  ;;  %v9633_v51 = vadd.f32 %v9625_v44, %v2364_v28  ;;  %v10019_v28 = vld [vmem:[#allocation25_spill] sm:$0xff] }
 0x321   : > { %7165 = vmatprep.mubr.msk.f32.mxu1 %vm1594_vm4, %v9197_v32  ;;  %7522 = vmatpush3.bf16.msra.mxu1 %v9143_v29  ;;  %v10011_v32 = vld [vmem:[#allocation21_spill] sm:$0xff] }
 0x322   : > { %7519 = vmatprep.subr.bf16.mxu1 %v9159_v39  ;;  %v6816_v43 = vpop.f32.mrb[58].mxu0 }
 0x323   : > { %v9640_v59 = vadd.f32 %v6816_v43, %v9625_v44  ;;  %v2374_v53 = vpop.f32.mrb[59].mxu0  ;;  %v10020_v43 = vld [vmem:[#allocation12_spill] sm:$0xff] }
 0x324   : > { %7166 = vmatmul.mubr.msk.f32.gmra.mrb[4].mxu1 %vm1594_vm4, %v9204_v50  ;;  %v9645_v25 = vadd.f32 %v9625_v44, %v2374_v53  ;;  %v4436_v53 = vld [vmem:[#allocation2 + $0x199] sm:$0xff] }
 0x325   : > { %10009 = vst [vmem:[#allocation14_spill] sm:$0xff] %v9640_v59  ;;  %7168 = vmatprep.mubr.msk.f32.mxu1 %vm1594_vm4, %v9211_v54  ;;  %7523 = vmatpush3.bf16.msra.mxu1 %v9159_v39 }
 0x326   : > { %10010 = vst [vmem:[#allocation15_spill] sm:$0xff] %v9645_v25  ;;  %7520 = vmatprep.subr.bf16.mxu1 %v10011_v32  ;;  %v6819_v29 = vpop.f32.mrb[60].mxu0  ;;  %v7563_v25 = vadd.f32 %v9545_v33, %v9625_v44  ;;  %v7572_v33 = vadd.f32 %v9625_v44, %v9553_v62 }
 0x327   : > { %v9652_v57 = vadd.f32 %v6819_v29, %v9625_v44  ;;  %v2384_v6 = vpop.f32.mrb[61].mxu0  ;;  %v10021_v29 = vld [vmem:[#allocation13_spill] sm:$0xff] }
 0x328   : > { %7169 = vmatmul.mubr.msk.f32.gmra.mrb[6].mxu1 %vm1594_vm4, %v9217_v56  ;;  %v9657_v50 = vadd.f32 %v9625_v44, %v2384_v6 }
 0x329   : > { %10012 = vst [vmem:[#allocation16_spill] sm:$0xff] %v9652_v57  ;;  %7171 = vmatprep.mubr.msk.f32.mxu1 %vm1594_vm4, %v9223_v11  ;;  %7524 = vmatpush3.bf16.msra.mxu1 %v10011_v32 }
 0x32a   : > { %10013 = vst [vmem:[#allocation17_spill] sm:$0xff] %v9657_v50  ;;  %v6822_v54 = vpop.f32.mrb[62].mxu0 }
 0x32b   : > { %v9663_v39 = vadd.f32 %v6822_v54, %v9625_v44  ;;  %v2394_v23 = vpop.f32.mrb[63].mxu0  ;;  %v4437_v54 = vld [vmem:[#allocation2 + $0x1a1] sm:$0xff] }
 0x32c   : > { %7172 = vmatmul.mubr.msk.f32.gmra.mrb[8].mxu1 %vm1594_vm4, %v9229_v58  ;;  %v9668_v7 = vadd.f32 %v9625_v44, %v2394_v23 }
 0x32d   : > { %10014 = vst [vmem:[#allocation18_spill] sm:$0xff] %v9663_v39  ;;  %7174 = vmatprep.mubr.msk.f32.mxu1 %vm1594_vm4, %v9235_v4  ;;  %v7560_v39 = vadd.f32 %v9625_v44, %v9542_v31  ;;  %v7569_v31 = vadd.f32 %v9551_v13, %v9625_v44  ;;  %v7578_v13 = vadd.f32 %v9625_v44, %v9559_v42 }
 0x32e   : > { %10015 = vst [vmem:[#allocation19_spill] sm:$0xff] %v9668_v7  ;;  %v9672_v56 = vpop.f32.mrb[64].mxu0  ;;  %v7557_v7 = vadd.f32 %v9539_v38, %v9625_v44 }
 0x32f   : > { %v9676_v11 = vpop.f32.mrb[65].mxu0 }
 0x330   : > { %7175 = vmatmul.mubr.msk.f32.gmra.mrb[10].mxu1 %vm1594_vm4, %v9241_v8 }
 0x331   : > { %7177 = vmatprep.mubr.msk.f32.mxu1 %vm1594_vm4, %v9247_v22 }
 0x332   : > { %v9680_v19 = vpop.f32.mrb[66].mxu0 }
 0x333   : > { %v9684_v58 = vpop.f32.mrb[67].mxu0 }
 0x334   : > { %7178 = vmatmul.mubr.msk.f32.gmra.mrb[12].mxu1 %vm1594_vm4, %v9253_v24 }
 0x335   : > { %7180 = vmatprep.mubr.msk.f32.mxu1 %vm1594_vm4, %v9259_v45 }
 0x336   : > { %v9688_v4 = vpop.f32.mrb[68].mxu0 }
 0x337   : > { %v9692_v8 = vpop.f32.mrb[69].mxu0 }
 0x338   : > { %7181 = vmatmul.mubr.msk.f32.gmra.mrb[14].mxu1 %vm1594_vm4, %v9265_v49 }
 0x339   : > { %7183 = vmatprep.mubr.msk.f32.mxu1 %vm1594_vm4, %v9271_v61 }
 0x33a   : > { %v9696_v22 = vpop.f32.mrb[70].mxu0 }
 0x33b   : > { %v9700_v24 = vpop.f32.mrb[71].mxu0 }
 0x33c   : > { %7184 = vmatmul.mubr.msk.f32.gmra.mrb[16].mxu1 %vm1594_vm4, %v9277_v63 }
 0x33d   : > { %7186 = vmatprep.mubr.msk.f32.mxu1 %vm1594_vm4, %v9283_v15 }
 0x33e   : > { %v9704_v45 = vpop.f32.mrb[72].mxu0 }
 0x33f   : > { %v9708_v49 = vpop.f32.mrb[73].mxu0 }
 0x340   : > { %7187 = vmatmul.mubr.msk.f32.gmra.mrb[18].mxu1 %vm1594_vm4, %v9289_v20 }
 0x341   : > { %7189 = vmatprep.mubr.msk.f32.mxu1 %vm1594_vm4, %v9295_v41 }
 0x342   : > { %v9712_v61 = vpop.f32.mrb[74].mxu0 }
 0x343   : > { %v9716_v63 = vpop.f32.mrb[75].mxu0 }
 0x344   : > { %7190 = vmatmul.mubr.msk.f32.gmra.mrb[20].mxu1 %vm1594_vm4, %v9301_v46 }
 0x345   : > { %7192 = vmatprep.mubr.msk.f32.mxu1 %vm1594_vm4, %v9307_v12 }
 0x346   : > { %v9720_v15 = vpop.f32.mrb[76].mxu0 }
 0x347   : > { %v9724_v20 = vpop.f32.mrb[77].mxu0 }
 0x348   : > { %7193 = vmatmul.mubr.msk.f32.gmra.mrb[22].mxu1 %vm1594_vm4, %v9313_v14 }
 0x349   : > { %7195 = vmatprep.mubr.msk.f32.mxu1 %vm1594_vm4, %v10016_v26 }
 0x34a   : > { %v9728_v41 = vpop.f32.mrb[78].mxu0 }
 0x34b   : > { %v9732_v46 = vpop.f32.mrb[79].mxu0 }
 0x34c   : > { %7196 = vmatmul.mubr.msk.f32.gmra.mrb[24].mxu1 %vm1594_vm4, %v10017_v35  ;;  %v4830_v35 = vld [vmem:[#allocation2 + $0x19a] sm:$0xff] }
 0x34d   : > { %7198 = vmatprep.mubr.msk.f32.mxu1 %vm1594_vm4, %v10018_v17 }
 0x34e   : > { %v9736_v12 = vpop.f32.mrb[80].mxu0 }
 0x34f   : > { %v9740_v14 = vpop.f32.mrb[81].mxu0 }
 0x350   : > { %7199 = vmatmul.mubr.msk.f32.gmra.mrb[26].mxu1 %vm1594_vm4, %v10019_v28 }
 0x351   : > { %7201 = vmatprep.mubr.msk.f32.mxu1 %vm1594_vm4, %v10020_v43  ;;  %v4831_v43 = vld [vmem:[#allocation2 + $0x1a2] sm:$0xff] }
 0x352   : > { %v9744_v32 = vpop.f32.mrb[82].mxu0 }
 0x353   : > { %v9748_v6 = vpop.f32.mrb[83].mxu0 }
 0x354   : > { %7202 = vmatmul.mubr.msk.f32.gmra.mrb[28].mxu1 %vm1594_vm4, %v10021_v29 }
 0x355   : > { %7204 = vmatprep.mubr.msk.f32.mxu1 %vm1594_vm4, %v4436_v53 }
 0x356   : > { %v9751_v23 = vpop.f32.mrb[84].mxu0 }
 0x357   : > { %v9754_v26 = vpop.f32.mrb[85].mxu0 }
 0x358   : > { %7205 = vmatmul.mubr.msk.f32.gmra.mrb[30].mxu1 %vm1594_vm4, %v4437_v54 }
 0x359   : > { %7265 = vmatprep.mubr.msk.f32.mxu1 %vm1594_vm4, %v9519_v27 }
 0x35a   : > { %v9758_v17 = vpop.f32.mrb[86].mxu0 }
 0x35b   : > { %v9760_v28 = vpop.f32.mrb[87].mxu0 }
 0x35c   : > { %7266 = vmatmul.mubr.msk.f32.vlgmr.msra.gmra.mrb[28].mxu1 %vm1594_vm4, %v9523_v48 }
 0x35d   : > { %7268 = vmatprep.mubr.msk.f32.mxu1 %vm1594_vm4, %v4830_v35 }
 0x35e   : > { %v9765_v53 = vpop.f32.mrb[88].mxu0 }
 0x35f   : > { %10022 = vst [vmem:[#allocation20_spill] sm:$0xff] %v9765_v53  ;;  %v9767_v29 = vpop.f32.mrb[89].mxu0 }
 0x360   : > { %10023 = vst [vmem:[#allocation21_spill] sm:$0xff] %v9767_v29  ;;  %7269 = vmatmul.mubr.msk.f32.gmra.mrb[30].mxu1 %vm1594_vm4, %v4831_v43  ;;  %v7566_v43 = vadd.f32 %v9625_v44, %v9547_v0 }
 0x362   : > { %v9770_v54 = vpop.f32.mrb[90].mxu0 }
 0x363   : > { %10024 = vst [vmem:[#allocation22_spill] sm:$0xff] %v9770_v54  ;;  %v9772_v27 = vpop.f32.mrb[91].mxu0 }
 0x364   : > { %10025 = vst [vmem:[#allocation23_spill] sm:$0xff] %v9772_v27 }
 0x3ef   : > { %v7161_v48 = vpop.f32.mrb[0].mxu1 }
 0x3f0   : > { %v7558_v50 = vadd.f32 %v7557_v7, %v7161_v48  ;;  %v4609_v35 = vpop.f32.mrb[1].mxu1 }
 0x3f1   : > { %v7561_v57 = vadd.f32 %v7560_v39, %v4609_v35 }
 0x3f2   : > { %v7559_v59 = vadd.f32 %v7558_v50, %v9672_v56 }
 0x3f3   : > { %v7164_v54 = vpop.f32.mrb[2].mxu1  ;;  %v7562_v27 = vadd.f32 %v7561_v57, %v9676_v11 }
 0x3f4   : > { %v7564_v29 = vadd.f32 %v7563_v25, %v7164_v54  ;;  %v4619_v38 = vpop.f32.mrb[3].mxu1  ;;  %v7575_v25 = vadd.f32 %v9557_v16, %v9625_v44  ;;  %v7584_v16 = vadd.f32 %v9625_v44, %v9565_v60 }
 0x3f5   : > { %v7567_v53 = vadd.f32 %v7566_v43, %v4619_v38  ;;  %5194 = vxpose.xlu0.b32.start [1/16] (narrow) %v7562_v27, 64 }
 0x3f6   : > { %v7565_v39 = vadd.f32 %v7564_v29, %v9680_v19 }
 0x3f7   : > { %v7167_v7 = vpop.f32.mrb[4].mxu1  ;;  %v7568_v50 = vadd.f32 %v7567_v53, %v9684_v58  ;;  %v7581_v58 = vadd.f32 %v9563_v55, %v9625_v44  ;;  %v7590_v55 = vadd.f32 %v9625_v44, %v9571_v9 }
 0x3f8   : > { %v7570_v56 = vadd.f32 %v7569_v31, %v7167_v7  ;;  %v4629_v0 = vpop.f32.mrb[5].mxu1 }
 0x3f9   : > { %v7573_v48 = vadd.f32 %v7572_v33, %v4629_v0  ;;  %5195 = vxpose.xlu0.b32.cont [2/16] (narrow) %v7559_v59, 64 }
 0x3fa   : > { %v7571_v57 = vadd.f32 %v7570_v56, %v9688_v4 }
 0x3fb   : > { %v7170_v11 = vpop.f32.mrb[6].mxu1  ;;  %v7574_v19 = vadd.f32 %v7573_v48, %v9692_v8  ;;  %v7587_v8 = vadd.f32 %v9569_v10, %v9625_v44  ;;  %v7596_v10 = vadd.f32 %v9625_v44, %v9577_v2 }
 0x3fc   : > { %v7576_v29 = vadd.f32 %v7575_v25, %v7170_v11  ;;  %v4639_v62 = vpop.f32.mrb[7].mxu1 }
 0x3fd   : > { %v7579_v54 = vadd.f32 %v7578_v13, %v4639_v62  ;;  %5196 = vxpose.xlu0.b32.cont [3/16] (narrow) %v7568_v50, 64 }
 0x3fe   : > { %v7577_v59 = vadd.f32 %v7576_v29, %v9696_v22 }
 0x3ff   : > { %v7173_v53 = vpop.f32.mrb[8].mxu1  ;;  %v7580_v4 = vadd.f32 %v7579_v54, %v9700_v24  ;;  %v7593_v24 = vadd.f32 %v9575_v21, %v9625_v44  ;;  %v7602_v21 = vadd.f32 %v9625_v44, %v9584_v18 }
 0x400   : > { %v7582_v27 = vadd.f32 %v7581_v58, %v7173_v53  ;;  %v4649_v42 = vpop.f32.mrb[9].mxu1 }
 0x401   : > { %v7585_v35 = vadd.f32 %v7584_v16, %v4649_v42  ;;  %5197 = vxpose.xlu0.b32.cont [4/16] (narrow) %v7565_v39, 64 }
 0x402   : > { %v7583_v43 = vadd.f32 %v7582_v27, %v9704_v45 }
 0x403   : > { %v7176_v38 = vpop.f32.mrb[10].mxu1  ;;  %v7586_v22 = vadd.f32 %v7585_v35, %v9708_v49  ;;  %v7599_v49 = vadd.f32 %v9582_v3, %v9625_v44  ;;  %v7608_v3 = vadd.f32 %v9625_v44, %v9592_v34 }
 0x404   : > { %v7588_v31 = vadd.f32 %v7587_v8, %v7176_v38  ;;  %v4659_v60 = vpop.f32.mrb[11].mxu1 }
 0x405   : > { %v7591_v33 = vadd.f32 %v7590_v55, %v4659_v60  ;;  %5198 = vxpose.xlu0.b32.cont [5/16] (narrow) %v7574_v19, 64 }
 0x406   : > { %v7589_v39 = vadd.f32 %v7588_v31, %v9712_v61  ;;  %v10027_v31 = vld [vmem:[#allocation21_spill] sm:$0xff] }
 0x407   : > { %v7179_v7 = vpop.f32.mrb[12].mxu1  ;;  %v7592_v45 = vadd.f32 %v7591_v33, %v9716_v63  ;;  %v7605_v63 = vadd.f32 %v9590_v5, %v9625_v44  ;;  %v7614_v5 = vadd.f32 %v9625_v44, %v9600_v30  ;;  %v10028_v33 = vld [vmem:[#allocation14_spill] sm:$0xff] }
 0x408   : > { %v7594_v50 = vadd.f32 %v7593_v24, %v7179_v7  ;;  %v4669_v9 = vpop.f32.mrb[13].mxu1  ;;  %v10029_v7 = vld [vmem:[#allocation15_spill] sm:$0xff] }
 0x409   : > { %v7597_v56 = vadd.f32 %v7596_v10, %v4669_v9  ;;  %5199 = vxpose.xlu0.b32.cont [6/16] (narrow) %v7571_v57, 64 }
 0x40a   : > { %v9817_v0 = vadd.f32 %v7594_v50, %v9720_v15 }
 0x40b   : > { %v7182_v61 = vpop.f32.mrb[14].mxu1  ;;  %v7598_v48 = vadd.f32 %v7597_v56, %v9724_v20  ;;  %v7611_v20 = vadd.f32 %v9598_v52, %v9625_v44  ;;  %v7620_v52 = vadd.f32 %v9625_v44, %v9607_v37 }
 0x40c   : > { %v7600_v2 = vadd.f32 %v7599_v49, %v7182_v61  ;;  %v4679_v25 = vpop.f32.mrb[15].mxu1  ;;  %v10033_v49 = vld [vmem:[#allocation17_spill] sm:$0xff] }
 0x40d   : > { %v7603_v13 = vadd.f32 %v7602_v21, %v4679_v25  ;;  %5200 = vxpose.xlu0.b32.cont [7/16] (narrow) %v7580_v4, 64 }
 0x40e   : > { %v9825_v57 = vadd.f32 %v7600_v2, %v9728_v41 }
 0x40f   : > { %v7185_v15 = vpop.f32.mrb[16].mxu1  ;;  %v7604_v11 = vadd.f32 %v7603_v13, %v9732_v46  ;;  %v7617_v46 = vadd.f32 %v9605_v40, %v9625_v44  ;;  %v7626_v40 = vadd.f32 %v9625_v44, %v9614_v36  ;;  %v10026_v36 = vld [vmem:[#allocation20_spill] sm:$0xff]  ;;  %v10035_v13 = vld [vmem:[#allocation19_spill] sm:$0xff] }
 0x410   : > { %v7606_v18 = vadd.f32 %v7605_v63, %v7185_v15  ;;  %v4689_v19 = vpop.f32.mrb[17].mxu1 }
 0x411   : > { %v7609_v29 = vadd.f32 %v7608_v3, %v4689_v19  ;;  %5201 = vxpose.xlu0.b32.cont [8/16] (narrow) %v7577_v59, 64 }
 0x412   : > { %v7607_v62 = vadd.f32 %v7606_v18, %v9736_v12 }
 0x413   : > { %v7188_v41 = vpop.f32.mrb[18].mxu1  ;;  %v7610_v54 = vadd.f32 %v7609_v29, %v9740_v14  ;;  %v7623_v14 = vadd.f32 %v9612_v47, %v9625_v44 }
 0x414   : > { %v7612_v58 = vadd.f32 %v7611_v20, %v7188_v41  ;;  %v4699_v34 = vpop.f32.mrb[19].mxu1 }
 0x415   : > { %v7615_v16 = vadd.f32 %v7614_v5, %v4699_v34  ;;  %5202 = vxpose.xlu0.b32.cont [9/16] (narrow) %v7586_v22, 64  ;;  %5226 = vxpose.xlu1.b32.start [1/16] (narrow) %v7610_v54, 64 }
 0x416   : > { %v7613_v59 = vadd.f32 %v7612_v58, %v9744_v32 }
 0x417   : > { %v7191_v12 = vpop.f32.mrb[20].mxu1  ;;  %v7616_v53 = vadd.f32 %v7615_v16, %v9748_v6 }
 0x418   : > { %v7618_v30 = vadd.f32 %v7617_v46, %v7191_v12  ;;  %v4709_v4 = vpop.f32.mrb[21].mxu1  ;;  %v5306_v12 = vld [vmem:[%s8328_s15] sm:$0xff] }
 0x419   : > { %v7621_v27 = vadd.f32 %v7620_v52, %v4709_v4  ;;  %5203 = vxpose.xlu0.b32.cont [10/16] (narrow) %v7583_v43, 64  ;;  %5227 = vxpose.xlu1.b32.cont [2/16] (narrow) %v7607_v62, 64 }
 0x41a   : > { %v7619_v42 = vadd.f32 %v7618_v30, %v9751_v23 }
 0x41b   : > { %v7194_v32 = vpop.f32.mrb[22].mxu1  ;;  %v7622_v35 = vadd.f32 %v7621_v27, %v9754_v26 }
 0x41c   : > { %v7624_v37 = vadd.f32 %v7623_v14, %v7194_v32  ;;  %v4719_v8 = vpop.f32.mrb[23].mxu1 }
 0x41d   : > { %v7627_v55 = vadd.f32 %v7626_v40, %v4719_v8  ;;  %5204 = vxpose.xlu0.b32.cont [11/16] (narrow) %v7592_v45, 64  ;;  %5228 = vxpose.xlu1.b32.cont [3/16] (narrow) %v7616_v53, 64 }
 0x41e   : > { %v7625_v6 = vadd.f32 %v7624_v37, %v9758_v17 }
 0x41f   : > { %v7197_v43 = vpop.f32.mrb[24].mxu1  ;;  %v7628_v38 = vadd.f32 %v7627_v55, %v9760_v28  ;;  %v10030_v28 = vld [vmem:[#allocation22_spill] sm:$0xff]  ;;  %v5310_v55 = vld [vmem:[%s8328_s15 + $0x20] sm:$0xff] }
 0x420   : > { %v7630_v47 = vadd.f32 %v9628_v1, %v7197_v43  ;;  %v4729_v22 = vpop.f32.mrb[25].mxu1  ;;  %v10031_v1 = vld [vmem:[#allocation23_spill] sm:$0xff] }
 0x421   : > { %v7633_v23 = vadd.f32 %v9633_v51, %v4729_v22  ;;  %5205 = vxpose.xlu0.b32.cont [12/16] (narrow) %v7589_v39, 64  ;;  %5229 = vxpose.xlu1.b32.cont [4/16] (narrow) %v7613_v59, 64  ;;  %v10032_v39 = vld [vmem:[#allocation16_spill] sm:$0xff] }
 0x422   : > { %v7631_v44 = vadd.f32 %v7630_v47, %v10026_v36 }
 0x423   : > { %v7200_v26 = vpop.f32.mrb[26].mxu1  ;;  %v7634_v60 = vadd.f32 %v7633_v23, %v10027_v31 }
 0x424   : > { %v7636_v24 = vadd.f32 %v10028_v33, %v7200_v26  ;;  %v4739_v10 = vpop.f32.mrb[27].mxu1 }
 0x425   : > { %v7639_v17 = vadd.f32 %v10029_v7, %v4739_v10  ;;  %5206 = vxpose.xlu0.b32.cont [13/16] (narrow) %v7598_v48, 64  ;;  %5230 = vxpose.xlu1.b32.cont [5/16] (narrow) %v7622_v35, 64  ;;  %v10034_v48 = vld [vmem:[#allocation18_spill] sm:$0xff] }
 0x426   : > { %v7637_v45 = vadd.f32 %v7636_v24, %v10030_v28 }
 0x427   : > { %v7640_v50 = vadd.f32 %v7639_v17, %v10031_v1 }
 0x429   : > { %5207 = vxpose.xlu0.b32.cont [14/16] (narrow) %v9817_v0, 64  ;;  %5231 = vxpose.xlu1.b32.cont [6/16] (narrow) %v7619_v42, 64  ;;  %v5308_v42 = vld [vmem:[%s8328_s15 + $0x10] sm:$0xff] }
 0x42d   : > { %5208 = vxpose.xlu0.b32.cont [15/16] (narrow) %v7604_v11, 64  ;;  %5232 = vxpose.xlu1.b32.cont [7/16] (narrow) %v7628_v38, 64 }
 0x42f   : > { %v7267_v51 = vpop.f32.mrb[28].mxu1 }
 0x430   : > { %v7642_v9 = vadd.f32 %v10032_v39, %v7267_v51  ;;  %v5143_v56 = vpop.f32.mrb[29].mxu1 }
 0x431   : > { %v7644_v21 = vadd.f32 %v10033_v49, %v5143_v56  ;;  %5209 = vxpose.xlu0.b32.end [16/16] (narrow) %v9825_v57, 64  ;;  %5233 = vxpose.xlu1.b32.cont [8/16] (narrow) %v7625_v6, 64 }
 0x433   : > { %v7270_v61 = vpop.f32.mrb[30].mxu1 }
 0x434   : > { %v7646_v2 = vadd.f32 %v10034_v48, %v7270_v61  ;;  %v5153_v25 = vpop.f32.mrb[31].mxu1  ;;  %v5307_v48 = vld [vmem:[%s8328_s15 + $0x8] sm:$0xff] }
 0x435   : > { %v7648_v63 = vadd.f32 %v10035_v13, %v5153_v25  ;;  %5234 = vxpose.xlu1.b32.cont [9/16] (narrow) %v7634_v60, 64 }
 0x439   : > { %5235 = vxpose.xlu1.b32.cont [10/16] (narrow) %v7631_v44, 64  ;;  %v5312_v44 = vld [vmem:[%s8328_s15 + $0x30] sm:$0xff] }
 0x43d   : > { %5236 = vxpose.xlu1.b32.cont [11/16] (narrow) %v7640_v50, 64 }
 0x441   : > { %5237 = vxpose.xlu1.b32.cont [12/16] (narrow) %v7637_v45, 64 }
 0x445   : > { %5238 = vxpose.xlu1.b32.cont [13/16] (narrow) %v7644_v21, 64 }
 0x449   : > { %5239 = vxpose.xlu1.b32.cont [14/16] (narrow) %v7642_v9, 64 }
 0x44d   : > { %5240 = vxpose.xlu1.b32.cont [15/16] (narrow) %v7648_v63, 64 }
 0x451   : > { %5241 = vxpose.xlu1.b32.end [16/16] (narrow) %v7646_v2, 64 }
 0x475   : > { %v5210_v0 = vpop.trf.xlu0 }
 0x476   : > { %v5258_v3 = vsub.f32 0.0, %v5210_v0 }
 0x478   : > { %v5266_v15 = vmul.f32 1.442695, %v5258_v3  ;;  %v5309_v3 = vld [vmem:[%s8328_s15 + $0x18] sm:$0xff] }
 0x479   : > { %v5211_v11 = vpop.trf.xlu0 }
 0x47a   : > { %7975 = vpow2.f32 %v5266_v15  ;;  %v5260_v57 = vsub.f32 0.0, %v5211_v11 }
 0x47c   : > { %v5270_v18 = vmul.f32 1.442695, %v5260_v57 }
 0x47d   : > { %v5212_v19 = vpop.trf.xlu0 }
 0x47e   : > { %7977 = vpow2.f32 %v5270_v18  ;;  %v5262_v29 = vsub.f32 0.0, %v5212_v19  ;;  %v5311_v18 = vld [vmem:[%s8328_s15 + $0x28] sm:$0xff] }
 0x480   : > { %v5274_v20 = vmul.f32 1.442695, %v5262_v29 }
 0x481   : > { %v5213_v62 = vpop.trf.xlu0 }
 0x482   : > { %7979 = vpow2.f32 %v5274_v20  ;;  %v5264_v5 = vsub.f32 0.0, %v5213_v62 }
 0x484   : > { %v7976_v41 = vpop.eup %7975  ;;  %v5278_v54 = vmul.f32 1.442695, %v5264_v5  ;;  %v5313_v5 = vld [vmem:[%s8328_s15 + $0x38] sm:$0xff]  ;;  %s8065_s15 = scalar_lea.vmem %s9884_s17, 1024 }
 0x485   : > { %v5282_v58 = vadd.f32 1.0, %v7976_v41  ;;  %v5214_v46 = vpop.trf.xlu0  ;;  %p8066_p6 = scmp.ne.s32.totalorder %s9884_s17, %s8065_s15  ;;  %p8073_p3 = scmp.lt.s32.totalorder %s8071_s8, %s8065_s15 }
 0x486   : > { %7981 = vpow2.f32 %v5278_v54 }
 0x487   : > { %7983 = vrcp.f32 %v5282_v58  ;;  %p8067_p8 = pnand %p8066_p6, %p8274_p12  ;;  %p8074_p7 = por %p8073_p3, %p8072_p13 }
 0x488   : > { %v7978_v34 = vpop.eup %7977 }
 0x489   : > { %v5284_v16 = vadd.f32 1.0, %v7978_v34  ;;  %v5215_v27 = vpop.trf.xlu0  ;;  %p8068_p10 = pneg %p8067_p8 }
 0x48b   : > { %7985 = vrcp.f32 %v5284_v16  ;;  %p8075_p9 = pnand %p8074_p7, %p8068_p10 }
 0x48c   : > { %v7980_v59 = vpop.eup %7979 }
 0x48d   : > { %v5286_v52 = vadd.f32 1.0, %v7980_v59  ;;  %v5216_v6 = vpop.trf.xlu0 }
 0x48f   : > { %7987 = vrcp.f32 %v5286_v52 }
 0x490   : > { %v7982_v53 = vpop.eup %7981 }
 0x491   : > { %v7984_v30 = vpop.eup %7983  ;;  %v5288_v4 = vadd.f32 1.0, %v7982_v53  ;;  %v5217_v24 = vpop.trf.xlu0 }
 0x492   : > { %v5314_v14 = vmul.f32 %v7984_v30, %v5306_v12 }
 0x493   : > { %7989 = vrcp.f32 %v5288_v4 }
 0x494   : > { %v5322_v40 = vadd.f32 %v5314_v14, %v5214_v46 }
 0x495   : > { %v7986_v32 = vpop.eup %7985  ;;  %v5242_v35 = vpop.trf.xlu1 }
 0x496   : > { %v5259_v37 = vsub.f32 0.0, %v5242_v35  ;;  %5330 = vst [vmem:[%s9868_s20] sm:$0xff] %v5322_v40  ;;  %v5316_v8 = vmul.f32 %v7986_v32, %v5308_v42 }
 0x498   : > { %v5268_v43 = vmul.f32 1.442695, %v5259_v37  ;;  %v5324_v38 = vadd.f32 %v5316_v8, %v5215_v27 }
 0x499   : > { %v7988_v47 = vpop.eup %7987  ;;  %v5243_v22 = vpop.trf.xlu1 }
 0x49a   : > { %7991 = vpow2.f32 %v5268_v43  ;;  %v5261_v23 = vsub.f32 0.0, %v5243_v22  ;;  %5332 = vst [vmem:[%s9868_s20 + $0x10] sm:$0xff] %v5324_v38  ;;  %v5318_v36 = vmul.f32 %v7988_v47, %v5310_v55 }
 0x49c   : > { %v5272_v26 = vmul.f32 1.442695, %v5261_v23  ;;  %v5326_v31 = vadd.f32 %v5318_v36, %v5216_v6 }
 0x49d   : > { %v7990_v60 = vpop.eup %7989  ;;  %v5244_v33 = vpop.trf.xlu1 }
 0x49e   : > { %7993 = vpow2.f32 %v5272_v26  ;;  %v5263_v10 = vsub.f32 0.0, %v5244_v33  ;;  %5334 = vst [vmem:[%s9868_s20 + $0x20] sm:$0xff] %v5326_v31  ;;  %v5320_v7 = vmul.f32 %v7990_v60, %v5312_v44 }
 0x4a0   : > { %v5276_v17 = vmul.f32 1.442695, %v5263_v10  ;;  %v5328_v28 = vadd.f32 %v5320_v7, %v5217_v24 }
 0x4a1   : > { %v5245_v45 = vpop.trf.xlu1 }
 0x4a2   : > { %7995 = vpow2.f32 %v5276_v17  ;;  %v5265_v1 = vsub.f32 0.0, %v5245_v45  ;;  %5336 = vst [vmem:[%s9868_s20 + $0x30] sm:$0xff] %v5328_v28 }
 0x4a4   : > { %v7992_v50 = vpop.eup %7991  ;;  %v5280_v51 = vmul.f32 1.442695, %v5265_v1 }
 0x4a5   : > { %v5283_v39 = vadd.f32 1.0, %v7992_v50  ;;  %v5246_v49 = vpop.trf.xlu1 }
 0x4a6   : > { %7997 = vpow2.f32 %v5280_v51 }
 0x4a7   : > { %7999 = vrcp.f32 %v5283_v39 }
 0x4a8   : > { %v7994_v9 = vpop.eup %7993 }
 0x4a9   : > { %v5285_v56 = vadd.f32 1.0, %v7994_v9  ;;  %v5247_v63 = vpop.trf.xlu1 }
 0x4ab   : > { %8001 = vrcp.f32 %v5285_v56 }
 0x4ac   : > { %v7996_v21 = vpop.eup %7995 }
 0x4ad   : > { %v5287_v61 = vadd.f32 1.0, %v7996_v21  ;;  %v5248_v19 = vpop.trf.xlu1 }
 0x4af   : > { %8003 = vrcp.f32 %v5287_v61 }
 0x4b0   : > { %v7998_v2 = vpop.eup %7997 }
 0x4b1   : > { %v8000_v25 = vpop.eup %7999  ;;  %v5289_v13 = vadd.f32 1.0, %v7998_v2  ;;  %v5249_v58 = vpop.trf.xlu1 }
 0x4b2   : > { %v5315_v0 = vmul.f32 %v8000_v25, %v5307_v48 }
 0x4b3   : > { %8005 = vrcp.f32 %v5289_v13 }
 0x4b4   : > { %v5323_v15 = vadd.f32 %v5315_v0, %v5246_v49 }
 0x4b5   : > { %v8002_v11 = vpop.eup %8001 }
 0x4b6   : > { %5331 = vst [vmem:[%s9868_s20 + $0x8] sm:$0xff] %v5323_v15  ;;  %v5317_v57 = vmul.f32 %v8002_v11, %v5309_v3 }
 0x4b8   : > { %v5325_v29 = vadd.f32 %v5317_v57, %v5247_v63 }
 0x4b9   : > { %v8004_v20 = vpop.eup %8003 }
 0x4ba   : > { %5333 = vst [vmem:[%s9868_s20 + $0x18] sm:$0xff] %v5325_v29  ;;  %v5319_v62 = vmul.f32 %v8004_v20, %v5311_v18 }
 0x4bc   : > { %v5327_v41 = vadd.f32 %v5319_v62, %v5248_v19 }
 0x4bd   : > { %v8006_v54 = vpop.eup %8005 }
 0x4be   : > { %5335 = vst [vmem:[%s9868_s20 + $0x28] sm:$0xff] %v5327_v41  ;;  %v5321_v34 = vmul.f32 %v8006_v54, %v5313_v5 }
 0x4c0   : > { %v5329_v16 = vadd.f32 %v5321_v34, %v5249_v58 }
 0x4c2   : > { %5337 = vst [vmem:[%s9868_s20 + $0x38] sm:$0xff] %v5329_v16 }
 0x4c3   : > { %8078 = shalt.err (!%p8075_p9)
}
 0x4c4   : > { %s8079_s18 = scalar_lea.hbm %s9890_s26, 1024  ;;  %s8083_s11 = scalar_lea.hbm %s9941_s6, 2048 }
 0x4c5   : > { %p8080_p2 = scmp.ne.s32.totalorder %s9890_s26, %s8079_s18  ;;  %p8084_p11 = scmp.lt.u32.totalorder %s9890_s26, %s9941_s6 }
 0x4c6   : > { %p8085_p1 = scmp.lt.u32.totalorder %s8083_s11, %s8079_s18  ;;  %p8087_p6 = scmp.lt.u32.totalorder %s8079_s18, %s9890_s26 }
 0x4c7   : > { %p8081_p0 = pnand %p8080_p2, %p8274_p12 }
 0x4c8   : > { %p8086_p4 = por %p8085_p1, %p8084_p11 }
 0x4c9   : > { %p8082_p5 = pneg %p8081_p0 }
 0x4ca   : > { %p8088_p8 = por %p8087_p6, %p8086_p4 }
 0x4cc   : > { %p8089_p10 = pnand %p8088_p8, %p8082_p5 }
 0x4ce   : > { %8092 = shalt.err (!%p8089_p10)
}
 0x4cf   : > { %s8146_s7 = smov 256   ;;  %s8147_s30 = smov 16  }
 0x4d0   : > { %7916 = dma.vmem_to_hbm [thread:$0]  (%p8274_p12), %s9884_s17, 1024, %s9890_s26, %s5339_s19, %s8146_s7, %s8146_s7, %s8147_s30  }
 0x4d1 PF: > { %s5367_s15 = sand.u32 1, %s8123_s21   ;;  %p10036_p13 = scmp.ne.s32.totalorder %s9972_s28, 0 }
 0x4d2   : > { %p10037_p3 = scmp.ge.s32.totalorder %s8135_s24, 2  ;;  %s5368_s25 = scalar_lea.sflag [#allocation5], %s5367_s15 }
 0x4d4   : > { %p7927_p7 = pnand %p10037_p3, %p10036_p13 }
 0x4d6   : > { %8118 = dma.done.wait (!%p7927_p7), %s5368_s25, 1024  }
 0x4d7   : > { %8120 = vsyncadd (!%p7927_p7), %s5368_s25, 4294966272  ;;  %p20_p9 = scmp.ge.s32.totalorder %s8239_s9, 4   ;;  %s10038_s21 = smov %s8127_s22 }
 0x4d8   : > { %s10039_s22 = smov %s8131_s23  ;;  %s10040_s23 = smov %s8270_s13 }
 0x4d9   : > { %s10041_s24 = smov %s8239_s9  ;;  %22 = sbr.rel (!%p20_p9) target bundleno = 6 (0x6), region = 111 }
 0x4e0   :  { %5373 = vsyncpa [#allocation4], 1 }
 0x4e1   :  { %5375 = vsyncpa [#allocation4 + $0x1], 1 }
 0x4e2   :  { %5376 = vsyncpa [#allocation7], 1 }
 0x4e3   :  { %5377 = vsyncpa [#allocation5], 1 }
 0x4e4   :  { %5379 = vsyncpa [#allocation5 + $0x1], 1 }

</bundles_post_ra>
